<compile_context>
chip_gen: v7x
topology: tpu7x:2x2x1
jax: 0.10.0
libtpu: 0.0.40
codegen_flags: <defaults>
</compile_context>

<pallas_src>
import jax
import jax.numpy as jnp
from jax.experimental import pallas as pl
from jax.experimental.pallas import tpu as pltpu

NEG_SLOPE = 0.2      # PyG GATConv LeakyReLU default
MASK_VAL = -1e30


def _leaky_relu(x):
    return jnp.where(x > 0, x, NEG_SLOPE * x)


def _recip(x):
    # EUP reciprocal (co-issues with VPU/MXU work) + one Newton step -> ~f32 accurate,
    # no VPU divide.
    r = pl.reciprocal(x, approx=True)
    return r * (2.0 - x * r)


def _masked_softmax_rows(e, mask):
    # Softmax over incoming edges (axis=1).  Precondition: every row has at least one
    # unmasked entry (guaranteed here: adj always includes self-loops).
    # NOTE: on v6e/v7x the [N,N] e/alpha tensors could be bf16 (halves VPU/EUP bytes);
    # kept f32 here so the kernel matches the f32 reference at tight tolerance.
    e = jnp.where(mask, e, MASK_VAL)
    e = e - jnp.max(e, axis=1, keepdims=True)
    p = jnp.exp(e)                                 # masked entries underflow to exactly 0
    return p * _recip(jnp.sum(p, axis=1, keepdims=True))


def gat_kernel(x_ref, adj_ref, w1_ref, att1_ref, b1_ref,
               w2_ref, att2_ref, b2_ref, out_ref):
    # One graph per grid step (batch axis squeezed out of the refs).
    x = x_ref[...]                                          # [N, F_in]
    mask = adj_ref[...].astype(jnp.float32) > 0.0           # [N, N] bool, computed once
    n = x.shape[0]
    heads = att1_ref.shape[1] // 2
    hid = att1_ref.shape[0] // heads
    c = w2_ref.shape[1]

    # ---------- Layer 1: GATConv(F_in -> hid, heads=H, concat=True) ----------
    h_all = jnp.dot(x, w1_ref[...], preferred_element_type=jnp.float32)      # [N, H*hid]
    # All per-head src/dst attention scores in a single matmul (vectorized over heads).
    s1 = jnp.dot(h_all, att1_ref[...], preferred_element_type=jnp.float32)   # [N, 2H]
    s_dst = s1[:, :heads]                                   # [N, H]  score of target i
    s_src_t = s1[:, heads:].T                               # [H, N]  one tiny transpose

    b1 = b1_ref[...]                                        # [1, H*hid]
    # Fused "concat + layer-2 matmul": x1 @ W2 distributes over head slabs, so the
    # [N, H*hid] concatenation is never materialized; accumulate straight into h2.
    h2 = jnp.zeros((n, c), jnp.float32)
    # heads is a small static constant -> fully unrolled loop (== fori_loop(unroll=True));
    # each head's [N, N] intermediates are consumed immediately.
    # TODO(synk): for large N, move heads to a grid axis and tile destination rows with
    # an online softmax over source tiles (size tiles for v7x's 64 MiB VMEM).
    for h in range(heads):
        sl = slice(h * hid, (h + 1) * hid)
        hh = h_all[:, sl]                                                    # [N, hid]
        e = _leaky_relu(s_dst[:, h:h + 1] + s_src_t[h:h + 1, :])             # [N, N]
        alpha = _masked_softmax_rows(e, mask)                                # [N, N]
        x1_h = jnp.dot(alpha, hh, preferred_element_type=jnp.float32) + b1[:, sl]
        x1_h = jnp.where(x1_h > 0, x1_h, jnp.exp(x1_h) - 1.0)                # F.elu
        h2 = h2 + jnp.dot(x1_h, w2_ref[sl, :],
                          preferred_element_type=jnp.float32)                # [N, C]

    # ---------- Layer 2: GATConv(H*hid -> C, heads=1, concat=False) ----------
    s2 = jnp.dot(h2, att2_ref[...], preferred_element_type=jnp.float32)      # [N, 2]
    e2 = _leaky_relu(s2[:, 0:1] + s2.T[1:2, :])
    alpha2 = _masked_softmax_rows(e2, mask)
    out = jnp.dot(alpha2, h2, preferred_element_type=jnp.float32) + b2_ref[...]

    # ---------- log_softmax over classes (dim=1) ----------
    out = out - jnp.max(out, axis=1, keepdims=True)
    out = out - jnp.log(jnp.sum(jnp.exp(out), axis=1, keepdims=True))
    out_ref[...] = out.astype(out_ref.dtype)
    # TODO(synk): output is only C=4 lanes wide (masked vst); pad classes to 128 lanes
    # if the store ever becomes material at scale.


def _pack_att1(a_dst, a_src):
    """[H, hid] x 2 -> [H*hid, 2H] block-diagonal score-projection matrix."""
    heads, hid = a_dst.shape
    eye = jnp.eye(heads, dtype=a_dst.dtype)                                  # [H, H]
    blk_dst = (a_dst[:, :, None] * eye[:, None, :]).reshape(heads * hid, heads)
    blk_src = (a_src[:, :, None] * eye[:, None, :]).reshape(heads * hid, heads)
    return jnp.concatenate([blk_dst, blk_src], axis=1)                       # [H*hid, 2H]


def gat_forward(x, adj, params):
    b, n, f_in = x.shape
    c = params["W2"].shape[1]

    att1 = _pack_att1(params["a_dst1"], params["a_src1"])                    # [H*hid, 2H]
    att2 = jnp.stack([params["a_dst2"][0], params["a_src2"][0]], axis=1)     # [C, 2]

    args = (x, adj.astype(jnp.int8),
            params["W1"], att1, params["b1"],
            params["W2"], att2, params["b2"])

    def full_spec(a):
        # Whole (small) parameter resident in VMEM; constant index map -> no re-DMA
        # across grid steps.
        return pl.BlockSpec(a.shape, lambda i: (0,) * a.ndim)

    return pl.pallas_call(
        gat_kernel,
        out_shape=jax.ShapeDtypeStruct((b, n, c), jnp.float32),
        grid=(b,),                                       # one small graph per grid step
        in_specs=[
            pl.BlockSpec((None, n, f_in), lambda i: (i, 0, 0)),   # x   (per graph)
            pl.BlockSpec((None, n, n), lambda i: (i, 0, 0)),      # adj (per graph, int8)
            full_spec(params["W1"]), full_spec(att1), full_spec(params["b1"]),
            full_spec(params["W2"]), full_spec(att2), full_spec(params["b2"]),
        ],
        out_specs=pl.BlockSpec((None, n, c), lambda i: (i, 0, 0)),
        compiler_params=pltpu.CompilerParams(
            # Graphs are independent -> shards across the 2 TensorCores on v7x;
            # harmless on v5e/v6e (1 TC).
            dimension_semantics=("parallel",),
            # Headroom above the default scoped limit (16 MiB v5e / 32 MiB v6e,v7x) so
            # mid-sized graphs stay gridless before row-tiling is needed.
            vmem_limit_bytes=64 * 1024 * 1024,
        ),
    )(*args)


# ----------------------- pure-JAX reference (for validation) -----------------------
def gat_reference(x, adj, params):
    heads1, hid = params["a_src1"].shape

    def layer(xin, adjf, W, a_src, a_dst, b, heads, concat):
        h_all = xin @ W                                   # [N, heads*out]
        out_dim = W.shape[1] // heads
        outs = []
        for h in range(heads):
            hh = h_all[:, h * out_dim:(h + 1) * out_dim]
            s_src = jnp.sum(hh * a_src[h], axis=1)        # [N]
            s_dst = jnp.sum(hh * a_dst[h], axis=1)        # [N]
            e = s_dst[:, None] + s_src[None, :]
            e = jnp.where(e > 0, e, NEG_SLOPE * e)
            e = jnp.where(adjf > 0, e, MASK_VAL)
            alpha = jax.nn.softmax(e, axis=1)
            outs.append(alpha @ hh)
        o = jnp.concatenate(outs, axis=1) if concat else sum(outs) / heads
        return o + b

    def one_graph(xg, adjg):
        x1 = layer(xg, adjg, params["W1"], params["a_src1"], params["a_dst1"],
                   params["b1"], heads1, True)
        x1 = jnp.where(x1 > 0, x1, jnp.exp(x1) - 1.0)     # F.elu
        x2 = layer(x1, adjg, params["W2"], params["a_src2"], params["a_dst2"],
                   params["b2"], 1, False)
        return jax.nn.log_softmax(x2, axis=1)

    return jax.vmap(one_graph)(x, adj.astype(jnp.float32))


def glorot(key, shape):
    fan_in, fan_out = shape[0], shape[-1]
    lim = (6.0 / (fan_in + fan_out)) ** 0.5
    return jax.random.uniform(key, shape, jnp.float32, -lim, lim)


if __name__ == "__main__":
    B = 4           # batch of small graphs (amortizes launch/DMA overhead via the grid)
    N = 32          # nodes per graph
    F_IN = 16       # dataset.num_features
    HID = 8         # self.hid
    HEADS = 8       # self.in_head
    C = 4           # dataset.num_classes

    key = jax.random.PRNGKey(0)
    k = jax.random.split(key, 10)

    # node features
    x = jax.random.normal(k[0], (B, N, F_IN), jnp.float32)

    # synthetic edge_index materialized as a dense int8 adjacency mask with self-loops
    # TODO(synk): sparse edge_index gather / scatter-softmax replaced by dense adj mask
    adj = jax.random.uniform(k[1], (B, N, N)) < 0.2
    adj = jnp.logical_or(adj, jnp.eye(N, dtype=bool)[None, :, :])
    adj = adj.astype(jnp.int8)

    params = {
        "W1":      glorot(k[2], (F_IN, HEADS * HID)),
        "a_src1":  glorot(k[3], (HEADS, HID)),
        "a_dst1":  glorot(k[4], (HEADS, HID)),
        "b1":      jnp.zeros((1, HEADS * HID), jnp.float32),
        "W2":      glorot(k[5], (HEADS * HID, C)),
        "a_src2":  glorot(k[6], (1, C)),
        "a_dst2":  glorot(k[7], (1, C)),
        "b2":      jnp.zeros((1, C), jnp.float32),
    }

    out = jax.block_until_ready(gat_forward(x, adj, params))
    ref = jax.block_until_ready(gat_reference(x, adj, params))

    assert out.shape == (B, N, C)
    assert bool(jnp.all(jnp.isfinite(out)))
    assert bool(jnp.allclose(out, ref, rtol=1e-4, atol=1e-4)), "mismatch vs JAX reference"
    print("KERNEL_OK")
</pallas_src>

<mosaic_0001>
module attributes {stable_mosaic.version = 11 : i64} {
  func.func @gat_kernel(%arg0: i32, %arg1: memref<1x32x16xf32, #tpu.memory_space<vmem>>, %arg2: memref<1x32x32xi8, #tpu.memory_space<vmem>>, %arg3: memref<16x64xf32, #tpu.memory_space<vmem>>, %arg4: memref<64x16xf32, #tpu.memory_space<vmem>>, %arg5: memref<1x64xf32, #tpu.memory_space<vmem>>, %arg6: memref<64x4xf32, #tpu.memory_space<vmem>>, %arg7: memref<4x2xf32, #tpu.memory_space<vmem>>, %arg8: memref<1x4xf32, #tpu.memory_space<vmem>>, %arg9: memref<1x32x4xf32, #tpu.memory_space<vmem>>) attributes {dimension_semantics = [#tpu.dimension_semantics<parallel>], iteration_bounds = array<i64: 4>, scalar_prefetch = 0 : i64, scratch_operands = 0 : i64, tpu.core_type = #tpu.core_type<tc>, window_params = [{transform_indices = @transform_0, window_bounds = array<i64: 1, 32, 16>}, {transform_indices = @transform_1, window_bounds = array<i64: 1, 32, 32>}, {pipeline_mode = #tpu.pipeline_mode<synchronous>, transform_indices = @transform_2, window_bounds = array<i64: 16, 64>}, {pipeline_mode = #tpu.pipeline_mode<synchronous>, transform_indices = @transform_3, window_bounds = array<i64: 64, 16>}, {pipeline_mode = #tpu.pipeline_mode<synchronous>, transform_indices = @transform_4, window_bounds = array<i64: 1, 64>}, {pipeline_mode = #tpu.pipeline_mode<synchronous>, transform_indices = @transform_5, window_bounds = array<i64: 64, 4>}, {pipeline_mode = #tpu.pipeline_mode<synchronous>, transform_indices = @transform_6, window_bounds = array<i64: 4, 2>}, {pipeline_mode = #tpu.pipeline_mode<synchronous>, transform_indices = @transform_7, window_bounds = array<i64: 1, 4>}, {transform_indices = @transform_8, window_bounds = array<i64: 1, 32, 4>}]} {
    %c0 = arith.constant 0 : index
    %c0_0 = arith.constant 0 : index
    %c0_1 = arith.constant 0 : index
    %0 = vector.load %arg1[%c0, %c0_0, %c0_1] : memref<1x32x16xf32, #tpu.memory_space<vmem>>, vector<1x32x16xf32>
    %1 = vector.shape_cast %0 : vector<1x32x16xf32> to vector<32x16xf32>
    %c0_2 = arith.constant 0 : index
    %c0_3 = arith.constant 0 : index
    %c0_4 = arith.constant 0 : index
    %2 = vector.load %arg2[%c0_2, %c0_3, %c0_4] : memref<1x32x32xi8, #tpu.memory_space<vmem>>, vector<1x32x32xi8>
    %3 = vector.shape_cast %2 : vector<1x32x32xi8> to vector<32x32xi8>
    %4 = arith.sitofp %3 : vector<32x32xi8> to vector<32x32xf32>
    %cst = arith.constant 0.000000e+00 : f32
    %5 = vector.broadcast %cst : f32 to vector<32x32xf32>
    %6 = arith.cmpf ogt, %4, %5 : vector<32x32xf32>
    %c0_5 = arith.constant 0 : index
    %c0_6 = arith.constant 0 : index
    %7 = vector.load %arg3[%c0_5, %c0_6] : memref<16x64xf32, #tpu.memory_space<vmem>>, vector<16x64xf32>
    %cst_7 = arith.constant dense<0.000000e+00> : vector<32x64xf32>
    %8 = tpu.matmul %1, %7, %cst_7 {dimension_numbers = #tpu.dot_dimension_numbers<[1], [0], [0], [1], [0, 0, 1, 1], [], []>} : vector<32x16xf32>, vector<16x64xf32>, vector<32x64xf32> -> vector<32x64xf32>
    %c0_8 = arith.constant 0 : index
    %c0_9 = arith.constant 0 : index
    %9 = vector.load %arg4[%c0_8, %c0_9] : memref<64x16xf32, #tpu.memory_space<vmem>>, vector<64x16xf32>
    %cst_10 = arith.constant dense<0.000000e+00> : vector<32x16xf32>
    %10 = tpu.matmul %8, %9, %cst_10 {dimension_numbers = #tpu.dot_dimension_numbers<[1], [0], [0], [1], [0, 0, 1, 1], [], []>} : vector<32x64xf32>, vector<64x16xf32>, vector<32x16xf32> -> vector<32x16xf32>
    %11 = vector.extract_strided_slice %10 {offsets = [0, 0], sizes = [32, 8], strides = [1, 1]} : vector<32x16xf32> to vector<32x8xf32>
    %12 = vector.extract_strided_slice %10 {offsets = [0, 8], sizes = [32, 8], strides = [1, 1]} : vector<32x16xf32> to vector<32x8xf32>
    %13 = tpu.transpose %12, [1, 0] : vector<32x8xf32> -> vector<8x32xf32>
    %c0_11 = arith.constant 0 : index
    %c0_12 = arith.constant 0 : index
    %14 = vector.load %arg5[%c0_11, %c0_12] : memref<1x64xf32, #tpu.memory_space<vmem>>, vector<1x64xf32>
    %cst_13 = arith.constant 0.000000e+00 : f32
    %15 = vector.broadcast %cst_13 : f32 to vector<32x4xf32>
    %16 = vector.extract_strided_slice %8 {offsets = [0, 0], sizes = [32, 8], strides = [1, 1]} : vector<32x64xf32> to vector<32x8xf32>
    %17 = vector.extract_strided_slice %11 {offsets = [0, 0], sizes = [32, 1], strides = [1, 1]} : vector<32x8xf32> to vector<32x1xf32>
    %18 = vector.extract_strided_slice %13 {offsets = [0, 0], sizes = [1, 32], strides = [1, 1]} : vector<8x32xf32> to vector<1x32xf32>
    %19 = vector.broadcast %17 : vector<32x1xf32> to vector<32x32xf32>
    %20 = vector.broadcast %18 : vector<1x32xf32> to vector<32x32xf32>
    %21 = arith.addf %19, %20 : vector<32x32xf32>
    %cst_14 = arith.constant 0.000000e+00 : f32
    %22 = vector.broadcast %cst_14 : f32 to vector<32x32xf32>
    %23 = arith.cmpf ogt, %21, %22 : vector<32x32xf32>
    %cst_15 = arith.constant 2.000000e-01 : f32
    %24 = vector.broadcast %cst_15 : f32 to vector<32x32xf32>
    %25 = arith.mulf %24, %21 : vector<32x32xf32>
    %26 = arith.select %23, %21, %25 : vector<32x32xi1>, vector<32x32xf32>
    %cst_16 = arith.constant -1.000000e+30 : f32
    %27 = vector.broadcast %cst_16 : f32 to vector<32x32xf32>
    %28 = arith.select %6, %26, %27 : vector<32x32xi1>, vector<32x32xf32>
    %cst_17 = arith.constant dense<0xFF800000> : vector<32xf32>
    %29 = vector.multi_reduction <maximumf>, %28, %cst_17 [1] : vector<32x32xf32> to vector<32xf32>
    %30 = vector.shape_cast %29 : vector<32xf32> to vector<32x1xf32>
    %31 = vector.broadcast %30 : vector<32x1xf32> to vector<32x32xf32>
    %32 = arith.subf %28, %31 : vector<32x32xf32>
    %33 = math.exp %32 : vector<32x32xf32>
    %cst_18 = arith.constant dense<0.000000e+00> : vector<32xf32>
    %34 = vector.multi_reduction <add>, %33, %cst_18 [1] : vector<32x32xf32> to vector<32xf32>
    %35 = vector.shape_cast %34 : vector<32xf32> to vector<32x1xf32>
    %36 = tpu.reciprocal %35 {approx = true} : vector<32x1xf32> -> vector<32x1xf32>
    %37 = arith.mulf %35, %36 : vector<32x1xf32>
    %cst_19 = arith.constant 2.000000e+00 : f32
    %38 = vector.broadcast %cst_19 : f32 to vector<32x1xf32>
    %39 = arith.subf %38, %37 : vector<32x1xf32>
    %40 = arith.mulf %36, %39 : vector<32x1xf32>
    %41 = vector.broadcast %40 : vector<32x1xf32> to vector<32x32xf32>
    %42 = arith.mulf %33, %41 : vector<32x32xf32>
    %cst_20 = arith.constant dense<0.000000e+00> : vector<32x8xf32>
    %43 = tpu.matmul %42, %16, %cst_20 {dimension_numbers = #tpu.dot_dimension_numbers<[1], [0], [0], [1], [0, 0, 1, 1], [], []>} : vector<32x32xf32>, vector<32x8xf32>, vector<32x8xf32> -> vector<32x8xf32>
    %44 = vector.extract_strided_slice %14 {offsets = [0, 0], sizes = [1, 8], strides = [1, 1]} : vector<1x64xf32> to vector<1x8xf32>
    %45 = vector.broadcast %44 : vector<1x8xf32> to vector<32x8xf32>
    %46 = arith.addf %43, %45 : vector<32x8xf32>
    %cst_21 = arith.constant 0.000000e+00 : f32
    %47 = vector.broadcast %cst_21 : f32 to vector<32x8xf32>
    %48 = arith.cmpf ogt, %46, %47 : vector<32x8xf32>
    %49 = math.exp %46 : vector<32x8xf32>
    %cst_22 = arith.constant 1.000000e+00 : f32
    %50 = vector.broadcast %cst_22 : f32 to vector<32x8xf32>
    %51 = arith.subf %49, %50 : vector<32x8xf32>
    %52 = arith.select %48, %46, %51 : vector<32x8xi1>, vector<32x8xf32>
    %c0_23 = arith.constant 0 : index
    %c0_24 = arith.constant 0 : index
    %53 = vector.load %arg6[%c0_23, %c0_24] : memref<64x4xf32, #tpu.memory_space<vmem>>, vector<8x4xf32>
    %cst_25 = arith.constant dense<0.000000e+00> : vector<32x4xf32>
    %54 = tpu.matmul %52, %53, %cst_25 {dimension_numbers = #tpu.dot_dimension_numbers<[1], [0], [0], [1], [0, 0, 1, 1], [], []>} : vector<32x8xf32>, vector<8x4xf32>, vector<32x4xf32> -> vector<32x4xf32>
    %55 = arith.addf %15, %54 : vector<32x4xf32>
    %56 = vector.extract_strided_slice %8 {offsets = [0, 8], sizes = [32, 8], strides = [1, 1]} : vector<32x64xf32> to vector<32x8xf32>
    %57 = vector.extract_strided_slice %11 {offsets = [0, 1], sizes = [32, 1], strides = [1, 1]} : vector<32x8xf32> to vector<32x1xf32>
    %58 = vector.extract_strided_slice %13 {offsets = [1, 0], sizes = [1, 32], strides = [1, 1]} : vector<8x32xf32> to vector<1x32xf32>
    %59 = vector.broadcast %57 : vector<32x1xf32> to vector<32x32xf32>
    %60 = vector.broadcast %58 : vector<1x32xf32> to vector<32x32xf32>
    %61 = arith.addf %59, %60 : vector<32x32xf32>
    %cst_26 = arith.constant 0.000000e+00 : f32
    %62 = vector.broadcast %cst_26 : f32 to vector<32x32xf32>
    %63 = arith.cmpf ogt, %61, %62 : vector<32x32xf32>
    %cst_27 = arith.constant 2.000000e-01 : f32
    %64 = vector.broadcast %cst_27 : f32 to vector<32x32xf32>
    %65 = arith.mulf %64, %61 : vector<32x32xf32>
    %66 = arith.select %63, %61, %65 : vector<32x32xi1>, vector<32x32xf32>
    %cst_28 = arith.constant -1.000000e+30 : f32
    %67 = vector.broadcast %cst_28 : f32 to vector<32x32xf32>
    %68 = arith.select %6, %66, %67 : vector<32x32xi1>, vector<32x32xf32>
    %cst_29 = arith.constant dense<0xFF800000> : vector<32xf32>
    %69 = vector.multi_reduction <maximumf>, %68, %cst_29 [1] : vector<32x32xf32> to vector<32xf32>
    %70 = vector.shape_cast %69 : vector<32xf32> to vector<32x1xf32>
    %71 = vector.broadcast %70 : vector<32x1xf32> to vector<32x32xf32>
    %72 = arith.subf %68, %71 : vector<32x32xf32>
    %73 = math.exp %72 : vector<32x32xf32>
    %cst_30 = arith.constant dense<0.000000e+00> : vector<32xf32>
    %74 = vector.multi_reduction <add>, %73, %cst_30 [1] : vector<32x32xf32> to vector<32xf32>
    %75 = vector.shape_cast %74 : vector<32xf32> to vector<32x1xf32>
    %76 = tpu.reciprocal %75 {approx = true} : vector<32x1xf32> -> vector<32x1xf32>
    %77 = arith.mulf %75, %76 : vector<32x1xf32>
    %cst_31 = arith.constant 2.000000e+00 : f32
    %78 = vector.broadcast %cst_31 : f32 to vector<32x1xf32>
    %79 = arith.subf %78, %77 : vector<32x1xf32>
    %80 = arith.mulf %76, %79 : vector<32x1xf32>
    %81 = vector.broadcast %80 : vector<32x1xf32> to vector<32x32xf32>
    %82 = arith.mulf %73, %81 : vector<32x32xf32>
    %cst_32 = arith.constant dense<0.000000e+00> : vector<32x8xf32>
    %83 = tpu.matmul %82, %56, %cst_32 {dimension_numbers = #tpu.dot_dimension_numbers<[1], [0], [0], [1], [0, 0, 1, 1], [], []>} : vector<32x32xf32>, vector<32x8xf32>, vector<32x8xf32> -> vector<32x8xf32>
    %84 = vector.extract_strided_slice %14 {offsets = [0, 8], sizes = [1, 8], strides = [1, 1]} : vector<1x64xf32> to vector<1x8xf32>
    %85 = vector.broadcast %84 : vector<1x8xf32> to vector<32x8xf32>
    %86 = arith.addf %83, %85 : vector<32x8xf32>
    %cst_33 = arith.constant 0.000000e+00 : f32
    %87 = vector.broadcast %cst_33 : f32 to vector<32x8xf32>
    %88 = arith.cmpf ogt, %86, %87 : vector<32x8xf32>
    %89 = math.exp %86 : vector<32x8xf32>
    %cst_34 = arith.constant 1.000000e+00 : f32
    %90 = vector.broadcast %cst_34 : f32 to vector<32x8xf32>
    %91 = arith.subf %89, %90 : vector<32x8xf32>
    %92 = arith.select %88, %86, %91 : vector<32x8xi1>, vector<32x8xf32>
    %c8 = arith.constant 8 : index
    %c0_35 = arith.constant 0 : index
    %93 = vector.load %arg6[%c8, %c0_35] : memref<64x4xf32, #tpu.memory_space<vmem>>, vector<8x4xf32>
    %cst_36 = arith.constant dense<0.000000e+00> : vector<32x4xf32>
    %94 = tpu.matmul %92, %93, %cst_36 {dimension_numbers = #tpu.dot_dimension_numbers<[1], [0], [0], [1], [0, 0, 1, 1], [], []>} : vector<32x8xf32>, vector<8x4xf32>, vector<32x4xf32> -> vector<32x4xf32>
    %95 = arith.addf %55, %94 : vector<32x4xf32>
    %96 = vector.extract_strided_slice %8 {offsets = [0, 16], sizes = [32, 8], strides = [1, 1]} : vector<32x64xf32> to vector<32x8xf32>
    %97 = vector.extract_strided_slice %11 {offsets = [0, 2], sizes = [32, 1], strides = [1, 1]} : vector<32x8xf32> to vector<32x1xf32>
    %98 = vector.extract_strided_slice %13 {offsets = [2, 0], sizes = [1, 32], strides = [1, 1]} : vector<8x32xf32> to vector<1x32xf32>
    %99 = vector.broadcast %97 : vector<32x1xf32> to vector<32x32xf32>
    %100 = vector.broadcast %98 : vector<1x32xf32> to vector<32x32xf32>
    %101 = arith.addf %99, %100 : vector<32x32xf32>
    %cst_37 = arith.constant 0.000000e+00 : f32
    %102 = vector.broadcast %cst_37 : f32 to vector<32x32xf32>
    %103 = arith.cmpf ogt, %101, %102 : vector<32x32xf32>
    %cst_38 = arith.constant 2.000000e-01 : f32
    %104 = vector.broadcast %cst_38 : f32 to vector<32x32xf32>
    %105 = arith.mulf %104, %101 : vector<32x32xf32>
    %106 = arith.select %103, %101, %105 : vector<32x32xi1>, vector<32x32xf32>
    %cst_39 = arith.constant -1.000000e+30 : f32
    %107 = vector.broadcast %cst_39 : f32 to vector<32x32xf32>
    %108 = arith.select %6, %106, %107 : vector<32x32xi1>, vector<32x32xf32>
    %cst_40 = arith.constant dense<0xFF800000> : vector<32xf32>
    %109 = vector.multi_reduction <maximumf>, %108, %cst_40 [1] : vector<32x32xf32> to vector<32xf32>
    %110 = vector.shape_cast %109 : vector<32xf32> to vector<32x1xf32>
    %111 = vector.broadcast %110 : vector<32x1xf32> to vector<32x32xf32>
    %112 = arith.subf %108, %111 : vector<32x32xf32>
    %113 = math.exp %112 : vector<32x32xf32>
    %cst_41 = arith.constant dense<0.000000e+00> : vector<32xf32>
    %114 = vector.multi_reduction <add>, %113, %cst_41 [1] : vector<32x32xf32> to vector<32xf32>
    %115 = vector.shape_cast %114 : vector<32xf32> to vector<32x1xf32>
    %116 = tpu.reciprocal %115 {approx = true} : vector<32x1xf32> -> vector<32x1xf32>
    %117 = arith.mulf %115, %116 : vector<32x1xf32>
    %cst_42 = arith.constant 2.000000e+00 : f32
    %118 = vector.broadcast %cst_42 : f32 to vector<32x1xf32>
    %119 = arith.subf %118, %117 : vector<32x1xf32>
    %120 = arith.mulf %116, %119 : vector<32x1xf32>
    %121 = vector.broadcast %120 : vector<32x1xf32> to vector<32x32xf32>
    %122 = arith.mulf %113, %121 : vector<32x32xf32>
    %cst_43 = arith.constant dense<0.000000e+00> : vector<32x8xf32>
    %123 = tpu.matmul %122, %96, %cst_43 {dimension_numbers = #tpu.dot_dimension_numbers<[1], [0], [0], [1], [0, 0, 1, 1], [], []>} : vector<32x32xf32>, vector<32x8xf32>, vector<32x8xf32> -> vector<32x8xf32>
    %124 = vector.extract_strided_slice %14 {offsets = [0, 16], sizes = [1, 8], strides = [1, 1]} : vector<1x64xf32> to vector<1x8xf32>
    %125 = vector.broadcast %124 : vector<1x8xf32> to vector<32x8xf32>
    %126 = arith.addf %123, %125 : vector<32x8xf32>
    %cst_44 = arith.constant 0.000000e+00 : f32
    %127 = vector.broadcast %cst_44 : f32 to vector<32x8xf32>
    %128 = arith.cmpf ogt, %126, %127 : vector<32x8xf32>
    %129 = math.exp %126 : vector<32x8xf32>
    %cst_45 = arith.constant 1.000000e+00 : f32
    %130 = vector.broadcast %cst_45 : f32 to vector<32x8xf32>
    %131 = arith.subf %129, %130 : vector<32x8xf32>
    %132 = arith.select %128, %126, %131 : vector<32x8xi1>, vector<32x8xf32>
    %c16 = arith.constant 16 : index
    %c0_46 = arith.constant 0 : index
    %133 = vector.load %arg6[%c16, %c0_46] : memref<64x4xf32, #tpu.memory_space<vmem>>, vector<8x4xf32>
    %cst_47 = arith.constant dense<0.000000e+00> : vector<32x4xf32>
    %134 = tpu.matmul %132, %133, %cst_47 {dimension_numbers = #tpu.dot_dimension_numbers<[1], [0], [0], [1], [0, 0, 1, 1], [], []>} : vector<32x8xf32>, vector<8x4xf32>, vector<32x4xf32> -> vector<32x4xf32>
    %135 = arith.addf %95, %134 : vector<32x4xf32>
    %136 = vector.extract_strided_slice %8 {offsets = [0, 24], sizes = [32, 8], strides = [1, 1]} : vector<32x64xf32> to vector<32x8xf32>
    %137 = vector.extract_strided_slice %11 {offsets = [0, 3], sizes = [32, 1], strides = [1, 1]} : vector<32x8xf32> to vector<32x1xf32>
    %138 = vector.extract_strided_slice %13 {offsets = [3, 0], sizes = [1, 32], strides = [1, 1]} : vector<8x32xf32> to vector<1x32xf32>
    %139 = vector.broadcast %137 : vector<32x1xf32> to vector<32x32xf32>
    %140 = vector.broadcast %138 : vector<1x32xf32> to vector<32x32xf32>
    %141 = arith.addf %139, %140 : vector<32x32xf32>
    %cst_48 = arith.constant 0.000000e+00 : f32
    %142 = vector.broadcast %cst_48 : f32 to vector<32x32xf32>
    %143 = arith.cmpf ogt, %141, %142 : vector<32x32xf32>
    %cst_49 = arith.constant 2.000000e-01 : f32
    %144 = vector.broadcast %cst_49 : f32 to vector<32x32xf32>
    %145 = arith.mulf %144, %141 : vector<32x32xf32>
    %146 = arith.select %143, %141, %145 : vector<32x32xi1>, vector<32x32xf32>
    %cst_50 = arith.constant -1.000000e+30 : f32
    %147 = vector.broadcast %cst_50 : f32 to vector<32x32xf32>
    %148 = arith.select %6, %146, %147 : vector<32x32xi1>, vector<32x32xf32>
    %cst_51 = arith.constant dense<0xFF800000> : vector<32xf32>
    %149 = vector.multi_reduction <maximumf>, %148, %cst_51 [1] : vector<32x32xf32> to vector<32xf32>
    %150 = vector.shape_cast %149 : vector<32xf32> to vector<32x1xf32>
    %151 = vector.broadcast %150 : vector<32x1xf32> to vector<32x32xf32>
    %152 = arith.subf %148, %151 : vector<32x32xf32>
    %153 = math.exp %152 : vector<32x32xf32>
    %cst_52 = arith.constant dense<0.000000e+00> : vector<32xf32>
    %154 = vector.multi_reduction <add>, %153, %cst_52 [1] : vector<32x32xf32> to vector<32xf32>
    %155 = vector.shape_cast %154 : vector<32xf32> to vector<32x1xf32>
    %156 = tpu.reciprocal %155 {approx = true} : vector<32x1xf32> -> vector<32x1xf32>
    %157 = arith.mulf %155, %156 : vector<32x1xf32>
    %cst_53 = arith.constant 2.000000e+00 : f32
    %158 = vector.broadcast %cst_53 : f32 to vector<32x1xf32>
    %159 = arith.subf %158, %157 : vector<32x1xf32>
    %160 = arith.mulf %156, %159 : vector<32x1xf32>
    %161 = vector.broadcast %160 : vector<32x1xf32> to vector<32x32xf32>
    %162 = arith.mulf %153, %161 : vector<32x32xf32>
    %cst_54 = arith.constant dense<0.000000e+00> : vector<32x8xf32>
    %163 = tpu.matmul %162, %136, %cst_54 {dimension_numbers = #tpu.dot_dimension_numbers<[1], [0], [0], [1], [0, 0, 1, 1], [], []>} : vector<32x32xf32>, vector<32x8xf32>, vector<32x8xf32> -> vector<32x8xf32>
    %164 = vector.extract_strided_slice %14 {offsets = [0, 24], sizes = [1, 8], strides = [1, 1]} : vector<1x64xf32> to vector<1x8xf32>
    %165 = vector.broadcast %164 : vector<1x8xf32> to vector<32x8xf32>
    %166 = arith.addf %163, %165 : vector<32x8xf32>
    %cst_55 = arith.constant 0.000000e+00 : f32
    %167 = vector.broadcast %cst_55 : f32 to vector<32x8xf32>
    %168 = arith.cmpf ogt, %166, %167 : vector<32x8xf32>
    %169 = math.exp %166 : vector<32x8xf32>
    %cst_56 = arith.constant 1.000000e+00 : f32
    %170 = vector.broadcast %cst_56 : f32 to vector<32x8xf32>
    %171 = arith.subf %169, %170 : vector<32x8xf32>
    %172 = arith.select %168, %166, %171 : vector<32x8xi1>, vector<32x8xf32>
    %c24 = arith.constant 24 : index
    %c0_57 = arith.constant 0 : index
    %173 = vector.load %arg6[%c24, %c0_57] : memref<64x4xf32, #tpu.memory_space<vmem>>, vector<8x4xf32>
    %cst_58 = arith.constant dense<0.000000e+00> : vector<32x4xf32>
    %174 = tpu.matmul %172, %173, %cst_58 {dimension_numbers = #tpu.dot_dimension_numbers<[1], [0], [0], [1], [0, 0, 1, 1], [], []>} : vector<32x8xf32>, vector<8x4xf32>, vector<32x4xf32> -> vector<32x4xf32>
    %175 = arith.addf %135, %174 : vector<32x4xf32>
    %176 = vector.extract_strided_slice %8 {offsets = [0, 32], sizes = [32, 8], strides = [1, 1]} : vector<32x64xf32> to vector<32x8xf32>
    %177 = vector.extract_strided_slice %11 {offsets = [0, 4], sizes = [32, 1], strides = [1, 1]} : vector<32x8xf32> to vector<32x1xf32>
    %178 = vector.extract_strided_slice %13 {offsets = [4, 0], sizes = [1, 32], strides = [1, 1]} : vector<8x32xf32> to vector<1x32xf32>
    %179 = vector.broadcast %177 : vector<32x1xf32> to vector<32x32xf32>
    %180 = vector.broadcast %178 : vector<1x32xf32> to vector<32x32xf32>
    %181 = arith.addf %179, %180 : vector<32x32xf32>
    %cst_59 = arith.constant 0.000000e+00 : f32
    %182 = vector.broadcast %cst_59 : f32 to vector<32x32xf32>
    %183 = arith.cmpf ogt, %181, %182 : vector<32x32xf32>
    %cst_60 = arith.constant 2.000000e-01 : f32
    %184 = vector.broadcast %cst_60 : f32 to vector<32x32xf32>
    %185 = arith.mulf %184, %181 : vector<32x32xf32>
    %186 = arith.select %183, %181, %185 : vector<32x32xi1>, vector<32x32xf32>
    %cst_61 = arith.constant -1.000000e+30 : f32
    %187 = vector.broadcast %cst_61 : f32 to vector<32x32xf32>
    %188 = arith.select %6, %186, %187 : vector<32x32xi1>, vector<32x32xf32>
    %cst_62 = arith.constant dense<0xFF800000> : vector<32xf32>
    %189 = vector.multi_reduction <maximumf>, %188, %cst_62 [1] : vector<32x32xf32> to vector<32xf32>
    %190 = vector.shape_cast %189 : vector<32xf32> to vector<32x1xf32>
    %191 = vector.broadcast %190 : vector<32x1xf32> to vector<32x32xf32>
    %192 = arith.subf %188, %191 : vector<32x32xf32>
    %193 = math.exp %192 : vector<32x32xf32>
    %cst_63 = arith.constant dense<0.000000e+00> : vector<32xf32>
    %194 = vector.multi_reduction <add>, %193, %cst_63 [1] : vector<32x32xf32> to vector<32xf32>
    %195 = vector.shape_cast %194 : vector<32xf32> to vector<32x1xf32>
    %196 = tpu.reciprocal %195 {approx = true} : vector<32x1xf32> -> vector<32x1xf32>
    %197 = arith.mulf %195, %196 : vector<32x1xf32>
    %cst_64 = arith.constant 2.000000e+00 : f32
    %198 = vector.broadcast %cst_64 : f32 to vector<32x1xf32>
    %199 = arith.subf %198, %197 : vector<32x1xf32>
    %200 = arith.mulf %196, %199 : vector<32x1xf32>
    %201 = vector.broadcast %200 : vector<32x1xf32> to vector<32x32xf32>
    %202 = arith.mulf %193, %201 : vector<32x32xf32>
    %cst_65 = arith.constant dense<0.000000e+00> : vector<32x8xf32>
    %203 = tpu.matmul %202, %176, %cst_65 {dimension_numbers = #tpu.dot_dimension_numbers<[1], [0], [0], [1], [0, 0, 1, 1], [], []>} : vector<32x32xf32>, vector<32x8xf32>, vector<32x8xf32> -> vector<32x8xf32>
    %204 = vector.extract_strided_slice %14 {offsets = [0, 32], sizes = [1, 8], strides = [1, 1]} : vector<1x64xf32> to vector<1x8xf32>
    %205 = vector.broadcast %204 : vector<1x8xf32> to vector<32x8xf32>
    %206 = arith.addf %203, %205 : vector<32x8xf32>
    %cst_66 = arith.constant 0.000000e+00 : f32
    %207 = vector.broadcast %cst_66 : f32 to vector<32x8xf32>
    %208 = arith.cmpf ogt, %206, %207 : vector<32x8xf32>
    %209 = math.exp %206 : vector<32x8xf32>
    %cst_67 = arith.constant 1.000000e+00 : f32
    %210 = vector.broadcast %cst_67 : f32 to vector<32x8xf32>
    %211 = arith.subf %209, %210 : vector<32x8xf32>
    %212 = arith.select %208, %206, %211 : vector<32x8xi1>, vector<32x8xf32>
    %c32 = arith.constant 32 : index
    %c0_68 = arith.constant 0 : index
    %213 = vector.load %arg6[%c32, %c0_68] : memref<64x4xf32, #tpu.memory_space<vmem>>, vector<8x4xf32>
    %cst_69 = arith.constant dense<0.000000e+00> : vector<32x4xf32>
    %214 = tpu.matmul %212, %213, %cst_69 {dimension_numbers = #tpu.dot_dimension_numbers<[1], [0], [0], [1], [0, 0, 1, 1], [], []>} : vector<32x8xf32>, vector<8x4xf32>, vector<32x4xf32> -> vector<32x4xf32>
    %215 = arith.addf %175, %214 : vector<32x4xf32>
    %216 = vector.extract_strided_slice %8 {offsets = [0, 40], sizes = [32, 8], strides = [1, 1]} : vector<32x64xf32> to vector<32x8xf32>
    %217 = vector.extract_strided_slice %11 {offsets = [0, 5], sizes = [32, 1], strides = [1, 1]} : vector<32x8xf32> to vector<32x1xf32>
    %218 = vector.extract_strided_slice %13 {offsets = [5, 0], sizes = [1, 32], strides = [1, 1]} : vector<8x32xf32> to vector<1x32xf32>
    %219 = vector.broadcast %217 : vector<32x1xf32> to vector<32x32xf32>
    %220 = vector.broadcast %218 : vector<1x32xf32> to vector<32x32xf32>
    %221 = arith.addf %219, %220 : vector<32x32xf32>
    %cst_70 = arith.constant 0.000000e+00 : f32
    %222 = vector.broadcast %cst_70 : f32 to vector<32x32xf32>
    %223 = arith.cmpf ogt, %221, %222 : vector<32x32xf32>
    %cst_71 = arith.constant 2.000000e-01 : f32
    %224 = vector.broadcast %cst_71 : f32 to vector<32x32xf32>
    %225 = arith.mulf %224, %221 : vector<32x32xf32>
    %226 = arith.select %223, %221, %225 : vector<32x32xi1>, vector<32x32xf32>
    %cst_72 = arith.constant -1.000000e+30 : f32
    %227 = vector.broadcast %cst_72 : f32 to vector<32x32xf32>
    %228 = arith.select %6, %226, %227 : vector<32x32xi1>, vector<32x32xf32>
    %cst_73 = arith.constant dense<0xFF800000> : vector<32xf32>
    %229 = vector.multi_reduction <maximumf>, %228, %cst_73 [1] : vector<32x32xf32> to vector<32xf32>
    %230 = vector.shape_cast %229 : vector<32xf32> to vector<32x1xf32>
    %231 = vector.broadcast %230 : vector<32x1xf32> to vector<32x32xf32>
    %232 = arith.subf %228, %231 : vector<32x32xf32>
    %233 = math.exp %232 : vector<32x32xf32>
    %cst_74 = arith.constant dense<0.000000e+00> : vector<32xf32>
    %234 = vector.multi_reduction <add>, %233, %cst_74 [1] : vector<32x32xf32> to vector<32xf32>
    %235 = vector.shape_cast %234 : vector<32xf32> to vector<32x1xf32>
    %236 = tpu.reciprocal %235 {approx = true} : vector<32x1xf32> -> vector<32x1xf32>
    %237 = arith.mulf %235, %236 : vector<32x1xf32>
    %cst_75 = arith.constant 2.000000e+00 : f32
    %238 = vector.broadcast %cst_75 : f32 to vector<32x1xf32>
    %239 = arith.subf %238, %237 : vector<32x1xf32>
    %240 = arith.mulf %236, %239 : vector<32x1xf32>
    %241 = vector.broadcast %240 : vector<32x1xf32> to vector<32x32xf32>
    %242 = arith.mulf %233, %241 : vector<32x32xf32>
    %cst_76 = arith.constant dense<0.000000e+00> : vector<32x8xf32>
    %243 = tpu.matmul %242, %216, %cst_76 {dimension_numbers = #tpu.dot_dimension_numbers<[1], [0], [0], [1], [0, 0, 1, 1], [], []>} : vector<32x32xf32>, vector<32x8xf32>, vector<32x8xf32> -> vector<32x8xf32>
    %244 = vector.extract_strided_slice %14 {offsets = [0, 40], sizes = [1, 8], strides = [1, 1]} : vector<1x64xf32> to vector<1x8xf32>
    %245 = vector.broadcast %244 : vector<1x8xf32> to vector<32x8xf32>
    %246 = arith.addf %243, %245 : vector<32x8xf32>
    %cst_77 = arith.constant 0.000000e+00 : f32
    %247 = vector.broadcast %cst_77 : f32 to vector<32x8xf32>
    %248 = arith.cmpf ogt, %246, %247 : vector<32x8xf32>
    %249 = math.exp %246 : vector<32x8xf32>
    %cst_78 = arith.constant 1.000000e+00 : f32
    %250 = vector.broadcast %cst_78 : f32 to vector<32x8xf32>
    %251 = arith.subf %249, %250 : vector<32x8xf32>
    %252 = arith.select %248, %246, %251 : vector<32x8xi1>, vector<32x8xf32>
    %c40 = arith.constant 40 : index
    %c0_79 = arith.constant 0 : index
    %253 = vector.load %arg6[%c40, %c0_79] : memref<64x4xf32, #tpu.memory_space<vmem>>, vector<8x4xf32>
    %cst_80 = arith.constant dense<0.000000e+00> : vector<32x4xf32>
    %254 = tpu.matmul %252, %253, %cst_80 {dimension_numbers = #tpu.dot_dimension_numbers<[1], [0], [0], [1], [0, 0, 1, 1], [], []>} : vector<32x8xf32>, vector<8x4xf32>, vector<32x4xf32> -> vector<32x4xf32>
    %255 = arith.addf %215, %254 : vector<32x4xf32>
    %256 = vector.extract_strided_slice %8 {offsets = [0, 48], sizes = [32, 8], strides = [1, 1]} : vector<32x64xf32> to vector<32x8xf32>
    %257 = vector.extract_strided_slice %11 {offsets = [0, 6], sizes = [32, 1], strides = [1, 1]} : vector<32x8xf32> to vector<32x1xf32>
    %258 = vector.extract_strided_slice %13 {offsets = [6, 0], sizes = [1, 32], strides = [1, 1]} : vector<8x32xf32> to vector<1x32xf32>
    %259 = vector.broadcast %257 : vector<32x1xf32> to vector<32x32xf32>
    %260 = vector.broadcast %258 : vector<1x32xf32> to vector<32x32xf32>
    %261 = arith.addf %259, %260 : vector<32x32xf32>
    %cst_81 = arith.constant 0.000000e+00 : f32
    %262 = vector.broadcast %cst_81 : f32 to vector<32x32xf32>
    %263 = arith.cmpf ogt, %261, %262 : vector<32x32xf32>
    %cst_82 = arith.constant 2.000000e-01 : f32
    %264 = vector.broadcast %cst_82 : f32 to vector<32x32xf32>
    %265 = arith.mulf %264, %261 : vector<32x32xf32>
    %266 = arith.select %263, %261, %265 : vector<32x32xi1>, vector<32x32xf32>
    %cst_83 = arith.constant -1.000000e+30 : f32
    %267 = vector.broadcast %cst_83 : f32 to vector<32x32xf32>
    %268 = arith.select %6, %266, %267 : vector<32x32xi1>, vector<32x32xf32>
    %cst_84 = arith.constant dense<0xFF800000> : vector<32xf32>
    %269 = vector.multi_reduction <maximumf>, %268, %cst_84 [1] : vector<32x32xf32> to vector<32xf32>
    %270 = vector.shape_cast %269 : vector<32xf32> to vector<32x1xf32>
    %271 = vector.broadcast %270 : vector<32x1xf32> to vector<32x32xf32>
    %272 = arith.subf %268, %271 : vector<32x32xf32>
    %273 = math.exp %272 : vector<32x32xf32>
    %cst_85 = arith.constant dense<0.000000e+00> : vector<32xf32>
    %274 = vector.multi_reduction <add>, %273, %cst_85 [1] : vector<32x32xf32> to vector<32xf32>
    %275 = vector.shape_cast %274 : vector<32xf32> to vector<32x1xf32>
    %276 = tpu.reciprocal %275 {approx = true} : vector<32x1xf32> -> vector<32x1xf32>
    %277 = arith.mulf %275, %276 : vector<32x1xf32>
    %cst_86 = arith.constant 2.000000e+00 : f32
    %278 = vector.broadcast %cst_86 : f32 to vector<32x1xf32>
    %279 = arith.subf %278, %277 : vector<32x1xf32>
    %280 = arith.mulf %276, %279 : vector<32x1xf32>
    %281 = vector.broadcast %280 : vector<32x1xf32> to vector<32x32xf32>
    %282 = arith.mulf %273, %281 : vector<32x32xf32>
    %cst_87 = arith.constant dense<0.000000e+00> : vector<32x8xf32>
    %283 = tpu.matmul %282, %256, %cst_87 {dimension_numbers = #tpu.dot_dimension_numbers<[1], [0], [0], [1], [0, 0, 1, 1], [], []>} : vector<32x32xf32>, vector<32x8xf32>, vector<32x8xf32> -> vector<32x8xf32>
    %284 = vector.extract_strided_slice %14 {offsets = [0, 48], sizes = [1, 8], strides = [1, 1]} : vector<1x64xf32> to vector<1x8xf32>
    %285 = vector.broadcast %284 : vector<1x8xf32> to vector<32x8xf32>
    %286 = arith.addf %283, %285 : vector<32x8xf32>
    %cst_88 = arith.constant 0.000000e+00 : f32
    %287 = vector.broadcast %cst_88 : f32 to vector<32x8xf32>
    %288 = arith.cmpf ogt, %286, %287 : vector<32x8xf32>
    %289 = math.exp %286 : vector<32x8xf32>
    %cst_89 = arith.constant 1.000000e+00 : f32
    %290 = vector.broadcast %cst_89 : f32 to vector<32x8xf32>
    %291 = arith.subf %289, %290 : vector<32x8xf32>
    %292 = arith.select %288, %286, %291 : vector<32x8xi1>, vector<32x8xf32>
    %c48 = arith.constant 48 : index
    %c0_90 = arith.constant 0 : index
    %293 = vector.load %arg6[%c48, %c0_90] : memref<64x4xf32, #tpu.memory_space<vmem>>, vector<8x4xf32>
    %cst_91 = arith.constant dense<0.000000e+00> : vector<32x4xf32>
    %294 = tpu.matmul %292, %293, %cst_91 {dimension_numbers = #tpu.dot_dimension_numbers<[1], [0], [0], [1], [0, 0, 1, 1], [], []>} : vector<32x8xf32>, vector<8x4xf32>, vector<32x4xf32> -> vector<32x4xf32>
    %295 = arith.addf %255, %294 : vector<32x4xf32>
    %296 = vector.extract_strided_slice %8 {offsets = [0, 56], sizes = [32, 8], strides = [1, 1]} : vector<32x64xf32> to vector<32x8xf32>
    %297 = vector.extract_strided_slice %11 {offsets = [0, 7], sizes = [32, 1], strides = [1, 1]} : vector<32x8xf32> to vector<32x1xf32>
    %298 = vector.extract_strided_slice %13 {offsets = [7, 0], sizes = [1, 32], strides = [1, 1]} : vector<8x32xf32> to vector<1x32xf32>
    %299 = vector.broadcast %297 : vector<32x1xf32> to vector<32x32xf32>
    %300 = vector.broadcast %298 : vector<1x32xf32> to vector<32x32xf32>
    %301 = arith.addf %299, %300 : vector<32x32xf32>
    %cst_92 = arith.constant 0.000000e+00 : f32
    %302 = vector.broadcast %cst_92 : f32 to vector<32x32xf32>
    %303 = arith.cmpf ogt, %301, %302 : vector<32x32xf32>
    %cst_93 = arith.constant 2.000000e-01 : f32
    %304 = vector.broadcast %cst_93 : f32 to vector<32x32xf32>
    %305 = arith.mulf %304, %301 : vector<32x32xf32>
    %306 = arith.select %303, %301, %305 : vector<32x32xi1>, vector<32x32xf32>
    %cst_94 = arith.constant -1.000000e+30 : f32
    %307 = vector.broadcast %cst_94 : f32 to vector<32x32xf32>
    %308 = arith.select %6, %306, %307 : vector<32x32xi1>, vector<32x32xf32>
    %cst_95 = arith.constant dense<0xFF800000> : vector<32xf32>
    %309 = vector.multi_reduction <maximumf>, %308, %cst_95 [1] : vector<32x32xf32> to vector<32xf32>
    %310 = vector.shape_cast %309 : vector<32xf32> to vector<32x1xf32>
    %311 = vector.broadcast %310 : vector<32x1xf32> to vector<32x32xf32>
    %312 = arith.subf %308, %311 : vector<32x32xf32>
    %313 = math.exp %312 : vector<32x32xf32>
    %cst_96 = arith.constant dense<0.000000e+00> : vector<32xf32>
    %314 = vector.multi_reduction <add>, %313, %cst_96 [1] : vector<32x32xf32> to vector<32xf32>
    %315 = vector.shape_cast %314 : vector<32xf32> to vector<32x1xf32>
    %316 = tpu.reciprocal %315 {approx = true} : vector<32x1xf32> -> vector<32x1xf32>
    %317 = arith.mulf %315, %316 : vector<32x1xf32>
    %cst_97 = arith.constant 2.000000e+00 : f32
    %318 = vector.broadcast %cst_97 : f32 to vector<32x1xf32>
    %319 = arith.subf %318, %317 : vector<32x1xf32>
    %320 = arith.mulf %316, %319 : vector<32x1xf32>
    %321 = vector.broadcast %320 : vector<32x1xf32> to vector<32x32xf32>
    %322 = arith.mulf %313, %321 : vector<32x32xf32>
    %cst_98 = arith.constant dense<0.000000e+00> : vector<32x8xf32>
    %323 = tpu.matmul %322, %296, %cst_98 {dimension_numbers = #tpu.dot_dimension_numbers<[1], [0], [0], [1], [0, 0, 1, 1], [], []>} : vector<32x32xf32>, vector<32x8xf32>, vector<32x8xf32> -> vector<32x8xf32>
    %324 = vector.extract_strided_slice %14 {offsets = [0, 56], sizes = [1, 8], strides = [1, 1]} : vector<1x64xf32> to vector<1x8xf32>
    %325 = vector.broadcast %324 : vector<1x8xf32> to vector<32x8xf32>
    %326 = arith.addf %323, %325 : vector<32x8xf32>
    %cst_99 = arith.constant 0.000000e+00 : f32
    %327 = vector.broadcast %cst_99 : f32 to vector<32x8xf32>
    %328 = arith.cmpf ogt, %326, %327 : vector<32x8xf32>
    %329 = math.exp %326 : vector<32x8xf32>
    %cst_100 = arith.constant 1.000000e+00 : f32
    %330 = vector.broadcast %cst_100 : f32 to vector<32x8xf32>
    %331 = arith.subf %329, %330 : vector<32x8xf32>
    %332 = arith.select %328, %326, %331 : vector<32x8xi1>, vector<32x8xf32>
    %c56 = arith.constant 56 : index
    %c0_101 = arith.constant 0 : index
    %333 = vector.load %arg6[%c56, %c0_101] : memref<64x4xf32, #tpu.memory_space<vmem>>, vector<8x4xf32>
    %cst_102 = arith.constant dense<0.000000e+00> : vector<32x4xf32>
    %334 = tpu.matmul %332, %333, %cst_102 {dimension_numbers = #tpu.dot_dimension_numbers<[1], [0], [0], [1], [0, 0, 1, 1], [], []>} : vector<32x8xf32>, vector<8x4xf32>, vector<32x4xf32> -> vector<32x4xf32>
    %335 = arith.addf %295, %334 : vector<32x4xf32>
    %c0_103 = arith.constant 0 : index
    %c0_104 = arith.constant 0 : index
    %336 = vector.load %arg7[%c0_103, %c0_104] : memref<4x2xf32, #tpu.memory_space<vmem>>, vector<4x2xf32>
    %cst_105 = arith.constant dense<0.000000e+00> : vector<32x2xf32>
    %337 = tpu.matmul %335, %336, %cst_105 {dimension_numbers = #tpu.dot_dimension_numbers<[1], [0], [0], [1], [0, 0, 1, 1], [], []>} : vector<32x4xf32>, vector<4x2xf32>, vector<32x2xf32> -> vector<32x2xf32>
    %338 = vector.extract_strided_slice %337 {offsets = [0, 0], sizes = [32, 1], strides = [1, 1]} : vector<32x2xf32> to vector<32x1xf32>
    %339 = tpu.transpose %337, [1, 0] : vector<32x2xf32> -> vector<2x32xf32>
    %340 = vector.extract_strided_slice %339 {offsets = [1, 0], sizes = [1, 32], strides = [1, 1]} : vector<2x32xf32> to vector<1x32xf32>
    %341 = vector.broadcast %338 : vector<32x1xf32> to vector<32x32xf32>
    %342 = vector.broadcast %340 : vector<1x32xf32> to vector<32x32xf32>
    %343 = arith.addf %341, %342 : vector<32x32xf32>
    %cst_106 = arith.constant 0.000000e+00 : f32
    %344 = vector.broadcast %cst_106 : f32 to vector<32x32xf32>
    %345 = arith.cmpf ogt, %343, %344 : vector<32x32xf32>
    %cst_107 = arith.constant 2.000000e-01 : f32
    %346 = vector.broadcast %cst_107 : f32 to vector<32x32xf32>
    %347 = arith.mulf %346, %343 : vector<32x32xf32>
    %348 = arith.select %345, %343, %347 : vector<32x32xi1>, vector<32x32xf32>
    %cst_108 = arith.constant -1.000000e+30 : f32
    %349 = vector.broadcast %cst_108 : f32 to vector<32x32xf32>
    %350 = arith.select %6, %348, %349 : vector<32x32xi1>, vector<32x32xf32>
    %cst_109 = arith.constant dense<0xFF800000> : vector<32xf32>
    %351 = vector.multi_reduction <maximumf>, %350, %cst_109 [1] : vector<32x32xf32> to vector<32xf32>
    %352 = vector.shape_cast %351 : vector<32xf32> to vector<32x1xf32>
    %353 = vector.broadcast %352 : vector<32x1xf32> to vector<32x32xf32>
    %354 = arith.subf %350, %353 : vector<32x32xf32>
    %355 = math.exp %354 : vector<32x32xf32>
    %cst_110 = arith.constant dense<0.000000e+00> : vector<32xf32>
    %356 = vector.multi_reduction <add>, %355, %cst_110 [1] : vector<32x32xf32> to vector<32xf32>
    %357 = vector.shape_cast %356 : vector<32xf32> to vector<32x1xf32>
    %358 = tpu.reciprocal %357 {approx = true} : vector<32x1xf32> -> vector<32x1xf32>
    %359 = arith.mulf %357, %358 : vector<32x1xf32>
    %cst_111 = arith.constant 2.000000e+00 : f32
    %360 = vector.broadcast %cst_111 : f32 to vector<32x1xf32>
    %361 = arith.subf %360, %359 : vector<32x1xf32>
    %362 = arith.mulf %358, %361 : vector<32x1xf32>
    %363 = vector.broadcast %362 : vector<32x1xf32> to vector<32x32xf32>
    %364 = arith.mulf %355, %363 : vector<32x32xf32>
    %cst_112 = arith.constant dense<0.000000e+00> : vector<32x4xf32>
    %365 = tpu.matmul %364, %335, %cst_112 {dimension_numbers = #tpu.dot_dimension_numbers<[1], [0], [0], [1], [0, 0, 1, 1], [], []>} : vector<32x32xf32>, vector<32x4xf32>, vector<32x4xf32> -> vector<32x4xf32>
    %c0_113 = arith.constant 0 : index
    %c0_114 = arith.constant 0 : index
    %366 = vector.load %arg8[%c0_113, %c0_114] : memref<1x4xf32, #tpu.memory_space<vmem>>, vector<1x4xf32>
    %367 = vector.broadcast %366 : vector<1x4xf32> to vector<32x4xf32>
    %368 = arith.addf %365, %367 : vector<32x4xf32>
    %cst_115 = arith.constant dense<0xFF800000> : vector<32xf32>
    %369 = vector.multi_reduction <maximumf>, %368, %cst_115 [1] : vector<32x4xf32> to vector<32xf32>
    %370 = vector.shape_cast %369 : vector<32xf32> to vector<32x1xf32>
    %371 = vector.broadcast %370 : vector<32x1xf32> to vector<32x4xf32>
    %372 = arith.subf %368, %371 : vector<32x4xf32>
    %373 = math.exp %372 : vector<32x4xf32>
    %cst_116 = arith.constant dense<0.000000e+00> : vector<32xf32>
    %374 = vector.multi_reduction <add>, %373, %cst_116 [1] : vector<32x4xf32> to vector<32xf32>
    %375 = vector.shape_cast %374 : vector<32xf32> to vector<32x1xf32>
    %376 = math.log %375 : vector<32x1xf32>
    %377 = vector.broadcast %376 : vector<32x1xf32> to vector<32x4xf32>
    %378 = arith.subf %372, %377 : vector<32x4xf32>
    %c0_117 = arith.constant 0 : index
    %c0_118 = arith.constant 0 : index
    %c0_119 = arith.constant 0 : index
    %379 = vector.load %arg9[%c0_117, %c0_118, %c0_119] : memref<1x32x4xf32, #tpu.memory_space<vmem>>, vector<1x32x4xf32>
    %380 = vector.shape_cast %379 : vector<1x32x4xf32> to vector<32x4xf32>
    %381 = vector.shape_cast %378 : vector<32x4xf32> to vector<1x32x4xf32>
    tpu.vector_store %arg9[%c0_117, %c0_118, %c0_119], %381 {strides = array<i32>} : memref<1x32x4xf32, #tpu.memory_space<vmem>>, vector<1x32x4xf32>,
    return
  }
  func.func @transform_0(%arg0: i32) -> (i32, i32, i32) {
    %c0_i32 = arith.constant 0 : i32
    %c0_i32_0 = arith.constant 0 : i32
    %c0_i32_1 = arith.constant 0 : i32
    return %arg0, %c0_i32, %c0_i32_0 : i32, i32, i32
  }
  func.func @transform_1(%arg0: i32) -> (i32, i32, i32) {
    %c0_i32 = arith.constant 0 : i32
    %c0_i32_0 = arith.constant 0 : i32
    %c0_i32_1 = arith.constant 0 : i32
    return %arg0, %c0_i32, %c0_i32_0 : i32, i32, i32
  }
  func.func @transform_2(%arg0: i32) -> (i32, i32) {
    %c0_i32 = arith.constant 0 : i32
    %c0_i32_0 = arith.constant 0 : i32
    %c0_i32_1 = arith.constant 0 : i32
    return %c0_i32, %c0_i32_0 : i32, i32
  }
  func.func @transform_3(%arg0: i32) -> (i32, i32) {
    %c0_i32 = arith.constant 0 : i32
    %c0_i32_0 = arith.constant 0 : i32
    %c0_i32_1 = arith.constant 0 : i32
    return %c0_i32, %c0_i32_0 : i32, i32
  }
  func.func @transform_4(%arg0: i32) -> (i32, i32) {
    %c0_i32 = arith.constant 0 : i32
    %c0_i32_0 = arith.constant 0 : i32
    %c0_i32_1 = arith.constant 0 : i32
    return %c0_i32, %c0_i32_0 : i32, i32
  }
  func.func @transform_5(%arg0: i32) -> (i32, i32) {
    %c0_i32 = arith.constant 0 : i32
    %c0_i32_0 = arith.constant 0 : i32
    %c0_i32_1 = arith.constant 0 : i32
    return %c0_i32, %c0_i32_0 : i32, i32
  }
  func.func @transform_6(%arg0: i32) -> (i32, i32) {
    %c0_i32 = arith.constant 0 : i32
    %c0_i32_0 = arith.constant 0 : i32
    %c0_i32_1 = arith.constant 0 : i32
    return %c0_i32, %c0_i32_0 : i32, i32
  }
  func.func @transform_7(%arg0: i32) -> (i32, i32) {
    %c0_i32 = arith.constant 0 : i32
    %c0_i32_0 = arith.constant 0 : i32
    %c0_i32_1 = arith.constant 0 : i32
    return %c0_i32, %c0_i32_0 : i32, i32
  }
  func.func @transform_8(%arg0: i32) -> (i32, i32, i32) {
    %c0_i32 = arith.constant 0 : i32
    %c0_i32_0 = arith.constant 0 : i32
    %c0_i32_1 = arith.constant 0 : i32
    return %arg0, %c0_i32, %c0_i32_0 : i32, i32, i32
  }
}

</mosaic_0001>

<bundles_post_ra>
// kernel: tpu_custom_call.1
= control target key start
LH: loop header
LB: loop body
LE: loop exit
PB: predicated region body
PF: predicated region fallthrough
CT: control target
= control target key end

     0   :  { %s6638_s0 = inlined_call_operand.hbm [shape: f32[4,32,16], index: 0, kind: input, shape index: {}]   ;;  %s6639_s1 = inlined_call_operand.hbm [shape: s8[4,32,32], index: 1, kind: input, shape index: {}]   ;;  %s6640_s2 = inlined_call_operand.hbm [shape: f32[16,64], index: 2, kind: input, shape index: {}]   ;;  %s6641_s3 = inlined_call_operand.hbm [shape: f32[64,16], index: 3, kind: input, shape index: {}]   ;;  %s6642_s4 = inlined_call_operand.hbm [shape: f32[1,64], index: 4, kind: input, shape index: {}]   ;;  %s6643_s5 = inlined_call_operand.hbm [shape: f32[64,4], index: 5, kind: input, shape index: {}]   ;;  %s6644_s6 = inlined_call_operand.hbm [shape: f32[4,2], index: 6, kind: input, shape index: {}]   ;;  %s6645_s7 = inlined_call_operand.hbm [shape: f32[1,4], index: 7, kind: input, shape index: {}]   ;;  %s6646_s8 = inlined_call_operand.hbm [shape: f32[4,32,4], index: 8, kind: output, shape index: {}]  }
   0x1   :  { %6671 = sst [smem:[#allocation40_spill]] %s6638_s0 }
   0x2   :  { %6672 = sst [smem:[#allocation41_spill]] %s6640_s2 }
   0x3   :  { %6673 = sst [smem:[#allocation42_spill]] %s6641_s3 }
   0x4   :  { %6674 = sst [smem:[#allocation43_spill]] %s6642_s4 }
   0x5   :  { %6675 = sst [smem:[#allocation44_spill]] %s6643_s5 }
   0x6   :  { %6676 = sst [smem:[#allocation45_spill]] %s6644_s6 }
   0x7   :  { %13 = vsyncpa [#allocation3], 0 }
   0x8   :  { %15 = vsyncpa [#allocation3 + $0x1], 0 }
   0x9   :  { %16 = vsyncpa [#allocation6], 0 }
   0xa   :  { %18 = vsyncpa [#allocation6 + $0x1], 0 }
   0xb   :  { %19 = vsyncpa [#allocation9], 0 }
   0xc   :  { %20 = vsyncpa [#allocation12], 0 }
   0xd   :  { %21 = vsyncpa [#allocation15], 0 }
   0xe   :  { %22 = vsyncpa [#allocation4], 0 }
   0xf   :  { %24 = vsyncpa [#allocation4 + $0x1], 0  ;;  %s5376_s27 = smov 0   ;;  %s5378_s28 = smov 0  }
  0x10   :  { %s5380_s29 = smov 0   ;;  %s5382_s30 = smov 0  }
  0x11 LB: > { %s5303_s9 = smov [#allocation7]   ;;  %s5397_s11 = sadd.s32 4294967295, %s5301_s30   ;;  %s5301_s30 = sphi %s5382_s30, %s6743_s30   ;;  %s5297_s29 = sphi %s5380_s29, %s6742_s29   ;;  %s5293_s28 = sphi %s5378_s28, %s6741_s28   ;;  %s5289_s27 = sphi %s5376_s27, %s6740_s27  }
  0x12   : > { %s251_s10 = sshll.u32 %s5303_s9, 4  ;;  %p3898_p0 = scmp.ge.s32.totalorder %s5301_s30, 1  ;;  %s5402_s10 = int_to_ptr.vmem [resolvable:$true] %s251_s10 }
  0x13   : > { %p6647_p1 = scmp.eq.s32.totalorder %s5397_s11, 0  ;;  %p239_p2 = scmp.lt.s32.totalorder %s5301_s30, 5 }
  0x14   : > { %s5304_s13 = smov [#allocation8]   ;;  %s5305_s16 = smov [#allocation11]  }
  0x15   : > { %p5404_p3 = pnand %p3898_p0, %p239_p2  ;;  %s264_s14 = sshll.u32 %s5304_s13, 4  ;;  %s5416_s14 = int_to_ptr.vmem [resolvable:$true] %s264_s14 }
  0x16   : > { %s288_s17 = sshll.u32 %s5305_s16, 4  ;;  %s6679_s2 = sld [smem:[#allocation41_spill]]  ;;  %s5418_s17 = int_to_ptr.vmem [resolvable:$true] %s288_s17 }
  0x17   : > { %s6677_s12 = scalar_select %p5404_p3, 1, 0 }
  0x18   : > { %p4558_p4 = pneg %p5404_p3 }
  0x1a   : > { %p5412_p5 = pnand %p4558_p4, %p6647_p1 }
  0x1c   : > { %s4987_s20 = scalar_lea.hbm %s6679_s2, 256  ;;  %p5428_p7 = pneg %p5412_p5 }
  0x1d   : > { %p4988_p6 = scmp.ne.s32.totalorder %s6679_s2, %s4987_s20  ;;  %p4994_p10 = scmp.lt.u32.totalorder %s4987_s20, %s6679_s2 }
  0x1f   : > { %p4990_p8 = pnand %p5428_p7, %p4988_p6 }
  0x21   : > { %p4991_p9 = pneg %p4990_p8 }
  0x23   : > { %p4996_p11 = pnand %p4994_p10, %p4991_p9 }
  0x25   : > { %4999 = shalt.err (!%p4996_p11)
}
  0x26   : > { %s5000_s26 = scalar_lea.vmem %s5402_s10, 256  ;;  %p5008_p2 = scmp.lt.s32.totalorder %s5402_s10, %s5402_s10 }
  0x27   : > { %p5001_p12 = scmp.ne.s32.totalorder %s5402_s10, %s5000_s26  ;;  %p5009_p4 = scmp.lt.s32.totalorder %s5000_s26, %s5000_s26 }
  0x29   : > { %p5003_p13 = pnand %p5001_p12, %p5428_p7  ;;  %p5010_p6 = por %p5009_p4, %p5008_p2 }
  0x2b   : > { %p5004_p0 = pneg %p5003_p13 }
  0x2d   : > { %p5011_p8 = pnand %p5010_p6, %p5004_p0 }
  0x2f   : > { %5014 = shalt.err (!%p5011_p8)
}
  0x30   : > { %s6649_s9 = smov 128   ;;  %s6650_s13 = smov 8  }
  0x31   : > { %4561 = dma.hbm_to_vmem [thread:$0]  (!%p5412_p5), %s6679_s2, 256, %s5402_s10, [#allocation6], %s6649_s9, %s6649_s9, %s6650_s13  }
  0x32   : > { %s6681_s3 = sld [smem:[#allocation42_spill]] }
  0x38   : > { %s5015_s21 = scalar_lea.hbm %s6681_s3, 1024 }
  0x39   : > { %p5016_p9 = scmp.ne.s32.totalorder %s6681_s3, %s5015_s21  ;;  %p5022_p12 = scmp.lt.u32.totalorder %s5015_s21, %s6681_s3 }
  0x3b   : > { %p5018_p10 = pnand %p5016_p9, %p5428_p7 }
  0x3d   : > { %p5019_p11 = pneg %p5018_p10 }
  0x3f   : > { %p5024_p13 = pnand %p5022_p12, %p5019_p11 }
  0x41   : > { %5027 = shalt.err (!%p5024_p13)
}
  0x42   : > { %s5028_s10 = scalar_lea.vmem %s5416_s14, 1024  ;;  %p5036_p6 = scmp.lt.s32.totalorder %s5416_s14, %s5416_s14 }
  0x43   : > { %p5029_p0 = scmp.ne.s32.totalorder %s5416_s14, %s5028_s10  ;;  %p5037_p8 = scmp.lt.s32.totalorder %s5028_s10, %s5028_s10 }
  0x45   : > { %p5031_p2 = pnand %p5029_p0, %p5428_p7  ;;  %p5038_p9 = por %p5037_p8, %p5036_p6 }
  0x47   : > { %p5032_p4 = pneg %p5031_p2 }
  0x49   : > { %p5039_p10 = pnand %p5038_p9, %p5032_p4 }
  0x4b   : > { %5042 = shalt.err (!%p5039_p10)
}
  0x4c   : > { %4564 = dma.hbm_to_vmem [thread:$0]  (!%p5412_p5), %s6681_s3, 1024, %s5416_s14, [#allocation9], %s6649_s9, %s6649_s9, %s6650_s13  }
  0x4d   : > { %s6682_s5 = sld [smem:[#allocation44_spill]] }
  0x53   : > { %s5043_s21 = scalar_lea.hbm %s6682_s5, 1024 }
  0x54   : > { %p5044_p11 = scmp.ne.s32.totalorder %s6682_s5, %s5043_s21  ;;  %p5050_p0 = scmp.lt.u32.totalorder %s5043_s21, %s6682_s5 }
  0x56   : > { %p5046_p12 = pnand %p5044_p11, %p5428_p7 }
  0x58   : > { %p5047_p13 = pneg %p5046_p12 }
  0x5a   : > { %p5052_p2 = pnand %p5050_p0, %p5047_p13 }
  0x5c   : > { %5055 = shalt.err (!%p5052_p2)
}
  0x5d   : > { %s5056_s14 = scalar_lea.vmem %s5418_s17, 1024  ;;  %p5064_p9 = scmp.lt.s32.totalorder %s5418_s17, %s5418_s17 }
  0x5e   : > { %p5057_p4 = scmp.ne.s32.totalorder %s5418_s17, %s5056_s14  ;;  %p5065_p10 = scmp.lt.s32.totalorder %s5056_s14, %s5056_s14 }
  0x60   : > { %p5059_p6 = pnand %p5057_p4, %p5428_p7  ;;  %p5066_p11 = por %p5065_p10, %p5064_p9 }
  0x62   : > { %p5060_p8 = pneg %p5059_p6 }
  0x64   : > { %p5067_p12 = pnand %p5066_p11, %p5060_p8 }
  0x66   : > { %5070 = shalt.err (!%p5067_p12)
}
  0x67   : > { %4570 = dma.hbm_to_vmem [thread:$0]  (!%p5412_p5), %s6682_s5, 1024, %s5418_s17, [#allocation12], %s6649_s9, %s6649_s9, %s6650_s13  }
  0x68   : > { %s5308_s18 = smov [#allocation10]   ;;  %s5309_s20 = smov [#allocation13]  }
  0x69   : > { %s278_s19 = sshll.u32 %s5308_s18, 4  ;;  %s302_s21 = sshll.u32 %s5309_s20, 4  ;;  %s279_s19 = int_to_ptr.vmem [resolvable:$true] %s278_s19  ;;  %s303_s21 = int_to_ptr.vmem [resolvable:$true] %s302_s21 }
  0x6a   : > { %s6683_s4 = sld [smem:[#allocation43_spill]] }
  0x70   : > { %s5071_s25 = scalar_lea.hbm %s6683_s4, 16 }
  0x71   : > { %p5072_p13 = scmp.ne.s32.totalorder %s6683_s4, %s5071_s25  ;;  %p5078_p4 = scmp.lt.u32.totalorder %s5071_s25, %s6683_s4 }
  0x73   : > { %p5074_p0 = pnand %p5072_p13, %p5428_p7 }
  0x75   : > { %p5075_p2 = pneg %p5074_p0 }
  0x77   : > { %p5080_p6 = pnand %p5078_p4, %p5075_p2 }
  0x79   : > { %5083 = shalt.err (!%p5080_p6)
}
  0x7a   : > { %s5084_s17 = scalar_lea.vmem %s279_s19, 16  ;;  %s5091_s16 = scalar_lea.vmem %s279_s19, 32 }
  0x7b   : > { %p5085_p8 = scmp.ne.s32.totalorder %s279_s19, %s5084_s17  ;;  %p5092_p11 = scmp.lt.s32.totalorder %s279_s19, %s279_s19 }
  0x7c   : > { %p5093_p12 = scmp.lt.s32.totalorder %s5091_s16, %s5084_s17 }
  0x7d   : > { %p5087_p9 = pnand %p5085_p8, %p5428_p7 }
  0x7e   : > { %p5094_p1 = por %p5093_p12, %p5092_p11 }
  0x7f   : > { %p5088_p10 = pneg %p5087_p9 }
  0x81   : > { %p5095_p3 = pnand %p5094_p1, %p5088_p10 }
  0x83   : > { %5098 = shalt.err (!%p5095_p3)
}
  0x84   : > { %4567 = dma.hbm_to_vmem [thread:$0]  (!%p5412_p5), %s6683_s4, 16, %s279_s19, [#allocation9]  }
  0x85   : > { %s6684_s6 = sld [smem:[#allocation45_spill]] }
  0x8b   : > { %s5099_s24 = scalar_lea.hbm %s6684_s6, 64 }
  0x8c   : > { %p5100_p13 = scmp.ne.s32.totalorder %s6684_s6, %s5099_s24  ;;  %p5106_p3 = scmp.lt.u32.totalorder %s5099_s24, %s6684_s6 }
  0x8e   : > { %p5102_p0 = pnand %p5100_p13, %p5428_p7 }
  0x90   : > { %p5103_p1 = pneg %p5102_p0 }
  0x92   : > { %p5108_p2 = pnand %p5106_p3, %p5103_p1 }
  0x94   : > { %5111 = shalt.err (!%p5108_p2)
}
  0x95   : > { %s5112_s17 = scalar_lea.vmem %s303_s21, 64  ;;  %p5120_p9 = scmp.lt.s32.totalorder %s303_s21, %s303_s21 }
  0x96   : > { %p5113_p4 = scmp.ne.s32.totalorder %s303_s21, %s5112_s17  ;;  %p5121_p10 = scmp.lt.s32.totalorder %s5112_s17, %s5112_s17 }
  0x98   : > { %p5115_p6 = pnand %p5113_p4, %p5428_p7  ;;  %p5122_p11 = por %p5121_p10, %p5120_p9 }
  0x9a   : > { %p5116_p8 = pneg %p5115_p6 }
  0x9c   : > { %p5123_p12 = pnand %p5122_p11, %p5116_p8 }
  0x9e   : > { %5126 = shalt.err (!%p5123_p12)
}
  0x9f   : > { %4573 = dma.hbm_to_vmem [thread:$0]  (!%p5412_p5), %s6684_s6, 64, %s303_s21, [#allocation12]  }
  0xa0   : > { %s5310_s18 = smov [#allocation14]   ;;  %s5127_s24 = scalar_lea.hbm %s6645_s7, 16 }
  0xa1   : > { %s313_s20 = sshll.u32 %s5310_s18, 4  ;;  %p5128_p13 = scmp.ne.s32.totalorder %s6645_s7, %s5127_s24  ;;  %s314_s20 = int_to_ptr.vmem [resolvable:$true] %s313_s20 }
  0xa2   : > { %p5134_p3 = scmp.lt.u32.totalorder %s5127_s24, %s6645_s7 }
  0xa3   : > { %p5130_p0 = pnand %p5128_p13, %p5428_p7 }
  0xa5   : > { %p5131_p1 = pneg %p5130_p0 }
  0xa7   : > { %p5136_p2 = pnand %p5134_p3, %p5131_p1 }
  0xa9   : > { %5139 = shalt.err (!%p5136_p2)
}
  0xaa   : > { %s5140_s21 = scalar_lea.vmem %s314_s20, 16  ;;  %s5147_s17 = scalar_lea.vmem %s314_s20, 32 }
  0xab   : > { %p5141_p4 = scmp.ne.s32.totalorder %s314_s20, %s5140_s21  ;;  %p5148_p9 = scmp.lt.s32.totalorder %s314_s20, %s314_s20 }
  0xac   : > { %p5149_p10 = scmp.lt.s32.totalorder %s5147_s17, %s5140_s21 }
  0xad   : > { %p5143_p6 = pnand %p5141_p4, %p5428_p7 }
  0xae   : > { %p5150_p11 = por %p5149_p10, %p5148_p9 }
  0xaf   : > { %p5144_p8 = pneg %p5143_p6 }
  0xb1   : > { %p5151_p12 = pnand %p5150_p11, %p5144_p8 }
  0xb3   : > { %5154 = shalt.err (!%p5151_p12)
}
  0xb4   : > { %4576 = dma.hbm_to_vmem [thread:$0]  (!%p5412_p5), %s6645_s7, 16, %s314_s20, [#allocation15]  }
  0xb5   : > { %s3897_s23 = sadd.s32 4294967294, %s5301_s30   ;;  %s5560_s15 = sadd.s32 1, %s5301_s30  }
  0xb6   : > { %s34_s18 = ssub.s32 %s5301_s30, %s5560_s15  ;;  %s37_s2 = sadd.s32 1, %s5297_s29 }
  0xb7   : > { %p35_p7 = scmp.eq.s32.totalorder %s34_s18, 0  ;;  %p44_p13 = scmp.ne.s32.totalorder %s5297_s29, %s5293_s28 }
  0xb8   : > { %p45_p0 = scmp.eq.s32.totalorder %s5301_s30, 0  ;;  %p50_p1 = scmp.ne.s32.totalorder %s5293_s28, %s5289_s27 }
  0xb9   : > { %s5571_s22 = scalar_select %p35_p7, %s5297_s29, %s37_s2  }
  0xba   : > { %p5573_p3 = por %p45_p0, %p44_p13  ;;  %p6686_p2 = scmp.eq.s32.totalorder %s5397_s11, 0 }
  0xbb   : > { %p226_p4 = scmp.eq.s32.totalorder %s5397_s11, 3  ;;  %p232_p6 = scmp.eq.s32.totalorder %s3897_s23, 3 }
  0xbc   : > { %p5579_p5 = por %p6686_p2, %p50_p1  ;;  %p4594_p8 = scmp.lt.s32.totalorder %s5301_s30, 4 }
  0xbd   : > { %s5586_s25 = sand.u32 1, %s5297_s29   ;;  %p5588_p9 = por %p226_p4, %p44_p13 }
  0xbe   : > { %s6687_s20 = scalar_select %p5579_p5, 1, 0 }
  0xbf   : > { %s6688_s26 = scalar_select %p5588_p9, 1, 0 }
  0xc0   : > { %p5592_p10 = por %p232_p6, %p50_p1  ;;  %s3906_s10 = sshll.u32 %s5586_s25, 5 }
  0xc1   : > { %s4041_s21 = sshll.u32 %s5301_s30, 9  ;;  %s6690_s0 = sld [smem:[#allocation40_spill]] }
  0xc2   : > { %s6689_s14 = scalar_select %p5592_p10, 1, 0 }
  0xc3   : > { %s328_s23 = scalar_lea.vmem [#allocation2], %s3906_s10  ;;  %p5607_p11 = pnand %p4594_p8, %p5573_p3 }
  0xc4   : > { %s335_s18 = sshll.u32 %s328_s23, 4  ;;  %s3909_s13 = sshll.u32 %s5586_s25, 3  ;;  %s5603_s18 = int_to_ptr.vmem [resolvable:$true] %s335_s18 }
  0xc5   : > { %s325_s17 = scalar_lea.sflag [#allocation3], %s5586_s25  ;;  %p5157_p7 = pneg %p5607_p11 }
  0xc7   : > { %s5601_s16 = scalar_lea.hbm %s6690_s0, %s4041_s21  ;;  %s5160_s24 = scalar_lea.hbm %s6690_s0, 2048 }
  0xc8   : > { %s5155_s21 = scalar_lea.hbm %s5601_s16, 512  ;;  %p5161_p1 = scmp.lt.u32.totalorder %s5601_s16, %s6690_s0 }
  0xc9   : > { %p5156_p12 = scmp.ne.s32.totalorder %s5601_s16, %s5155_s21  ;;  %p5162_p3 = scmp.lt.u32.totalorder %s5160_s24, %s5155_s21 }
  0xca   : > { %p5164_p4 = scmp.lt.u32.totalorder %s5155_s21, %s5601_s16 }
  0xcb   : > { %p5158_p13 = pnand %p5157_p7, %p5156_p12  ;;  %p5163_p2 = por %p5162_p3, %p5161_p1 }
  0xcd   : > { %p5159_p0 = pneg %p5158_p13  ;;  %p5165_p6 = por %p5164_p4, %p5163_p2 }
  0xcf   : > { %p5166_p8 = pnand %p5165_p6, %p5159_p0 }
  0xd1   : > { %5169 = shalt.err (!%p5166_p8)
}
  0xd2   : > { %s5170_s9 = scalar_lea.vmem %s5603_s18, 512  ;;  %s5311_s10 = smov [#allocation2]  }
  0xd3   : > { %p5171_p12 = scmp.ne.s32.totalorder %s5603_s18, %s5170_s9  ;;  %s5175_s19 = sshll.u32 %s5311_s10, 4  ;;  %s5176_s19 = int_to_ptr.vmem [resolvable:$false] %s5175_s19 }
  0xd4   : > { %s5177_s3 = scalar_lea.vmem %s5176_s19, 1024  ;;  %p5178_p9 = scmp.lt.s32.totalorder %s5603_s18, %s5176_s19 }
  0xd5   : > { %p5173_p13 = pnand %p5171_p12, %p5157_p7  ;;  %p5179_p1 = scmp.lt.s32.totalorder %s5177_s3, %s5170_s9 }
  0xd7   : > { %p5174_p10 = pneg %p5173_p13  ;;  %p5180_p3 = por %p5179_p1, %p5178_p9 }
  0xd9   : > { %p5181_p2 = pnand %p5180_p3, %p5174_p10 }
  0xdb   : > { %5184 = shalt.err (!%p5181_p2)
}
  0xdc   : > { %s6692_s21 = smov 8   ;;  %s6693_s24 = smov 128  }
  0xdd   : > { %4580 = dma.hbm_to_vmem [thread:$0]  (!%p5607_p11), %s5601_s16, 512, %s5603_s18, %s325_s17, %s6693_s24, %s6693_s24, %s6692_s21  }
  0xde   : > { %s3910_s23 = sshll.u32 %s5301_s30, 7  ;;  %s349_s3 = scalar_lea.vmem [#allocation5], %s3909_s13 }
  0xdf   : > { %s5648_s19 = scalar_lea.hbm %s6639_s1, %s3910_s23  ;;  %s356_s0 = sshll.u32 %s349_s3, 4  ;;  %s357_s0 = int_to_ptr.vmem [resolvable:$true] %s356_s0 }
  0xe0   : > { %s6694_s4 = sand.u32 1, %s5301_s30   ;;  %s5185_s6 = scalar_lea.hbm %s5648_s19, 128 }
  0xe1   : > { %s346_s5 = scalar_lea.sflag [#allocation6], %s6694_s4  ;;  %p5186_p9 = scmp.ne.s32.totalorder %s5648_s19, %s5185_s6 }
  0xe2   : > { %s5190_s17 = scalar_lea.hbm %s6639_s1, 512  ;;  %p5191_p4 = scmp.lt.u32.totalorder %s5648_s19, %s6639_s1 }
  0xe3   : > { %p5188_p10 = pnand %p5186_p9, %p5157_p7  ;;  %p5192_p6 = scmp.lt.u32.totalorder %s5190_s17, %s5185_s6 }
  0xe4   : > { %p5194_p12 = scmp.lt.u32.totalorder %s5185_s6, %s5648_s19 }
  0xe5   : > { %p5189_p0 = pneg %p5188_p10  ;;  %p5193_p8 = por %p5192_p6, %p5191_p4 }
  0xe7   : > { %p5195_p13 = por %p5194_p12, %p5193_p8 }
  0xe9   : > { %p5196_p1 = pnand %p5195_p13, %p5189_p0 }
  0xeb   : > { %5199 = shalt.err (!%p5196_p1)
}
  0xec   : > { %s5200_s4 = scalar_lea.vmem %s357_s0, 128  ;;  %s5312_s13 = smov [#allocation5]  }
  0xed   : > { %p5201_p3 = scmp.ne.s32.totalorder %s357_s0, %s5200_s4  ;;  %s5205_s24 = sshll.u32 %s5312_s13, 4  ;;  %s5206_s24 = int_to_ptr.vmem [resolvable:$false] %s5205_s24 }
  0xee   : > { %s5207_s23 = scalar_lea.vmem %s5206_s24, 256  ;;  %p5208_p10 = scmp.lt.s32.totalorder %s357_s0, %s5206_s24 }
  0xef   : > { %p5203_p2 = pnand %p5201_p3, %p5157_p7  ;;  %p5209_p5 = scmp.lt.s32.totalorder %s5207_s23, %s5200_s4 }
  0xf1   : > { %p5204_p9 = pneg %p5203_p2  ;;  %p5210_p4 = por %p5209_p5, %p5208_p10 }
  0xf3   : > { %p5211_p6 = pnand %p5210_p4, %p5204_p9 }
  0xf5   : > { %5214 = shalt.err (!%p5211_p6)
}
  0xf6   : > { %4583 = dma.hbm_to_vmem [thread:$0]  (!%p5607_p11), %s5648_s19, 128, %s357_s0, %s346_s5  }
  0xf7   : > { %p6695_p0 = scmp.ne.s32.totalorder %s6677_s12, 0 }
  0xf9   : > { %365 = sbr.rel (%p6695_p0) target bundleno = 3168 (0xc60), region = 52 }
 0x100   : > { %s5676_s6 = sand.u32 1, %s5293_s28   ;;  %p6696_p5 = scmp.ne.s32.totalorder %s6687_s20, 0 }
 0x101   : > { %s3912_s10 = sshll.u32 %s5676_s6, 5  ;;  %s368_s9 = scalar_lea.sflag [#allocation3], %s5676_s6 }
 0x102   : > { %s5682_s3 = scalar_lea.vmem [#allocation2], %s3912_s10 }
 0x103   : > { %5260 = dma.done.wait (%p6696_p5), %s368_s9, 512  }
 0x104   : > { %5262 = vsyncadd (%p6696_p5), %s368_s9, 4294966784  ;;  %s376_s0 = sand.u32 1, %s5397_s11   ;;  %s3913_s5 = sshll.u32 %s5676_s6, 3 }
 0x105   : > { %s377_s12 = scalar_lea.sflag [#allocation6], %s376_s0  ;;  %s5690_s2 = scalar_lea.vmem [#allocation5], %s3913_s5 }
 0x106   : > { %5264 = dma.done.wait (%p6696_p5), %s377_s12, 128  }
 0x107   : > { %5266 = vsyncadd (%p6696_p5), %s377_s12, 4294967168  ;;  %p6697_p11 = scmp.eq.s32.totalorder %s5397_s11, 0 }
 0x109   : > { %5268 = dma.done.wait (%p6697_p11), [#allocation6], 256   ;;  %p6698_p7 = pmov %p6697_p11 }
 0x10b   : > { %5270 = vsyncadd (%p6698_p7), [#allocation6], 4294967040  ;;  %p6699_p8 = pmov %p6698_p7 }
 0x10c   : > { %p6700_p12 = pmov %p6698_p7 }
 0x10d   : > { %5272 = dma.done.wait (%p6699_p8), [#allocation9], 1040  }
 0x10e   : > { %5274 = vsyncadd (%p6700_p12), [#allocation9], 4294966256  ;;  %p6701_p13 = pmov %p6698_p7 }
 0x10f   : > { %p6702_p1 = pmov %p6698_p7 }
 0x110   : > { %5276 = dma.done.wait (%p6701_p13), [#allocation12], 1088  }
 0x111   : > { %5278 = vsyncadd (%p6702_p1), [#allocation12], 4294966208  ;;  %p6703_p3 = pmov %p6702_p1 }
 0x112   : > { %p6704_p2 = pmov %p6702_p1 }
 0x113   : > { %5280 = dma.done.wait (%p6703_p3), [#allocation15], 16  }
 0x114   : > { %5282 = vsyncadd (%p6704_p2), [#allocation15], 4294967280  ;;  %vm461_vm0 = vcmask 130048   ;;  %v459_v0 = vld [vmem:[#allocation7] sm:$0xff]  ;;  %v460_v1 = vld [vmem:[#allocation7 + $0x8] sm:$0xff]  ;;  %vm567_vm1 = vcmask 523264  }
 0x115   : > { %v442_v2 = vld [vmem:[%s5682_s3] sm:$0xff]  ;;  %v4408_v3 = vpack.c.bf16 %v460_v1, %v459_v0  ;;  %v560_v5 = vld [vmem:[#allocation8 + $0x8] sm:$0xff]  ;;  %v561_v6 = vld [vmem:[#allocation8 + $0x10] sm:$0xff]  ;;  %s5313_s20 = smov 96   ;;  %s5314_s19 = smov 120   ;;  %v5315_v25 = vmov 0  }
 0x116   : > { %4182 = vmatprep.mubr.msk.f32.mxu0 %vm461_vm0, %v442_v2  ;;  %v559_v4 = vld [vmem:[#allocation8] sm:$0xff]  ;;  %v562_v8 = vld [vmem:[#allocation8 + $0x18] sm:$0xff]  ;;  %v443_v9 = vld [vmem:[%s5682_s3 + $0x8] sm:$0xff]  ;;  %4695 = vset.pattern.permute.xlu1 %v5315_v25  ;;  %s5316_s16 = smov 112   ;;  %s5317_s18 = smov 104   ;;  %v5318_v28 = vmov 1  }
 0x117   : > { %4409 = vmatprep.subr.bf16.mxu0 %v4408_v3  ;;  %v4412_v7 = vpack.c.bf16 %v560_v5, %v559_v4  ;;  %v4416_v10 = vpack.c.bf16 %v562_v8, %v561_v6  ;;  %v563_v11 = vld [vmem:[#allocation8 + $0x20] sm:$0xff]  ;;  %v564_v12 = vld [vmem:[#allocation8 + $0x28] sm:$0xff]  ;;  %v444_v13 = vld [vmem:[%s5682_s3 + $0x10] sm:$0xff]  ;;  %4696 = vset.pattern.permute.xlu0 %v5318_v28  ;;  %v5319_v36 = vmov 2   ;;  %v5320_v38 = vmov 3   ;;  %s5325_s17 = smov 88  }
 0x118   : > { %4411 = vmatpush3.bf16.msra.mxu0 %v4408_v3  ;;  %v4420_v14 = vpack.c.bf16 %v564_v12, %v563_v11  ;;  %v445_v15 = vld [vmem:[%s5682_s3 + $0x18] sm:$0xff]  ;;  %v565_v16 = vld [vmem:[#allocation8 + $0x30] sm:$0xff]  ;;  %v5321_v39 = vmov 5   ;;  %v5322_v40 = vmov 4   ;;  %v5323_v41 = vmov 7   ;;  %v446_v11 = vld [vmem:[%s5690_s2] sm:$0xff] }
 0x119   : > { %4413 = vmatprep.subr.bf16.mxu1 %v4412_v7  ;;  %v566_v17 = vld [vmem:[#allocation8 + $0x38] sm:$0xff]  ;;  %v5324_v42 = vmov 6   ;;  %v730_v12 = vlaneseq  ;;  %vm754_vm3 = vcmask 261120   ;;  %s5326_s25 = smov 80   ;;  %s5327_s21 = smov 72  }
 0x11a   : > { %4415 = vmatpush3.bf16.msra.mxu1 %v4412_v7  ;;  %v4424_v18 = vpack.c.bf16 %v566_v17, %v565_v16  ;;  %v447_v17 = vunpack.c.0.s8 %v446_v11  ;;  %s441_s4 = scalar_lea.vmem [#allocation16], %s3912_s10  ;;  %s4042_s13 = sshll.u32 %s5397_s11, 9 }
 0x11b   : > { %4183 = vmatmul.mubr.msk.f32.vlgmr.msra.gmra.mrb[0].mxu0 %vm461_vm0, %v443_v9  ;;  %4417 = vmatprep.subr.bf16.mxu1 %v4416_v10  ;;  %s3744_s24 = sshll.u32 %s441_s4, 4  ;;  %s6592_s10 = scalar_lea.hbm %s6646_s8, %s4042_s13  ;;  %s6594_s24 = int_to_ptr.vmem [resolvable:$true] %s3744_s24 }
 0x11c   : > { %4185 = vmatprep.mubr.msk.f32.mxu0 %vm461_vm0, %v444_v13  ;;  %s3731_s3 = scalar_lea.sflag [#allocation4], %s5676_s6  ;;  %s5215_s11 = scalar_lea.vmem %s6594_s24, 512 }
 0x11d   : > { %p5216_p9 = scmp.ne.s32.totalorder %s6594_s24, %s5215_s11  ;;  %p6738_p10 = scmp.ne.s32.totalorder %s6688_s26, 0 }
 0x11e   : > { %4419 = vmatpush3.bf16.msra.mxu1 %v4416_v10  ;;  %s5328_s0 = smov [#allocation16]  }
 0x11f   : > { %4186 = vmatmul.mubr.msk.f32.gmra.mrb[2].mxu0 %vm461_vm0, %v445_v15  ;;  %4421 = vmatprep.subr.bf16.mxu1 %v4420_v14  ;;  %v5811_v15 = vshrl.u32 %v730_v12, 7  ;;  %p5217_p4 = pnand %p5216_p9, %p6738_p10  ;;  %s5219_s5 = sshll.u32 %s5328_s0, 4  ;;  %s5220_s5 = int_to_ptr.vmem [resolvable:$false] %s5219_s5 }
 0x120   : > { %s5221_s12 = scalar_lea.vmem %s5220_s5, 1024  ;;  %p5222_p0 = scmp.lt.s32.totalorder %s6594_s24, %s5220_s5 }
 0x121   : > { %6705 = vst [vmem:[#allocation24_spill] sm:$0xff] %v5811_v15  ;;  %p5218_p6 = pneg %p5217_p4  ;;  %p5223_p5 = scmp.lt.s32.totalorder %s5221_s12, %s5215_s11 }
 0x122   : > { %4423 = vmatpush3.bf16.msra.mxu1 %v4420_v14  ;;  %v448_v14 = vunpack.c.1.s8 %v446_v11 }
 0x123   : > { %4425 = vmatprep.subr.bf16.mxu1 %v4424_v18  ;;  %p5224_p11 = por %p5223_p5, %p5222_p0 }
 0x125   : > { %p5225_p7 = pnand %p5224_p11, %p5218_p6 }
 0x126   : > { %4427 = vmatpush3.bf16.msra.mxu1 %v4424_v18  ;;  %v449_v18 = vunpack.c.2.s8 %v446_v11 }
 0x1ee   : > { %v4184_v19 = vpop.f32.mrb[0].mxu0 }
 0x1ef   : > { %v540_v20 = vpop.f32.mrb[1].mxu0 }
 0x1f0   : > { %4204 = vmatprep.mubr.msk.f32.mxu1 %vm567_vm1, %v540_v20  ;;  %v5721_v21 = vpack.i.bf16 %v4184_v19, %v540_v20  ;;  %v4428_v22 = vpack.c.bf16 %v4184_v19, %v540_v20 }
 0x1f1   : > { %4205 = vmatmul.mubr.msk.f32.vlgmr.msra.gmra.mrb[0].mxu1 %vm567_vm1, %v4184_v19  ;;  %v450_v19 = vunpack.c.3.s8 %v446_v11 }
 0x1f2   : > { %4676 = vrot.lane.b32.xlu0 %v5721_v21, %s5313_s20  ;;  %4661 = vrot.lane.b32.xlu1 %v5721_v21, %s5314_s19  ;;  %v4187_v23 = vpop.f32.mrb[2].mxu0 }
 0x1f3   : > { %4429 = vmatprep.subr.bf16.mxu0 %v4428_v22  ;;  %v550_v24 = vpop.f32.mrb[3].mxu0 }
 0x1f4   : > { %4431 = vmatpush3.bf16.msra.mxu0 %v4428_v22  ;;  %v5729_v26 = vpack.i.bf16 %v4187_v23, %v550_v24  ;;  %4207 = vmatprep.mubr.msk.f32.mxu1 %vm567_vm1, %v550_v24  ;;  %v4432_v27 = vpack.c.bf16 %v4187_v23, %v550_v24  ;;  %v5817_v22 = vcvt.s32.f32 %v448_v14  ;;  %v6653_v24 = vsub.s32 1, %v5811_v15 }
 0x1f5   : > { %4208 = vmatmul.mubr.msk.f32.gmra.mrb[2].mxu1 %vm567_vm1, %v4187_v23  ;;  %v732_v23 = vsub.s32 0, %v5811_v15 }
 0x1f6   : > { %4666 = vrot.lane.b32.xlu1 %v5721_v21, %s5316_s16  ;;  %4681 = vrot.lane.b32.xlu0 %v5729_v26, %s5314_s19  ;;  %6706 = vst [vmem:[#allocation25_spill] sm:$0xff] %v5817_v22  ;;  %vm456_vm2 = vcmp.gt.f32.partialorder %v5817_v22, 0.0 }
 0x1f7   : > { %4433 = vmatprep.subr.bf16.mxu0 %v4432_v27 }
 0x1f8   : > { %4435 = vmatpush3.bf16.msra.mxu0 %v4432_v27  ;;  %v5822_v27 = vcvt.s32.f32 %v447_v17 }
 0x1fa   : > { %4671 = vrot.lane.b32.xlu1 %v5721_v21, %s5317_s18  ;;  %4686 = vrot.lane.b32.xlu0 %v5729_v26, %s5316_s16  ;;  %6707 = vst [vmem:[#allocation26_spill] sm:$0xff] %v5822_v27  ;;  %vm455_vm4 = vcmp.gt.f32.partialorder %v5822_v27, 0.0 }
 0x1fe   : > { %4691 = vrot.lane.b32.xlu1 %v5729_v26, %s5317_s18 }
 0x264   : > { %v4662_v29 = vpop.permute.xlu1 %4661  ;;  %v5764_v43 = vpop.permute.xlu0 %4676 }
 0x265   : > { %v4664_v30 = vunpack.i.h.bf16 %v4662_v29  ;;  %v4663_v31 = vunpack.i.l.bf16 %v4662_v29  ;;  %v5826_v29 = vcvt.s32.f32 %v450_v19 }
 0x267   : > { %v5743_v32 = vpack.c.bf16 %v4664_v30, %v4663_v31  ;;  %6709 = vst [vmem:[#allocation28_spill] sm:$0xff] %v5826_v29  ;;  %v1707_v30 = vsub.s32 3, %v5811_v15  ;;  %vm458_vm6 = vcmp.gt.f32.partialorder %v5826_v29, 0.0 }
 0x268   : > { %v5766_v44 = vpop.permute.xlu1 %4666  ;;  %v5769_v45 = vpop.permute.xlu0 %4681 }
 0x269   : > { %4437 = vmatprep.subr.bf16.mxu0 %v5743_v32 }
 0x26c   : > { %v5771_v46 = vpop.permute.xlu1 %4671  ;;  %v5775_v48 = vpop.permute.xlu0 %4686 }
 0x270   : > { %v5773_v47 = vpop.permute.xlu1 %4691 }
 0x2c4   : > { %v4206_v33 = vpop.f32.mrb[0].mxu1 }
 0x2c5   : > { %v646_v34 = vpop.f32.mrb[1].mxu1  ;;  %719 = vperm.xlu1 %4695, %v4206_v33   ;;  %671 = vrot.lane.b32.xlu0 %v4206_v33, %s5314_s19 }
 0x2c8   : > { %v4209_v35 = vpop.f32.mrb[2].mxu1 }
 0x2c9   : > { %4697 = vset.pattern.permute.xlu1 %v5319_v36  ;;  %940 = vperm.xlu0 %4696, %v4206_v33   ;;  %v5747_v37 = vpop.f32.mrb[3].mxu1 }
 0x2ca   : > { %1364 = vperm.xlu1 %4697, %v4206_v33  }
 0x2cd   : > { %4698 = vset.pattern.permute.xlu0 %v5320_v38 }
 0x2ce   : > { %4700 = vset.pattern.permute.xlu1 %v5321_v39  ;;  %1694 = vperm.xlu0 %4698, %v4206_v33  }
 0x2cf   : > { %2354 = vperm.xlu1 %4700, %v4206_v33  }
 0x2d2   : > { %4699 = vset.pattern.permute.xlu0 %v5322_v40 }
 0x2d3   : > { %4702 = vset.pattern.permute.xlu1 %v5323_v41  ;;  %2024 = vperm.xlu0 %4699, %v4206_v33  }
 0x2d4   : > { %3014 = vperm.xlu1 %4702, %v4206_v33  }
 0x2d7   : > { %4701 = vset.pattern.permute.xlu0 %v5324_v42 }
 0x2d8   : > { %4704 = vset.pattern.permute.xlu1 %v5318_v28  ;;  %2684 = vperm.xlu0 %4701, %v4206_v33  }
 0x2d9   : > { %936 = vperm.xlu1 %4704, %v646_v34  }
 0x2dc   : > { %669 = vrot.lane.b32.xlu0 %v646_v34, %s5314_s19 }
 0x2dd   : > { %675 = vrot.lane.b32.xlu1 %v4209_v35, %s5314_s19  ;;  %4703 = vset.pattern.permute.xlu0 %v5315_v25 }
 0x2e0   : > { %715 = vperm.xlu0 %4703, %v646_v34  }
 0x2e1   : > { %948 = vperm.xlu1 %4704, %v4209_v35  }
 0x2e4   : > { %4705 = vset.pattern.permute.xlu0 %v5319_v36 }
 0x2e5   : > { %1360 = vperm.xlu0 %4705, %v646_v34   ;;  %4716 = vset.pattern.permute.xlu1 %v5324_v42 }
 0x2e6   : > { %2692 = vperm.xlu1 %4716, %v4209_v35  }
 0x2e9   : > { %4706 = vset.pattern.permute.xlu0 %v5320_v38 }
 0x2ea   : > { %1690 = vperm.xlu0 %4706, %v646_v34   ;;  %673 = vrot.lane.b32.xlu1 %v5747_v37, %s5314_s19 }
 0x2eb   : > { %4718 = vset.pattern.permute.xlu1 %v5315_v25 }
 0x2ee   : > { %4707 = vset.pattern.permute.xlu0 %v5322_v40  ;;  %723 = vperm.xlu1 %4718, %v5747_v37  }
 0x2ef   : > { %2020 = vperm.xlu0 %4707, %v646_v34  }
 0x2f2   : > { %4719 = vset.pattern.permute.xlu1 %v5318_v28  ;;  %v5824_v28 = vcvt.s32.f32 %v449_v18 }
 0x2f3   : > { %4708 = vset.pattern.permute.xlu0 %v5321_v39  ;;  %944 = vperm.xlu1 %4719, %v5747_v37  }
 0x2f4   : > { %2350 = vperm.xlu0 %4708, %v646_v34   ;;  %6708 = vst [vmem:[#allocation27_spill] sm:$0xff] %v5824_v28  ;;  %vm457_vm5 = vcmp.gt.f32.partialorder %v5824_v28, 0.0 }
 0x2f7   : > { %4725 = vset.pattern.permute.xlu1 %v5323_v41 }
 0x2f8   : > { %4709 = vset.pattern.permute.xlu0 %v5324_v42  ;;  %3018 = vperm.xlu1 %4725, %v5747_v37  }
 0x2f9   : > { %2680 = vperm.xlu0 %4709, %v646_v34  }
 0x2fd   : > { %4710 = vset.pattern.permute.xlu0 %v5323_v41 }
 0x2fe   : > { %3010 = vperm.xlu0 %4710, %v646_v34  }
 0x302   : > { %4711 = vset.pattern.permute.xlu0 %v5315_v25 }
 0x303   : > { %727 = vperm.xlu0 %4711, %v4209_v35  }
 0x307   : > { %4712 = vset.pattern.permute.xlu0 %v5319_v36 }
 0x308   : > { %1372 = vperm.xlu0 %4712, %v4209_v35  }
 0x30c   : > { %4713 = vset.pattern.permute.xlu0 %v5320_v38 }
 0x30d   : > { %1702 = vperm.xlu0 %4713, %v4209_v35  }
 0x311   : > { %4714 = vset.pattern.permute.xlu0 %v5322_v40 }
 0x312   : > { %2032 = vperm.xlu0 %4714, %v4209_v35  }
 0x316   : > { %4715 = vset.pattern.permute.xlu0 %v5321_v39 }
 0x317   : > { %2362 = vperm.xlu0 %4715, %v4209_v35  }
 0x31b   : > { %4717 = vset.pattern.permute.xlu0 %v5323_v41 }
 0x31c   : > { %3022 = vperm.xlu0 %4717, %v4209_v35  }
 0x320   : > { %4720 = vset.pattern.permute.xlu0 %v5319_v36 }
 0x321   : > { %1368 = vperm.xlu0 %4720, %v5747_v37  }
 0x325   : > { %4721 = vset.pattern.permute.xlu0 %v5320_v38 }
 0x326   : > { %1698 = vperm.xlu0 %4721, %v5747_v37  }
 0x32a   : > { %4722 = vset.pattern.permute.xlu0 %v5322_v40 }
 0x32b   : > { %2028 = vperm.xlu0 %4722, %v5747_v37  }
 0x32f   : > { %4723 = vset.pattern.permute.xlu0 %v5321_v39 }
 0x330   : > { %2358 = vperm.xlu0 %4723, %v5747_v37  }
 0x334   : > { %4724 = vset.pattern.permute.xlu0 %v5324_v42 }
 0x335   : > { %2688 = vperm.xlu0 %4724, %v5747_v37  }
 0x337   : > { %v672_v49 = vpop.permute.xlu0 %671 }
 0x339   : > { %4761 = vset.pattern.permute.xlu0 %v5315_v25 }
 0x344   : > { %v720_v50 = vpop.permute.xlu1 %719 }
 0x348   : > { %v5777_v51 = vpop.permute.xlu0 %940 }
 0x349   : > { %v5779_v52 = vpop.permute.xlu1 %1364 }
 0x34d   : > { %v5781_v53 = vpop.permute.xlu0 %1694 }
 0x34e   : > { %v5783_v54 = vpop.permute.xlu1 %2354 }
 0x352   : > { %v5785_v55 = vpop.permute.xlu0 %2024 }
 0x353   : > { %v5787_v56 = vpop.permute.xlu1 %3014 }
 0x357   : > { %v5789_v57 = vpop.permute.xlu0 %2684 }
 0x358   : > { %v937_v58 = vpop.permute.xlu1 %936 }
 0x35b   : > { %v670_v59 = vpop.permute.xlu0 %669 }
 0x35c   : > { %v676_v60 = vpop.permute.xlu1 %675  ;;  %681 = vxpose.xlu1.b32.start [1/4] (short) (narrow) %v670_v59, 8 }
 0x35f   : > { %v716_v0 = vpop.permute.xlu0 %715 }
 0x360   : > { %v5791_v61 = vpop.permute.xlu1 %948  ;;  %682 = vxpose.xlu1.b32.cont [2/4] (short) (narrow) %v672_v49, 8 }
 0x364   : > { %v1361_v1 = vpop.permute.xlu0 %1360 }
 0x365   : > { %v5793_v62 = vpop.permute.xlu1 %2692 }
 0x369   : > { %v674_v63 = vpop.permute.xlu1 %673  ;;  %v5796_v2 = vpop.permute.xlu0 %1690 }
 0x36a   : > { %683 = vxpose.xlu1.b32.cont [3/4] (short) (narrow) %v674_v63, 8 }
 0x36d   : > { %v724_v9 = vpop.permute.xlu1 %723 }
 0x36e   : > { %684 = vxpose.xlu1.b32.end [4/4] (short) (narrow) %v676_v60, 8  ;;  %v5798_v3 = vpop.permute.xlu0 %2020 }
 0x372   : > { %v945_v13 = vpop.permute.xlu1 %944 }
 0x373   : > { %v5800_v4 = vpop.permute.xlu0 %2350 }
 0x377   : > { %v5815_v20 = vpop.permute.xlu1 %3018 }
 0x378   : > { %v5802_v5 = vpop.permute.xlu0 %2680 }
 0x37d   : > { %v5804_v6 = vpop.permute.xlu0 %3010 }
 0x382   : > { %v728_v7 = vpop.permute.xlu0 %727 }
 0x387   : > { %v5806_v8 = vpop.permute.xlu0 %1372 }
 0x38c   : > { %4762 = vset.pattern.permute.xlu1 %v5315_v25  ;;  %v5808_v10 = vpop.permute.xlu0 %1702  ;;  %v1377_v25 = vsub.s32 2, %v5811_v15 }
 0x391   : > { %v5813_v16 = vpop.permute.xlu0 %2032 }
 0x396   : > { %v5829_v31 = vpop.permute.xlu0 %2362 }
 0x39b   : > { %v5849_v12 = vpop.permute.xlu0 %3022 }
 0x3e2   : > { %v5831_v33 = vpop.trf.xlu1 }
 0x3e3   : > { %v733_v34 = vrot.slane %v5831_v33, %v732_v23  ;;  %v954_v35 = vrot.slane %v5831_v33, %v6653_v24  ;;  %v5839_v36 = vrot.slane %v5831_v33, %v1377_v25  ;;  %v5845_v37 = vrot.slane %v5831_v33, %v1707_v30 }
 0x3e5   : > { %v735_v38 = vadd.f32 %v733_v34, %v720_v50  ;;  %v734_v39 = vadd.f32 %v733_v34, %v716_v0  ;;  %v736_v40 = vadd.f32 %v733_v34, %v724_v9  ;;  %v955_v41 = vadd.f32 %v954_v35, %v937_v58 }
 0x3e6   : > { %v737_v42 = vadd.f32 %v733_v34, %v728_v7  ;;  %v957_v49 = vadd.f32 %v954_v35, %v945_v13  ;;  %v956_v59 = vadd.f32 %v954_v35, %v5777_v51  ;;  %v1379_v60 = vadd.f32 %v5839_v36, %v1361_v1 }
 0x3e7   : > { %vm739_vm7 = vcmp.gt.f32.partialorder %v735_v38, 0.0  ;;  %v743_v63 = vmul.f32 0.2, %v735_v38  ;;  %vm738_vm8 = vcmp.gt.f32.partialorder %v734_v39, 0.0  ;;  %v742_v11 = vmul.f32 0.2, %v734_v39 }
 0x3e8   : > { %vm740_vm9 = vcmp.gt.f32.partialorder %v736_v40, 0.0  ;;  %v744_v14 = vmul.f32 0.2, %v736_v40  ;;  %vm959_vm10 = vcmp.gt.f32.partialorder %v955_v41, 0.0  ;;  %v963_v17 = vmul.f32 0.2, %v955_v41 }
 0x3e9   : > { %v747_v50 = vsel %vm739_vm7, %v735_v38, %v743_v63  ;;  %v746_v0 = vsel %vm738_vm8, %v734_v39, %v742_v11  ;;  %vm741_vm11 = vcmp.gt.f32.partialorder %v737_v42, 0.0  ;;  %v745_v58 = vmul.f32 0.2, %v737_v42 }
 0x3ea   : > { %v5853_v7 = vsel %vm456_vm2, %v747_v50, -1e+30  ;;  %v5857_v51 = vsel %vm455_vm4, %v746_v0, -1e+30  ;;  %v748_v1 = vsel %vm740_vm9, %v736_v40, %v744_v14  ;;  %v967_v9 = vsel %vm959_vm10, %v955_v41, %v963_v17  ;;  %v1369_v40 = vpop.permute.xlu0 %1368 }
 0x3eb   : > { %v758_v13 = vsel %vm754_vm3, %v5853_v7, -inf  ;;  %v755_v18 = vsel %vm754_vm3, %v5857_v51, -inf  ;;  %v5865_v19 = vsel %vm457_vm5, %v748_v1, -1e+30  ;;  %v5869_v23 = vsel %vm455_vm4, %v967_v9, -1e+30 }
 0x3ec   : > { %759 = vmax.xlane.f32.xlu0 %v758_v13  ;;  %756 = vmax.xlane.f32.xlu1 %v755_v18  ;;  %v761_v25 = vsel %vm754_vm3, %v5865_v19, -inf  ;;  %v749_v30 = vsel %vm741_vm11, %v737_v42, %v745_v58  ;;  %vm961_vm12 = vcmp.gt.f32.partialorder %v957_v49, 0.0  ;;  %v2037_v34 = vsub.s32 4, %v5811_v15 }
 0x3ed   : > { %v975_v38 = vsel %vm754_vm3, %v5869_v23, -inf  ;;  %v965_v39 = vmul.f32 0.2, %v957_v49  ;;  %vm960_vm13 = vcmp.gt.f32.partialorder %v956_v59, 0.0  ;;  %vm1383_vm14 = vcmp.gt.f32.partialorder %v1379_v60, 0.0 }
 0x3ee   : > { %v5878_v41 = vsel %vm458_vm6, %v749_v30, -1e+30  ;;  %v964_v63 = vmul.f32 0.2, %v956_v59  ;;  %v1387_v11 = vmul.f32 0.2, %v1379_v60  ;;  %v958_v14 = vadd.f32 %v954_v35, %v5791_v61 }
 0x3ef   : > { %v969_v17 = vsel %vm961_vm12, %v957_v49, %v965_v39  ;;  %v1381_v42 = vadd.f32 %v5839_v36, %v1369_v40  ;;  %v1380_v50 = vadd.f32 %v5839_v36, %v5779_v52  ;;  %v1709_v0 = vadd.f32 %v5845_v37, %v5796_v2  ;;  %v1699_v39 = vpop.permute.xlu0 %1698 }
 0x3f0   : > { %762 = vmax.xlane.f32.xlu0 %v761_v25  ;;  %976 = vmax.xlane.f32.xlu1 %v975_v38  ;;  %v5888_v58 = vsel %vm457_vm5, %v969_v17, -1e+30  ;;  %v968_v1 = vsel %vm960_vm13, %v956_v59, %v964_v63  ;;  %v1391_v9 = vsel %vm1383_vm14, %v1379_v60, %v1387_v11  ;;  %v764_v61 = vsel %vm754_vm3, %v5878_v41, -inf }
 0x3f1   : > { %v5894_v35 = vsel %vm456_vm2, %v968_v1, -1e+30  ;;  %vm962_vm15 = vcmp.gt.f32.partialorder %v958_v14, 0.0  ;;  %vm1385_vm0 = vcmp.gt.f32.partialorder %v1381_v42, 0.0  ;;  %v5898_v52 = vsel %vm455_vm4, %v1391_v9, -1e+30 }
 0x3f2   : > { %v966_v2 = vmul.f32 0.2, %v958_v14  ;;  %v1389_v49 = vmul.f32 0.2, %v1381_v42  ;;  %v5901_v13 = vrot.slane %v5831_v33, %v2037_v34  ;;  %v981_v59 = vsel %vm754_vm3, %v5888_v58, -inf }
 0x3f3   : > { %vm1384_vm1 = vcmp.gt.f32.partialorder %v1380_v50, 0.0  ;;  %v1388_v60 = vmul.f32 0.2, %v1380_v50  ;;  %v1717_v18 = vmul.f32 0.2, %v1709_v0  ;;  %vm1713_vm7 = vcmp.gt.f32.partialorder %v1709_v0, 0.0 }
 0x3f4   : > { %765 = vmax.xlane.f32.xlu0 %v764_v61  ;;  %982 = vmax.xlane.f32.xlu1 %v981_v59  ;;  %v970_v25 = vsel %vm962_vm15, %v958_v14, %v966_v2  ;;  %v1393_v30 = vsel %vm1385_vm0, %v1381_v42, %v1389_v49  ;;  %v1382_v38 = vadd.f32 %v5839_v36, %v5806_v8  ;;  %v978_v40 = vsel %vm754_vm3, %v5894_v35, -inf }
 0x3f5   : > { %v1399_v34 = vsel %vm754_vm3, %v5898_v52, -inf  ;;  %v5913_v63 = vsel %vm458_vm6, %v970_v25, -1e+30  ;;  %v5917_v11 = vsel %vm457_vm5, %v1393_v30, -1e+30  ;;  %v1392_v14 = vsel %vm1384_vm1, %v1380_v50, %v1388_v60 }
 0x3f6   : > { %v1721_v17 = vsel %vm1713_vm7, %v1709_v0, %v1717_v18  ;;  %v1390_v8 = vmul.f32 0.2, %v1382_v38  ;;  %v1711_v36 = vadd.f32 %v5845_v37, %v1699_v39  ;;  %v1710_v42 = vadd.f32 %v5845_v37, %v5781_v53  ;;  %v2029_v0 = vpop.permute.xlu0 %2028 }
 0x3f7   : > { %v2039_v1 = vadd.f32 %v5901_v13, %v5798_v3  ;;  %vm1386_vm8 = vcmp.gt.f32.partialorder %v1382_v38, 0.0  ;;  %v2367_v9 = vsub.s32 5, %v5811_v15  ;;  %v984_v61 = vsel %vm754_vm3, %v5913_v63, -inf }
 0x3f8   : > { %979 = vmax.xlane.f32.xlu0 %v978_v40  ;;  %1400 = vmax.xlane.f32.xlu1 %v1399_v34  ;;  %vm1715_vm9 = vcmp.gt.f32.partialorder %v1711_v36, 0.0  ;;  %v1719_v50 = vmul.f32 0.2, %v1711_v36  ;;  %v1405_v2 = vsel %vm754_vm3, %v5917_v11, -inf  ;;  %v5931_v49 = vsel %vm456_vm2, %v1392_v14, -1e+30 }
 0x3f9   : > { %v5935_v53 = vsel %vm455_vm4, %v1721_v17, -1e+30  ;;  %v1712_v3 = vadd.f32 %v5845_v37, %v5808_v10  ;;  %v1394_v59 = vsel %vm1386_vm8, %v1382_v38, %v1390_v8  ;;  %v1718_v60 = vmul.f32 0.2, %v1710_v42 }
 0x3fa   : > { %v2047_v18 = vmul.f32 0.2, %v2039_v1  ;;  %v2041_v25 = vadd.f32 %v5901_v13, %v2029_v0  ;;  %v1723_v30 = vsel %vm1715_vm9, %v1711_v36, %v1719_v50  ;;  %vm1714_vm10 = vcmp.gt.f32.partialorder %v1710_v42, 0.0 }
 0x3fb   : > { %vm2043_vm11 = vcmp.gt.f32.partialorder %v2039_v1, 0.0  ;;  %v2368_v39 = vrot.slane %v5831_v33, %v2367_v9  ;;  %v1402_v40 = vsel %vm754_vm3, %v5931_v49, -inf  ;;  %v2697_v34 = vsub.s32 6, %v5811_v15 }
 0x3fc   : > { %985 = vmax.xlane.f32.xlu0 %v984_v61  ;;  %1406 = vmax.xlane.f32.xlu1 %v1405_v2  ;;  %v1729_v10 = vsel %vm754_vm3, %v5935_v53, -inf  ;;  %v5948_v37 = vsel %vm458_vm6, %v1394_v59, -1e+30  ;;  %v1720_v38 = vmul.f32 0.2, %v1712_v3  ;;  %v2040_v14 = vadd.f32 %v5901_v13, %v5785_v55 }
 0x3fd   : > { %v5954_v17 = vsel %vm457_vm5, %v1723_v30, -1e+30  ;;  %v1722_v8 = vsel %vm1714_vm10, %v1710_v42, %v1718_v60  ;;  %v2051_v36 = vsel %vm2043_vm11, %v2039_v1, %v2047_v18  ;;  %v2049_v9 = vmul.f32 0.2, %v2041_v25  ;;  %v2359_v1 = vpop.permute.xlu0 %2358 }
 0x3fe   : > { %vm1716_vm12 = vcmp.gt.f32.partialorder %v1712_v3, 0.0  ;;  %vm2045_vm13 = vcmp.gt.f32.partialorder %v2041_v25, 0.0  ;;  %v2369_v61 = vadd.f32 %v2368_v39, %v5800_v4  ;;  %v5958_v50 = vrot.slane %v5831_v33, %v2697_v34 }
 0x3ff   : > { %v1408_v0 = vsel %vm754_vm3, %v5948_v37, -inf  ;;  %v1735_v55 = vsel %vm754_vm3, %v5954_v17, -inf  ;;  %v5966_v2 = vsel %vm456_vm2, %v1722_v8, -1e+30  ;;  %v5970_v42 = vsel %vm455_vm4, %v2051_v36, -1e+30 }
 0x400   : > { %1403 = vmax.xlane.f32.xlu0 %v1402_v40  ;;  %1730 = vmax.xlane.f32.xlu1 %v1729_v10  ;;  %v1724_v4 = vsel %vm1716_vm12, %v1712_v3, %v1720_v38  ;;  %v2053_v59 = vsel %vm2045_vm13, %v2041_v25, %v2049_v9  ;;  %v2048_v60 = vmul.f32 0.2, %v2040_v14  ;;  %v2042_v18 = vadd.f32 %v5901_v13, %v5813_v16 }
 0x401   : > { %vm2044_vm14 = vcmp.gt.f32.partialorder %v2040_v14, 0.0  ;;  %v2377_v30 = vmul.f32 0.2, %v2369_v61  ;;  %v2371_v40 = vadd.f32 %v2368_v39, %v2359_v1  ;;  %vm2373_vm15 = vcmp.gt.f32.partialorder %v2369_v61, 0.0 }
 0x402   : > { %v3027_v34 = vsub.s32 7, %v5811_v15  ;;  %v1732_v10 = vsel %vm754_vm3, %v5966_v2, -inf  ;;  %v2059_v8 = vsel %vm754_vm3, %v5970_v42, -inf  ;;  %v5981_v3 = vsel %vm458_vm6, %v1724_v4, -1e+30 }
 0x403   : > { %v5985_v25 = vsel %vm457_vm5, %v2053_v59, -1e+30  ;;  %v2052_v16 = vsel %vm2044_vm14, %v2040_v14, %v2048_v60  ;;  %v2050_v13 = vmul.f32 0.2, %v2042_v18  ;;  %v2370_v38 = vadd.f32 %v2368_v39, %v5783_v54 }
 0x404   : > { %1409 = vmax.xlane.f32.xlu0 %v1408_v0  ;;  %1736 = vmax.xlane.f32.xlu1 %v1735_v55  ;;  %v2699_v36 = vadd.f32 %v5958_v50, %v5802_v5  ;;  %v2381_v9 = vsel %vm2373_vm15, %v2369_v61, %v2377_v30  ;;  %vm2046_vm0 = vcmp.gt.f32.partialorder %v2042_v18, 0.0  ;;  %v2379_v0 = vmul.f32 0.2, %v2371_v40  ;;  %v2689_v5 = vpop.permute.xlu0 %2688 }
 0x405   : > { %vm2375_vm1 = vcmp.gt.f32.partialorder %v2371_v40, 0.0  ;;  %v5991_v55 = vrot.slane %v5831_v33, %v3027_v34  ;;  %v1738_v1 = vsel %vm754_vm3, %v5981_v3, -inf  ;;  %v2065_v4 = vsel %vm754_vm3, %v5985_v25, -inf }
 0x406   : > { %v5999_v14 = vsel %vm456_vm2, %v2052_v16, -1e+30  ;;  %v2372_v54 = vadd.f32 %v2368_v39, %v5829_v31  ;;  %v6004_v61 = vsel %vm455_vm4, %v2381_v9, -1e+30  ;;  %v2054_v33 = vsel %vm2046_vm0, %v2042_v18, %v2050_v13 }
 0x407   : > { %v2378_v59 = vmul.f32 0.2, %v2370_v38  ;;  %v2707_v60 = vmul.f32 0.2, %v2699_v36  ;;  %v2383_v30 = vsel %vm2375_vm1, %v2371_v40, %v2379_v0  ;;  %vm2374_vm7 = vcmp.gt.f32.partialorder %v2370_v38, 0.0 }
 0x408   : > { %1733 = vmax.xlane.f32.xlu0 %v1732_v10  ;;  %2060 = vmax.xlane.f32.xlu1 %v2059_v8  ;;  %vm2703_vm8 = vcmp.gt.f32.partialorder %v2699_v36, 0.0  ;;  %v2701_v34 = vadd.f32 %v5958_v50, %v2689_v5  ;;  %v2062_v10 = vsel %vm754_vm3, %v5999_v14, -inf  ;;  %v2389_v31 = vsel %vm754_vm3, %v6004_v61, -inf }
 0x409   : > { %v6013_v39 = vsel %vm458_vm6, %v2054_v33, -1e+30  ;;  %v6017_v18 = vsel %vm457_vm5, %v2383_v30, -1e+30  ;;  %v2382_v40 = vsel %vm2374_vm7, %v2370_v38, %v2378_v59  ;;  %v2711_v8 = vsel %vm2703_vm8, %v2699_v36, %v2707_v60 }
 0x40a   : > { %v2380_v16 = vmul.f32 0.2, %v2372_v54  ;;  %vm2376_vm9 = vcmp.gt.f32.partialorder %v2372_v54, 0.0  ;;  %v2709_v13 = vmul.f32 0.2, %v2701_v34  ;;  %v2700_v9 = vadd.f32 %v5958_v50, %v5789_v57 }
 0x40b   : > { %v3029_v0 = vadd.f32 %v5991_v55, %v5804_v6  ;;  %vm2705_vm10 = vcmp.gt.f32.partialorder %v2701_v34, 0.0  ;;  %v6029_v38 = vsel %vm456_vm2, %v2382_v40, -1e+30  ;;  %v6033_v36 = vsel %vm455_vm4, %v2711_v8, -1e+30 }
 0x40c   : > { %1739 = vmax.xlane.f32.xlu0 %v1738_v1  ;;  %2066 = vmax.xlane.f32.xlu1 %v2065_v4  ;;  %v2068_v1 = vsel %vm754_vm3, %v6013_v39, -inf  ;;  %v2395_v4 = vsel %vm754_vm3, %v6017_v18, -inf  ;;  %v2384_v57 = vsel %vm2376_vm9, %v2372_v54, %v2380_v16  ;;  %v2702_v6 = vadd.f32 %v5958_v50, %v5793_v62 }
 0x40d   : > { %v2713_v5 = vsel %vm2705_vm10, %v2701_v34, %v2709_v13  ;;  %v2708_v33 = vmul.f32 0.2, %v2700_v9  ;;  %v3037_v59 = vmul.f32 0.2, %v3029_v0  ;;  %v3031_v60 = vadd.f32 %v5991_v55, %v5815_v20 }
 0x40e   : > { %vm2704_vm11 = vcmp.gt.f32.partialorder %v2700_v9, 0.0  ;;  %vm3033_vm12 = vcmp.gt.f32.partialorder %v3029_v0, 0.0  ;;  %v2392_v30 = vsel %vm754_vm3, %v6029_v38, -inf  ;;  %v6045_v54 = vsel %vm458_vm6, %v2384_v57, -1e+30 }
 0x40f   : > { %v6049_v62 = vsel %vm457_vm5, %v2713_v5, -1e+30  ;;  %v3030_v20 = vadd.f32 %v5991_v55, %v5787_v56  ;;  %v2712_v50 = vsel %vm2704_vm11, %v2700_v9, %v2708_v33  ;;  %v3041_v34 = vsel %vm3033_vm12, %v3029_v0, %v3037_v59 }
 0x410   : > { %2063 = vmax.xlane.f32.xlu0 %v2062_v10  ;;  %2390 = vmax.xlane.f32.xlu1 %v2389_v31  ;;  %v2719_v10 = vsel %vm754_vm3, %v6033_v36, -inf  ;;  %v2710_v31 = vmul.f32 0.2, %v2702_v6  ;;  %v3039_v40 = vmul.f32 0.2, %v3031_v60  ;;  %vm2706_vm13 = vcmp.gt.f32.partialorder %v2702_v6, 0.0 }
 0x411   : > { %vm3035_vm14 = vcmp.gt.f32.partialorder %v3031_v60, 0.0  ;;  %v2398_v8 = vsel %vm754_vm3, %v6045_v54, -inf  ;;  %v2725_v16 = vsel %vm754_vm3, %v6049_v62, -inf  ;;  %v6059_v13 = vsel %vm456_vm2, %v2712_v50, -1e+30 }
 0x412   : > { %v6063_v56 = vsel %vm455_vm4, %v3041_v34, -1e+30  ;;  %v2714_v9 = vsel %vm2706_vm13, %v2702_v6, %v2710_v31  ;;  %v3043_v0 = vsel %vm3035_vm14, %v3031_v60, %v3039_v40  ;;  %vm3034_vm15 = vcmp.gt.f32.partialorder %v3030_v20, 0.0 }
 0x413   : > { %v3049_v57 = vsel %vm754_vm3, %v6063_v56, -inf  ;;  %v6071_v5 = vsel %vm458_vm6, %v2714_v9, -1e+30  ;;  %v6075_v33 = vsel %vm457_vm5, %v3043_v0, -1e+30  ;;  %vm3353_vm1 = vcmask 1043456  }
 0x414   : > { %2069 = vmax.xlane.f32.xlu0 %v2068_v1  ;;  %2396 = vmax.xlane.f32.xlu1 %v2395_v4  ;;  %v3038_v1 = vmul.f32 0.2, %v3030_v20  ;;  %v2722_v4 = vsel %vm754_vm3, %v6059_v13, -inf  ;;  %v2728_v59 = vsel %vm754_vm3, %v6071_v5, -inf  ;;  %v3055_v60 = vsel %vm754_vm3, %v6075_v33, -inf }
 0x415   : > { %vm1164_vm7 = vcmask 64512  }
 0x416   : > { %v3042_v6 = vsel %vm3034_vm15, %v3030_v20, %v3038_v1  ;;  %v3032_v20 = vadd.f32 %v5991_v55, %v5849_v12 }
 0x418   : > { %2393 = vmax.xlane.f32.xlu0 %v2392_v30  ;;  %2720 = vmax.xlane.f32.xlu1 %v2719_v10  ;;  %v6083_v30 = vsel %vm456_vm2, %v3042_v6, -1e+30  ;;  %v3040_v50 = vmul.f32 0.2, %v3032_v20  ;;  %vm3036_vm0 = vcmp.gt.f32.partialorder %v3032_v20, 0.0 }
 0x419   : > { %v3052_v10 = vsel %vm754_vm3, %v6083_v30, -inf }
 0x41a   : > { %v3044_v34 = vsel %vm3036_vm0, %v3032_v20, %v3040_v50 }
 0x41b   : > { %v6099_v31 = vsel %vm458_vm6, %v3044_v34, -1e+30 }
 0x41c   : > { %2399 = vmax.xlane.f32.xlu0 %v2398_v8  ;;  %2726 = vmax.xlane.f32.xlu1 %v2725_v16  ;;  %v3058_v40 = vsel %vm754_vm3, %v6099_v31, -inf }
 0x420   : > { %2723 = vmax.xlane.f32.xlu0 %v2722_v4  ;;  %3050 = vmax.xlane.f32.xlu1 %v3049_v57 }
 0x424   : > { %2729 = vmax.xlane.f32.xlu0 %v2728_v59  ;;  %3056 = vmax.xlane.f32.xlu1 %v3055_v60 }
 0x428   : > { %3053 = vmax.xlane.f32.xlu0 %v3052_v10 }
 0x435   : > { %4727 = vrot.lane.b32.xlu1 %v5729_v26, %s5313_s20 }
 0x43e   : > { %4732 = vrot.lane.b32.xlu0 %v5721_v21, %s5325_s17 }
 0x442   : > { %4737 = vrot.lane.b32.xlu0 %v5729_v26, %s5325_s17 }
 0x446   : > { %4742 = vrot.lane.b32.xlu0 %v5721_v21, %s5326_s25 }
 0x465   : > { %3059 = vmax.xlane.f32.xlu0 %v3058_v40 }
 0x479   : > { %v760_v8 = vpop.xlane.xlu0 %759  ;;  %v757_v16 = vpop.xlane.xlu1 %756 }
 0x47a   : > { %v767_v9 = vsub.f32 %v5857_v51, %v757_v16  ;;  %v768_v51 = vsub.f32 %v5853_v7, %v760_v8 }
 0x47b   : > { %4747 = vrot.lane.b32.xlu0 %v5729_v26, %s5326_s25 }
 0x47c   : > { %v771_v0 = vmul.f32 1.442695, %v767_v9  ;;  %v773_v16 = vmul.f32 1.442695, %v768_v51 }
 0x47d   : > { %v763_v12 = vpop.xlane.xlu0 %762  ;;  %v977_v55 = vpop.xlane.xlu1 %976 }
 0x47e   : > { %v769_v1 = vsub.f32 %v5865_v19, %v763_v12  ;;  %v987_v4 = vsub.f32 %v5869_v23, %v977_v55  ;;  %4763 = vpow2.f32 %v771_v0 }
 0x480   : > { %v775_v57 = vmul.f32 1.442695, %v769_v1  ;;  %v991_v6 = vmul.f32 1.442695, %v987_v4 }
 0x481   : > { %v766_v59 = vpop.xlane.xlu0 %765  ;;  %v983_v60 = vpop.xlane.xlu1 %982 }
 0x482   : > { %4765 = vpow2.f32 %v775_v57  ;;  %v989_v10 = vsub.f32 %v5888_v58, %v983_v60  ;;  %v770_v19 = vsub.f32 %v5878_v41, %v766_v59 }
 0x483   : > { %4767 = vpow2.f32 %v991_v6 }
 0x484   : > { %v995_v20 = vmul.f32 1.442695, %v989_v10  ;;  %v777_v8 = vmul.f32 1.442695, %v770_v19 }
 0x485   : > { %v980_v50 = vpop.xlane.xlu0 %979  ;;  %v1401_v34 = vpop.xlane.xlu1 %1400 }
 0x486   : > { %v1411_v40 = vsub.f32 %v5898_v52, %v1401_v34  ;;  %4769 = vpow2.f32 %v995_v20  ;;  %v988_v52 = vsub.f32 %v5894_v35, %v980_v50 }
 0x487   : > { %4771 = vpow2.f32 %v773_v16 }
 0x488   : > { %v6112_v23 = vpop.eup %4763  ;;  %v1415_v9 = vmul.f32 1.442695, %v1411_v40 }
 0x489   : > { %v986_v0 = vpop.xlane.xlu0 %985  ;;  %v1407_v12 = vpop.xlane.xlu1 %1406  ;;  %v779_v7 = vsel %vm754_vm3, %v6112_v23, 0.0 }
 0x48a   : > { %v1413_v55 = vsub.f32 %v5917_v11, %v1407_v12  ;;  %780 = vadd.xlane.f32.xlu1 %v779_v7  ;;  %4773 = vpow2.f32 %v1415_v9  ;;  %v993_v11 = vmul.f32 1.442695, %v988_v52  ;;  %v990_v59 = vsub.f32 %v5913_v63, %v986_v0 }
 0x48b   : > { %4775 = vpow2.f32 %v777_v8 }
 0x48c   : > { %v6117_v58 = vpop.eup %4765  ;;  %v1419_v41 = vmul.f32 1.442695, %v1413_v55  ;;  %v997_v50 = vmul.f32 1.442695, %v990_v59 }
 0x48d   : > { %v1404_v1 = vpop.xlane.xlu0 %1403  ;;  %v1731_v4 = vpop.xlane.xlu1 %1730  ;;  %v785_v57 = vsel %vm754_vm3, %v6117_v58, 0.0 }
 0x48e   : > { %v6122_v6 = vpop.eup %4767  ;;  %786 = vadd.xlane.f32.xlu1 %v785_v57  ;;  %4777 = vpow2.f32 %v1419_v41  ;;  %v1412_v34 = vsub.f32 %v5931_v49, %v1404_v1  ;;  %v1741_v57 = vsub.f32 %v5935_v53, %v1731_v4 }
 0x48f   : > { %v999_v35 = vsel %vm754_vm3, %v6122_v6, 0.0  ;;  %4779 = vpow2.f32 %v993_v11 }
 0x490   : > { %v6128_v20 = vpop.eup %4769  ;;  %v1417_v12 = vmul.f32 1.442695, %v1412_v34  ;;  %v1745_v53 = vmul.f32 1.442695, %v1741_v57 }
 0x491   : > { %v1410_v60 = vpop.xlane.xlu0 %1409  ;;  %v1737_v10 = vpop.xlane.xlu1 %1736 }
 0x492   : > { %v1743_v51 = vsub.f32 %v5954_v17, %v1737_v10  ;;  %1000 = vadd.xlane.f32.xlu1 %v999_v35  ;;  %v6131_v9 = vpop.eup %4771  ;;  %v1005_v17 = vsel %vm754_vm3, %v6128_v20, 0.0  ;;  %v1414_v55 = vsub.f32 %v5948_v37, %v1410_v60 }
 0x493   : > { %v782_v52 = vsel %vm754_vm3, %v6131_v9, 0.0 }
 0x494   : > { %v1749_v40 = vmul.f32 1.442695, %v1743_v51  ;;  %v6136_v0 = vpop.eup %4773  ;;  %v1421_v37 = vmul.f32 1.442695, %v1414_v55 }
 0x495   : > { %v1734_v16 = vpop.xlane.xlu0 %1733  ;;  %v2061_v19 = vpop.xlane.xlu1 %2060 }
 0x496   : > { %v2071_v63 = vsub.f32 %v5970_v42, %v2061_v19  ;;  %4781 = vpow2.f32 %v1749_v40  ;;  %1006 = vadd.xlane.f32.xlu1 %v1005_v17  ;;  %v6141_v41 = vpop.eup %4775  ;;  %v1423_v42 = vsel %vm754_vm3, %v6136_v0, 0.0  ;;  %v1742_v4 = vsub.f32 %v5966_v2, %v1734_v16 }
 0x497   : > { %4783 = vpow2.f32 %v997_v50  ;;  %v788_v10 = vsel %vm754_vm3, %v6141_v41, 0.0 }
 0x498   : > { %v2075_v7 = vmul.f32 1.442695, %v2071_v63  ;;  %v6145_v1 = vpop.eup %4777  ;;  %v1747_v16 = vmul.f32 1.442695, %v1742_v4 }
 0x499   : > { %v1740_v49 = vpop.xlane.xlu0 %1739  ;;  %v2067_v8 = vpop.xlane.xlu1 %2066  ;;  %v1429_v50 = vsel %vm754_vm3, %v6145_v1, 0.0 }
 0x49a   : > { %783 = vadd.xlane.f32.xlu0 %v782_v52  ;;  %4785 = vpow2.f32 %v2075_v7  ;;  %1424 = vadd.xlane.f32.xlu1 %v1423_v42  ;;  %v2073_v11 = vsub.f32 %v5985_v25, %v2067_v8  ;;  %v6151_v51 = vpop.eup %4779  ;;  %v1744_v55 = vsub.f32 %v5981_v3, %v1740_v49 }
 0x49b   : > { %4787 = vpow2.f32 %v1417_v12  ;;  %v1002_v17 = vsel %vm754_vm3, %v6151_v51, 0.0 }
 0x49c   : > { %4789 = vpow2.f32 %v1421_v37  ;;  %v2079_v34 = vmul.f32 1.442695, %v2073_v11  ;;  %v1751_v37 = vmul.f32 1.442695, %v1744_v55 }
 0x49d   : > { %v2064_v59 = vpop.xlane.xlu0 %2063  ;;  %v2391_v60 = vpop.xlane.xlu1 %2390 }
 0x49e   : > { %v2072_v35 = vsub.f32 %v5999_v14, %v2064_v59  ;;  %789 = vadd.xlane.f32.xlu0 %v788_v10  ;;  %1430 = vadd.xlane.f32.xlu1 %v1429_v50 }
 0x4a0   : > { %v2077_v25 = vmul.f32 1.442695, %v2072_v35  ;;  %v6157_v40 = vpop.eup %4781  ;;  %v2401_v35 = vsub.f32 %v6004_v61, %v2391_v60 }
 0x4a1   : > { %v2070_v19 = vpop.xlane.xlu0 %2069  ;;  %v2397_v63 = vpop.xlane.xlu1 %2396  ;;  %v1759_v2 = vsel %vm754_vm3, %v6157_v40, 0.0 }
 0x4a2   : > { %v6161_v12 = vpop.eup %4783  ;;  %4791 = vpow2.f32 %v2077_v25  ;;  %v2403_v14 = vsub.f32 %v6017_v18, %v2397_v63  ;;  %1003 = vadd.xlane.f32.xlu0 %v1002_v17  ;;  %1760 = vadd.xlane.f32.xlu1 %v1759_v2  ;;  %v2074_v11 = vsub.f32 %v6013_v39, %v2070_v19  ;;  %v2405_v19 = vmul.f32 1.442695, %v2401_v35 }
 0x4a3   : > { %4793 = vpow2.f32 %v1745_v53  ;;  %v1008_v42 = vsel %vm754_vm3, %v6161_v12, 0.0 }
 0x4a4   : > { %4795 = vpow2.f32 %v2079_v34  ;;  %v2409_v7 = vmul.f32 1.442695, %v2403_v14  ;;  %v6167_v8 = vpop.eup %4785  ;;  %v2081_v50 = vmul.f32 1.442695, %v2074_v11 }
 0x4a5   : > { %v2394_v52 = vpop.xlane.xlu0 %2393  ;;  %v6171_v57 = vpop.eup %4787  ;;  %v2083_v18 = vsel %vm754_vm3, %v6167_v8, 0.0  ;;  %4797 = vpow2.f32 %v1747_v16 }
 0x4a6   : > { %1009 = vadd.xlane.f32.xlu0 %v1008_v42  ;;  %2084 = vadd.xlane.f32.xlu1 %v2083_v18  ;;  %4799 = vpow2.f32 %v2409_v7  ;;  %v1426_v49 = vsel %vm754_vm3, %v6171_v57, 0.0  ;;  %v6178_v59 = vpop.eup %4789  ;;  %v2402_v63 = vsub.f32 %v6029_v38, %v2394_v52  ;;  %v2721_v55 = vpop.xlane.xlu1 %2720 }
 0x4a7   : > { %4801 = vpow2.f32 %v1751_v37  ;;  %v1432_v39 = vsel %vm754_vm3, %v6178_v59, 0.0 }
 0x4a8   : > { %4803 = vpow2.f32 %v2081_v50  ;;  %v2407_v7 = vmul.f32 1.442695, %v2402_v63 }
 0x4a9   : > { %v2400_v3 = vpop.xlane.xlu0 %2399  ;;  %4805 = vpow2.f32 %v2405_v19 }
 0x4aa   : > { %1427 = vadd.xlane.f32.xlu0 %v1426_v49  ;;  %v2404_v38 = vsub.f32 %v6045_v54, %v2400_v3  ;;  %v2731_v49 = vsub.f32 %v6033_v36, %v2721_v55  ;;  %v2727_v3 = vpop.xlane.xlu1 %2726 }
 0x4ac   : > { %v6180_v10 = vpop.eup %4791  ;;  %v2411_v35 = vmul.f32 1.442695, %v2404_v38 }
 0x4ad   : > { %v6183_v53 = vpop.eup %4793  ;;  %v2724_v4 = vpop.xlane.xlu0 %2723  ;;  %v2086_v34 = vsel %vm754_vm3, %v6180_v10, 0.0 }
 0x4ae   : > { %v6189_v25 = vpop.eup %4795  ;;  %1433 = vadd.xlane.f32.xlu0 %v1432_v39  ;;  %2087 = vadd.xlane.f32.xlu1 %v2086_v34  ;;  %v1753_v60 = vsel %vm754_vm3, %v6183_v53, 0.0  ;;  %v2735_v34 = vmul.f32 1.442695, %v2731_v49  ;;  %v2732_v19 = vsub.f32 %v6059_v13, %v2724_v4  ;;  %v3051_v36 = vpop.xlane.xlu1 %3050 }
 0x4af   : > { %v6192_v17 = vpop.eup %4797  ;;  %v2089_v14 = vsel %vm754_vm3, %v6189_v25, 0.0  ;;  %v3061_v38 = vsub.f32 %v6063_v56, %v3051_v36 }
 0x4b0   : > { %v6198_v2 = vpop.eup %4799  ;;  %v1756_v18 = vsel %vm754_vm3, %v6192_v17, 0.0 }
 0x4b1   : > { %v2730_v61 = vpop.xlane.xlu0 %2729  ;;  %6710 = vst [vmem:[#allocation29_spill] sm:$0xff] %v6198_v2  ;;  %v2419_v37 = vsel %vm754_vm3, %v6198_v2, 0.0  ;;  %v6206_v11 = vpop.eup %4801 }
 0x4b2   : > { %v2734_v16 = vsub.f32 %v6071_v5, %v2730_v61  ;;  %1754 = vadd.xlane.f32.xlu0 %v1753_v60  ;;  %2090 = vadd.xlane.f32.xlu1 %v2089_v14  ;;  %v1762_v50 = vsel %vm754_vm3, %v6206_v11, 0.0  ;;  %v6212_v39 = vpop.eup %4803  ;;  %v2733_v60 = vsub.f32 %v6049_v62, %v2727_v3  ;;  %v2737_v14 = vmul.f32 1.442695, %v2732_v19 }
 0x4b3   : > { %v6217_v63 = vpop.eup %4805 }
 0x4b4   : > { %v2741_v52 = vmul.f32 1.442695, %v2734_v16  ;;  %v2413_v16 = vsel %vm754_vm3, %v6217_v63, 0.0 }
 0x4b5   : > { %v3054_v42 = vpop.xlane.xlu0 %3053 }
 0x4b6   : > { %4807 = vpow2.f32 %v2741_v52  ;;  %v3062_v5 = vsub.f32 %v6083_v30, %v3054_v42  ;;  %1757 = vadd.xlane.f32.xlu0 %v1756_v18  ;;  %2420 = vadd.xlane.f32.xlu1 %v2419_v37  ;;  %v2092_v30 = vsel %vm754_vm3, %v6212_v39, 0.0  ;;  %v3057_v52 = vpop.xlane.xlu1 %3056  ;;  %v3065_v37 = vmul.f32 1.442695, %v3061_v38 }
 0x4b7   : > { %4809 = vpow2.f32 %v2407_v7  ;;  %v2739_v7 = vmul.f32 1.442695, %v2733_v60 }
 0x4b8   : > { %v3067_v54 = vmul.f32 1.442695, %v3062_v5  ;;  %v3063_v5 = vsub.f32 %v6075_v33, %v3057_v52 }
 0x4ba   : > { %4811 = vpow2.f32 %v3067_v54  ;;  %1763 = vadd.xlane.f32.xlu0 %v1762_v50  ;;  %v3069_v56 = vmul.f32 1.442695, %v3063_v5 }
 0x4bb   : > { %4813 = vpow2.f32 %v2411_v35 }
 0x4bc   : > { %4815 = vpow2.f32 %v2735_v34 }
 0x4bd   : > { %4817 = vpow2.f32 %v2737_v14  ;;  %v6260_v14 = vpop.permute.xlu0 %4732 }
 0x4be   : > { %2093 = vadd.xlane.f32.xlu0 %v2092_v30  ;;  %4819 = vpow2.f32 %v2739_v7 }
 0x4bf   : > { %4821 = vpow2.f32 %v3065_v37  ;;  %v6272_v37 = vpop.permute.xlu1 %4727 }
 0x4c0   : > { %v6219_v61 = vpop.eup %4807  ;;  %4823 = vpow2.f32 %v3069_v56 }
 0x4c1   : > { %6711 = vst [vmem:[#allocation30_spill] sm:$0xff] %v6219_v61  ;;  %v2752_v55 = vsel %vm754_vm3, %v6219_v61, 0.0  ;;  %v6226_v13 = vpop.eup %4809 }
 0x4c2   : > { %2414 = vadd.xlane.f32.xlu0 %v2413_v16  ;;  %2753 = vadd.xlane.f32.xlu1 %v2752_v55  ;;  %v2416_v62 = vsel %vm754_vm3, %v6226_v13, 0.0  ;;  %v6262_v16 = vpop.permute.xlu0 %4737 }
 0x4c4   : > { %v6228_v4 = vpop.eup %4811 }
 0x4c5   : > { %6712 = vst [vmem:[#allocation31_spill] sm:$0xff] %v6228_v4  ;;  %v3076_v42 = vsel %vm754_vm3, %v6228_v4, 0.0  ;;  %v6235_v18 = vpop.eup %4813 }
 0x4c6   : > { %6713 = vst [vmem:[#allocation32_spill] sm:$0xff] %v6235_v18  ;;  %2417 = vadd.xlane.f32.xlu0 %v2416_v62  ;;  %3077 = vadd.xlane.f32.xlu1 %v3076_v42  ;;  %v2422_v49 = vsel %vm754_vm3, %v6235_v18, 0.0  ;;  %v6240_v35 = vpop.eup %4815  ;;  %v6264_v55 = vpop.permute.xlu0 %4742 }
 0x4c7   : > { %6714 = vst [vmem:[#allocation33_spill] sm:$0xff] %v6240_v35  ;;  %v2743_v54 = vsel %vm754_vm3, %v6240_v35, 0.0  ;;  %v6244_v3 = vpop.eup %4817 }
 0x4c8   : > { %6715 = vst [vmem:[#allocation34_spill] sm:$0xff] %v6244_v3  ;;  %v2746_v50 = vsel %vm754_vm3, %v6244_v3, 0.0  ;;  %v6248_v34 = vpop.eup %4819 }
 0x4c9   : > { %6716 = vst [vmem:[#allocation35_spill] sm:$0xff] %v6248_v34  ;;  %v2749_v33 = vsel %vm754_vm3, %v6248_v34, 0.0  ;;  %v6252_v19 = vpop.eup %4821 }
 0x4ca   : > { %2423 = vadd.xlane.f32.xlu0 %v2422_v49  ;;  %6717 = vst [vmem:[#allocation36_spill] sm:$0xff] %v6252_v19  ;;  %v3073_v30 = vsel %vm754_vm3, %v6252_v19, 0.0  ;;  %v6256_v36 = vpop.eup %4823  ;;  %v4684_v19 = vunpack.i.h.bf16 %v5769_v45 }
 0x4cb   : > { %6718 = vst [vmem:[#allocation37_spill] sm:$0xff] %v6256_v36  ;;  %v3079_v60 = vsel %vm754_vm3, %v6256_v36, 0.0 }
 0x4ce   : > { %2744 = vadd.xlane.f32.xlu0 %v2743_v54 }
 0x4d2   : > { %2747 = vadd.xlane.f32.xlu0 %v2746_v50 }
 0x4d6   : > { %2750 = vadd.xlane.f32.xlu0 %v2749_v33 }
 0x4da   : > { %3074 = vadd.xlane.f32.xlu0 %v3073_v30 }
 0x4de   : > { %3080 = vadd.xlane.f32.xlu0 %v3079_v60 }
 0x4f2   : > { %v3060_v7 = vpop.xlane.xlu0 %3059 }
 0x4f3   : > { %v3064_v38 = vsub.f32 %v6099_v31, %v3060_v7  ;;  %v6275_v31 = vld [vmem:[#allocation10] ss:$0 sm:$0xff] }
 0x4f4   : > { %4757 = vrot.lane.b32.xlu0 %v5729_v26, %s5327_s21  ;;  %6720 = vst [vmem:[#allocation39_spill] sm:$0xff] %v6275_v31 }
 0x4f5   : > { %v3071_v52 = vmul.f32 1.442695, %v3064_v38 }
 0x4f6   : > { %v6277_v54 = vpop.permute.xlu0 %4747 }
 0x4f7   : > { %4825 = vpow2.f32 %v3071_v52 }
 0x4f8   : > { %1043 = vrot.lane.b32.xlu0 %v6275_v31, %s5314_s19 }
 0x4fc   : > { %1467 = vrot.lane.b32.xlu0 %v6275_v31, %s5316_s16 }
 0x500   : > { %1797 = vrot.lane.b32.xlu0 %v6275_v31, %s5317_s18 }
 0x501   : > { %v6268_v62 = vpop.eup %4825 }
 0x502   : > { %6719 = vst [vmem:[#allocation38_spill] sm:$0xff] %v6268_v62  ;;  %v3082_v42 = vsel %vm754_vm3, %v6268_v62, 0.0 }
 0x503   : > { %3083 = vadd.xlane.f32.xlu1 %v3082_v42 }
 0x504   : > { %2127 = vrot.lane.b32.xlu0 %v6275_v31, %s5313_s20 }
 0x508   : > { %2787 = vrot.lane.b32.xlu0 %v6275_v31, %s5326_s25 }
 0x514   : > { %4752 = vrot.lane.b32.xlu1 %v5721_v21, %s5327_s21 }
 0x517   : > { %v781_v5 = vpop.xlane.xlu1 %780 }
 0x518   : > { %4827 = vrcp.f32 %v781_v5  ;;  %2457 = vrot.lane.b32.xlu1 %v6275_v31, %s5325_s17 }
 0x51b   : > { %v787_v49 = vpop.xlane.xlu1 %786 }
 0x51c   : > { %4829 = vrcp.f32 %v787_v49  ;;  %3117 = vrot.lane.b32.xlu1 %v6275_v31, %s5327_s21  ;;  %v4668_v31 = vunpack.i.l.bf16 %v5766_v44 }
 0x51f   : > { %v1001_v56 = vpop.xlane.xlu1 %1000 }
 0x520   : > { %4831 = vrcp.f32 %v1001_v56 }
 0x522   : > { %v4828_v26 = vpop.eup %4827 }
 0x523   : > { %v795_v50 = vmul.f32 %v4828_v26, %v781_v5  ;;  %v1007_v33 = vpop.xlane.xlu1 %1006 }
 0x525   : > { %v799_v21 = vsub.f32 2.0, %v795_v50 }
 0x526   : > { %v4830_v52 = vpop.eup %4829 }
 0x527   : > { %v784_v30 = vpop.xlane.xlu0 %783  ;;  %v803_v60 = vmul.f32 %v4828_v26, %v799_v21  ;;  %v1425_v7 = vpop.xlane.xlu1 %1424  ;;  %v797_v50 = vmul.f32 %v4830_v52, %v787_v49 }
 0x528   : > { %4833 = vrcp.f32 %v784_v30 }
 0x529   : > { %4835 = vrcp.f32 %v1007_v33  ;;  %v807_v38 = vmul.f32 %v6112_v23, %v803_v60  ;;  %v801_v23 = vsub.f32 2.0, %v797_v50  ;;  %v4683_v50 = vunpack.i.l.bf16 %v5769_v45 }
 0x52a   : > { %v4832_v24 = vpop.eup %4831 }
 0x52b   : > { %v790_v42 = vpop.xlane.xlu0 %789  ;;  %4218 = vmatprep.mubr.msk.f32.mxu0 %vm754_vm3, %v807_v38  ;;  %v1431_v5 = vpop.xlane.xlu1 %1430  ;;  %v1015_v21 = vmul.f32 %v4832_v24, %v1001_v56  ;;  %v805_v15 = vmul.f32 %v4830_v52, %v801_v23  ;;  %v4440_v2 = vpack.c.bf16 %v4684_v19, %v4683_v50 }
 0x52c   : > { %4837 = vrcp.f32 %v790_v42 }
 0x52d   : > { %4839 = vrcp.f32 %v1425_v7  ;;  %v1019_v62 = vsub.f32 2.0, %v1015_v21 }
 0x52f   : > { %v1004_v29 = vpop.xlane.xlu0 %1003  ;;  %v6292_v60 = vpop.xlane.xlu1 %1760  ;;  %v1023_v21 = vmul.f32 %v4832_v24, %v1019_v62  ;;  %v4689_v62 = vunpack.i.h.bf16 %v5775_v48 }
 0x530   : > { %4841 = vrcp.f32 %v1004_v29 }
 0x531   : > { %4843 = vrcp.f32 %v1431_v5 }
 0x532   : > { %v4834_v26 = vpop.eup %4833 }
 0x533   : > { %v4836_v28 = vpop.eup %4835  ;;  %v796_v27 = vmul.f32 %v4834_v26, %v784_v30  ;;  %v1010_v22 = vpop.xlane.xlu0 %1009  ;;  %v4669_v30 = vunpack.i.h.bf16 %v5766_v44 }
 0x534   : > { %4845 = vrcp.f32 %v1010_v22  ;;  %v1017_v36 = vmul.f32 %v4836_v28, %v1007_v33  ;;  %v6298_v3 = vpop.xlane.xlu1 %2084  ;;  %v809_v33 = vmul.f32 %v6117_v58, %v805_v15 }
 0x535   : > { %v800_v49 = vsub.f32 2.0, %v796_v27  ;;  %v4444_v24 = vpack.c.bf16 %v4669_v30, %v4668_v31 }
 0x536   : > { %v4838_v38 = vpop.eup %4837  ;;  %v1021_v35 = vsub.f32 2.0, %v1017_v36 }
 0x537   : > { %v4840_v4 = vpop.eup %4839  ;;  %v804_v56 = vmul.f32 %v4834_v26, %v800_v49  ;;  %v798_v61 = vmul.f32 %v4838_v38, %v790_v42  ;;  %v1428_v34 = vpop.xlane.xlu0 %1427 }
 0x538   : > { %4847 = vrcp.f32 %v1428_v34  ;;  %v1439_v18 = vmul.f32 %v4840_v4, %v1425_v7 }
 0x539   : > { %v808_v27 = vmul.f32 %v6131_v9, %v804_v56  ;;  %v802_v52 = vsub.f32 2.0, %v798_v61  ;;  %v1025_v61 = vmul.f32 %v4836_v28, %v1021_v35 }
 0x53a   : > { %v4842_v23 = vpop.eup %4841  ;;  %v1443_v36 = vsub.f32 2.0, %v1439_v18 }
 0x53b   : > { %v4844_v45 = vpop.eup %4843  ;;  %v806_v26 = vmul.f32 %v4838_v38, %v802_v52  ;;  %v1016_v42 = vmul.f32 %v4842_v23, %v1004_v29  ;;  %v1434_v49 = vpop.xlane.xlu0 %1433  ;;  %4219 = vmatmul.mubr.msk.f32.vlgmr.msra.gmra.mrb[4].mxu0 %vm754_vm3, %v808_v27  ;;  %v1027_v29 = vmul.f32 %v6122_v6, %v1023_v21  ;;  %v4693_v21 = vunpack.i.l.bf16 %v5773_v47 }
 0x53c   : > { %4849 = vrcp.f32 %v1434_v49  ;;  %4439 = vmatpush3.bf16.msra.mxu0 %v5743_v32  ;;  %v6306_v44 = vpop.xlane.xlu1 %2087  ;;  %4221 = vmatprep.mubr.msk.f32.mxu0 %vm754_vm3, %v809_v33  ;;  %v1441_v19 = vmul.f32 %v4844_v45, %v1431_v5  ;;  %v4688_v32 = vunpack.i.l.bf16 %v5775_v48  ;;  %v4673_v48 = vunpack.i.l.bf16 %v5771_v46 }
 0x53d   : > { %v810_v9 = vmul.f32 %v6141_v41, %v806_v26  ;;  %v1020_v15 = vsub.f32 2.0, %v1016_v42  ;;  %4851 = vrcp.f32 %v6292_v60  ;;  %4441 = vmatprep.subr.bf16.mxu0 %v4440_v2  ;;  %v4674_v41 = vunpack.i.h.bf16 %v5771_v46 }
 0x53e   : > { %v4846_v58 = vpop.eup %4845  ;;  %v1447_v35 = vmul.f32 %v4840_v4, %v1443_v36  ;;  %v1445_v31 = vsub.f32 2.0, %v1441_v19  ;;  %v4694_v33 = vunpack.i.h.bf16 %v5773_v47 }
 0x53f   : > { %v1024_v7 = vmul.f32 %v4842_v23, %v1020_v15  ;;  %v1018_v38 = vmul.f32 %v4846_v58, %v1010_v22  ;;  %v1755_v50 = vpop.xlane.xlu0 %1754  ;;  %4222 = vmatmul.mubr.msk.f32.gmra.mrb[6].mxu0 %vm754_vm3, %v810_v9  ;;  %v1029_v22 = vmul.f32 %v6128_v20, %v1025_v61  ;;  %v4452_v52 = vpack.c.bf16 %v4674_v41, %v4673_v48 }
 0x540   : > { %4853 = vrcp.f32 %v1755_v50  ;;  %4443 = vmatpush3.bf16.msra.mxu0 %v4440_v2  ;;  %4232 = vmatprep.mubr.msk.f32.mxu0 %vm754_vm3, %v1027_v29  ;;  %v6321_v5 = vpop.xlane.xlu1 %2090  ;;  %v1451_v4 = vmul.f32 %v6136_v0, %v1447_v35  ;;  %v4678_v29 = vunpack.i.l.bf16 %v5764_v43 }
 0x541   : > { %v1028_v6 = vmul.f32 %v6151_v51, %v1024_v7  ;;  %v1022_v28 = vsub.f32 2.0, %v1018_v38  ;;  %4855 = vrcp.f32 %v6298_v3  ;;  %4445 = vmatprep.subr.bf16.mxu0 %v4444_v24  ;;  %v4448_v51 = vpack.c.bf16 %v4689_v62, %v4688_v32 }
 0x542   : > { %v4848_v18 = vpop.eup %4847  ;;  %4857 = vrcp.f32 %v6306_v44 }
 0x543   : > { %v1026_v2 = vmul.f32 %v4846_v58, %v1022_v28  ;;  %v1440_v56 = vmul.f32 %v4848_v18, %v1428_v34  ;;  %v1758_v30 = vpop.xlane.xlu0 %1757  ;;  %4233 = vmatmul.mubr.msk.f32.vlgmr.msra.gmra.mrb[8].mxu0 %vm754_vm3, %v1028_v6  ;;  %v1449_v34 = vmul.f32 %v4844_v45, %v1445_v31  ;;  %v4679_v45 = vunpack.i.h.bf16 %v5764_v43 }
 0x544   : > { %4859 = vrcp.f32 %v1758_v30  ;;  %4447 = vmatpush3.bf16.msra.mxu0 %v4444_v24  ;;  %4235 = vmatprep.mubr.msk.f32.mxu0 %vm754_vm3, %v1029_v22  ;;  %v6337_v58 = vpop.xlane.xlu1 %2420 }
 0x545   : > { %v1030_v46 = vmul.f32 %v6161_v12, %v1026_v2  ;;  %v1444_v27 = vsub.f32 2.0, %v1440_v56  ;;  %4861 = vrcp.f32 %v6321_v5  ;;  %4449 = vmatprep.subr.bf16.mxu0 %v4448_v51  ;;  %v1453_v24 = vmul.f32 %v6145_v1, %v1449_v34 }
 0x546   : > { %v4850_v20 = vpop.eup %4849  ;;  %v4460_v28 = vpack.c.bf16 %v4679_v45, %v4678_v29 }
 0x547   : > { %v4852_v23 = vpop.eup %4851  ;;  %v1448_v26 = vmul.f32 %v4848_v18, %v1444_v27  ;;  %v1442_v42 = vmul.f32 %v4850_v20, %v1434_v49  ;;  %v1764_v9 = vpop.xlane.xlu0 %1763  ;;  %4236 = vmatmul.mubr.msk.f32.gmra.mrb[10].mxu0 %vm754_vm3, %v1030_v46  ;;  %v4730_v18 = vunpack.i.h.bf16 %v6272_v37 }
 0x548   : > { %4863 = vrcp.f32 %v1764_v9  ;;  %4451 = vmatpush3.bf16.msra.mxu0 %v4448_v51  ;;  %4262 = vmatprep.mubr.msk.f32.mxu0 %vm754_vm3, %v1451_v4  ;;  %v1771_v47 = vmul.f32 %v4852_v23, %v6292_v60 }
 0x549   : > { %v1452_v12 = vmul.f32 %v6171_v57, %v1448_v26  ;;  %v1446_v15 = vsub.f32 2.0, %v1442_v42  ;;  %4453 = vmatprep.subr.bf16.mxu0 %v4452_v52  ;;  %v4456_v57 = vpack.c.bf16 %v4694_v33, %v4693_v21  ;;  %v4735_v33 = vunpack.i.h.bf16 %v6260_v14 }
 0x54a   : > { %v4854_v0 = vpop.eup %4853  ;;  %v1775_v7 = vsub.f32 2.0, %v1771_v47  ;;  %v4740_v47 = vunpack.i.h.bf16 %v6262_v16 }
 0x54b   : > { %v4856_v49 = vpop.eup %4855  ;;  %v1450_v61 = vmul.f32 %v4850_v20, %v1446_v15  ;;  %v1769_v36 = vmul.f32 %v4854_v0, %v1755_v50  ;;  %v2094_v19 = vpop.xlane.xlu0 %2093  ;;  %4263 = vmatmul.mubr.msk.f32.vlgmr.msra.gmra.mrb[12].mxu0 %vm754_vm3, %v1452_v12 }
 0x54c   : > { %4865 = vrcp.f32 %v2094_v19  ;;  %4455 = vmatpush3.bf16.msra.mxu0 %v4452_v52  ;;  %4265 = vmatprep.mubr.msk.f32.mxu0 %vm754_vm3, %v1453_v24  ;;  %v4858_v62 = vpop.eup %4857  ;;  %v2099_v43 = vmul.f32 %v4856_v49, %v6298_v3  ;;  %v4729_v3 = vunpack.i.l.bf16 %v6272_v37  ;;  %v1779_v31 = vmul.f32 %v4852_v23, %v1775_v7 }
 0x54d   : > { %v1454_v1 = vmul.f32 %v6178_v59, %v1450_v61  ;;  %v1773_v32 = vsub.f32 2.0, %v1769_v36  ;;  %4867 = vrcp.f32 %v6337_v58  ;;  %4457 = vmatprep.subr.bf16.mxu0 %v4456_v57  ;;  %v2100_v59 = vmul.f32 %v4858_v62, %v6306_v44 }
 0x54e   : > { %v4860_v60 = vpop.eup %4859  ;;  %v2103_v2 = vsub.f32 2.0, %v2099_v43  ;;  %v4464_v4 = vpack.c.bf16 %v4730_v18, %v4729_v3  ;;  %v1783_v34 = vmul.f32 %v6157_v40, %v1779_v31 }
 0x54f   : > { %v4862_v38 = vpop.eup %4861  ;;  %v1777_v50 = vmul.f32 %v4854_v0, %v1773_v32  ;;  %v1770_v41 = vmul.f32 %v4860_v60, %v1758_v30  ;;  %v2415_v6 = vpop.xlane.xlu0 %2414  ;;  %4266 = vmatmul.mubr.msk.f32.gmra.mrb[14].mxu0 %vm754_vm3, %v1454_v1  ;;  %v2104_v27 = vsub.f32 2.0, %v2100_v59 }
 0x550   : > { %4869 = vrcp.f32 %v2415_v6  ;;  %4459 = vmatpush3.bf16.msra.mxu0 %v4456_v57  ;;  %v2101_v56 = vmul.f32 %v4862_v38, %v6321_v5  ;;  %v2107_v52 = vmul.f32 %v4856_v49, %v2103_v2  ;;  %v4734_v5 = vunpack.i.l.bf16 %v6260_v14  ;;  %v2754_v45 = vpop.xlane.xlu1 %2753 }
 0x551   : > { %v1781_v48 = vmul.f32 %v6183_v53, %v1777_v50  ;;  %v1774_v22 = vsub.f32 2.0, %v1770_v41  ;;  %4461 = vmatprep.subr.bf16.mxu0 %v4460_v28  ;;  %v4739_v49 = vunpack.i.l.bf16 %v6262_v16  ;;  %v4744_v57 = vunpack.i.l.bf16 %v6264_v55 }
 0x552   : > { %v4864_v35 = vpop.eup %4863  ;;  %v2105_v37 = vsub.f32 2.0, %v2101_v56  ;;  %v2111_v15 = vmul.f32 %v6167_v8, %v2107_v52  ;;  %v4468_v24 = vpack.c.bf16 %v4735_v33, %v4734_v5  ;;  %v4750_v41 = vunpack.i.h.bf16 %v6277_v54  ;;  %v6724_v5 = vld [vmem:[#allocation34_spill] sm:$0xff] }
 0x553   : > { %v1778_v30 = vmul.f32 %v4860_v60, %v1774_v22  ;;  %v1772_v51 = vmul.f32 %v4864_v35, %v1764_v9  ;;  %v2418_v46 = vpop.xlane.xlu0 %2417  ;;  %4284 = vmatprep.mubr.msk.f32.mxu0 %vm754_vm3, %v1781_v48  ;;  %v4472_v1 = vpack.c.bf16 %v4740_v47, %v4739_v49  ;;  %v6721_v22 = vld [vmem:[#allocation29_spill] sm:$0xff]  ;;  %v6727_v47 = vld [vmem:[#allocation36_spill] sm:$0xff] }
 0x554   : > { %4871 = vrcp.f32 %v2418_v46  ;;  %v2109_v0 = vmul.f32 %v4862_v38, %v2105_v37 }
 0x555   : > { %v1782_v44 = vmul.f32 %v6192_v17, %v1778_v30  ;;  %v1776_v20 = vsub.f32 2.0, %v1772_v51  ;;  %v2108_v17 = vmul.f32 %v4858_v62, %v2104_v27  ;;  %v6722_v30 = vld [vmem:[#allocation32_spill] sm:$0xff] }
 0x556   : > { %v4866_v53 = vpop.eup %4865  ;;  %v2113_v16 = vmul.f32 %v6189_v25, %v2109_v0 }
 0x557   : > { %v4868_v23 = vpop.eup %4867  ;;  %v1780_v21 = vmul.f32 %v4864_v35, %v1776_v20  ;;  %v2102_v26 = vmul.f32 %v4866_v53, %v2094_v19  ;;  %v2424_v42 = vpop.xlane.xlu0 %2423  ;;  %4285 = vmatmul.mubr.msk.f32.vlgmr.msra.gmra.mrb[16].mxu0 %vm754_vm3, %v1782_v44  ;;  %v4745_v19 = vunpack.i.h.bf16 %v6264_v55 }
 0x558   : > { %4873 = vrcp.f32 %v2424_v42  ;;  %4463 = vmatpush3.bf16.msra.mxu0 %v4460_v28  ;;  %4287 = vmatprep.mubr.msk.f32.mxu0 %vm754_vm3, %v1783_v34  ;;  %v2431_v14 = vmul.f32 %v4868_v23, %v6337_v58 }
 0x559   : > { %v1784_v9 = vmul.f32 %v6206_v11, %v1780_v21  ;;  %v2106_v40 = vsub.f32 2.0, %v2102_v26  ;;  %4465 = vmatprep.subr.bf16.mxu0 %v4464_v4  ;;  %v2112_v11 = vmul.f32 %v6180_v10, %v2108_v17  ;;  %v4476_v50 = vpack.c.bf16 %v4745_v19, %v4744_v57 }
 0x55a   : > { %v4870_v12 = vpop.eup %4869  ;;  %v2435_v62 = vsub.f32 2.0, %v2431_v14  ;;  %v6726_v14 = vld [vmem:[#allocation30_spill] sm:$0xff] }
 0x55b   : > { %v2429_v29 = vmul.f32 %v4870_v12, %v2415_v6  ;;  %v2745_v61 = vpop.xlane.xlu0 %2744  ;;  %4288 = vmatmul.mubr.msk.f32.gmra.mrb[18].mxu0 %vm754_vm3, %v1784_v9  ;;  %v2110_v8 = vmul.f32 %v4866_v53, %v2106_v40  ;;  %v4749_v6 = vunpack.i.l.bf16 %v6277_v54  ;;  %v6723_v53 = vld [vmem:[#allocation33_spill] sm:$0xff] }
 0x55c   : > { %4875 = vrcp.f32 %v2745_v61  ;;  %4467 = vmatpush3.bf16.msra.mxu0 %v4464_v4  ;;  %4306 = vmatprep.mubr.msk.f32.mxu0 %vm754_vm3, %v2111_v15  ;;  %v2439_v25 = vmul.f32 %v4868_v23, %v2435_v62 }
 0x55d   : > { %v2433_v36 = vsub.f32 2.0, %v2429_v29  ;;  %4877 = vrcp.f32 %v2754_v45  ;;  %4469 = vmatprep.subr.bf16.mxu0 %v4468_v24  ;;  %v2114_v10 = vmul.f32 %v6212_v39, %v2110_v8  ;;  %v4480_v31 = vpack.c.bf16 %v4750_v41, %v4749_v6  ;;  %v3078_v29 = vpop.xlane.xlu1 %3077 }
 0x55e   : > { %v4872_v58 = vpop.eup %4871  ;;  %v2443_v35 = vmul.f32 %v6721_v22, %v2439_v25 }
 0x55f   : > { %v2437_v32 = vmul.f32 %v4870_v12, %v2433_v36  ;;  %v2430_v60 = vmul.f32 %v4872_v58, %v2418_v46  ;;  %v2748_v7 = vpop.xlane.xlu0 %2747  ;;  %4307 = vmatmul.mubr.msk.f32.vlgmr.msra.gmra.mrb[20].mxu0 %vm754_vm3, %v2112_v11  ;;  %v6725_v12 = vld [vmem:[#allocation35_spill] sm:$0xff] }
 0x560   : > { %4879 = vrcp.f32 %v2748_v7  ;;  %4471 = vmatpush3.bf16.msra.mxu0 %v4468_v24  ;;  %4309 = vmatprep.mubr.msk.f32.mxu0 %vm754_vm3, %v2113_v16 }
 0x561   : > { %v2441_v43 = vmul.f32 %v6217_v63, %v2437_v32  ;;  %v2434_v38 = vsub.f32 2.0, %v2430_v60  ;;  %4473 = vmatprep.subr.bf16.mxu0 %v4472_v1 }
 0x562   : > { %v4874_v55 = vpop.eup %4873 }
 0x563   : > { %v2438_v28 = vmul.f32 %v4872_v58, %v2434_v38  ;;  %v2432_v18 = vmul.f32 %v4874_v55, %v2424_v42  ;;  %v2751_v59 = vpop.xlane.xlu0 %2750  ;;  %4310 = vmatmul.mubr.msk.f32.gmra.mrb[22].mxu0 %vm754_vm3, %v2114_v10 }
 0x564   : > { %4881 = vrcp.f32 %v2751_v59  ;;  %4475 = vmatpush3.bf16.msra.mxu0 %v4472_v1  ;;  %4328 = vmatprep.mubr.msk.f32.mxu0 %vm754_vm3, %v2441_v43 }
 0x565   : > { %v2442_v39 = vmul.f32 %v6226_v13, %v2438_v28  ;;  %v2436_v63 = vsub.f32 2.0, %v2432_v18  ;;  %4477 = vmatprep.subr.bf16.mxu0 %v4476_v50  ;;  %v6728_v28 = vld [vmem:[#allocation31_spill] sm:$0xff] }
 0x566   : > { %v4876_v48 = vpop.eup %4875 }
 0x567   : > { %v4878_v3 = vpop.eup %4877  ;;  %v2440_v2 = vmul.f32 %v4874_v55, %v2436_v63  ;;  %v2759_v54 = vmul.f32 %v4876_v48, %v2745_v61  ;;  %v3075_v56 = vpop.xlane.xlu0 %3074  ;;  %4329 = vmatmul.mubr.msk.f32.vlgmr.msra.gmra.mrb[24].mxu0 %vm754_vm3, %v2442_v39 }
 0x568   : > { %4883 = vrcp.f32 %v3075_v56  ;;  %4479 = vmatpush3.bf16.msra.mxu0 %v4476_v50  ;;  %4331 = vmatprep.mubr.msk.f32.mxu0 %vm754_vm3, %v2443_v35  ;;  %v2762_v27 = vmul.f32 %v4878_v3, %v2754_v45  ;;  %v1163_v35 = vld [vmem:[#allocation11 + $0x8] sm:$0xff] }
 0x569   : > { %v2444_v51 = vmul.f32 %v6722_v30, %v2440_v2  ;;  %v2763_v46 = vsub.f32 2.0, %v2759_v54  ;;  %4481 = vmatprep.subr.bf16.mxu0 %v4480_v31  ;;  %4885 = vrcp.f32 %v3078_v29  ;;  %4238 = vmatprep.subr.mxu1 %v1163_v35 }
 0x56a   : > { %v4880_v13 = vpop.eup %4879  ;;  %v2766_v37 = vsub.f32 2.0, %v2762_v27  ;;  %4239 = vmatpush3.msra.mxu1 %v1163_v35 }
 0x56b   : > { %v2767_v44 = vmul.f32 %v4876_v48, %v2763_v46  ;;  %v2760_v20 = vmul.f32 %v4880_v13, %v2748_v7  ;;  %4332 = vmatmul.mubr.msk.f32.gmra.mrb[26].mxu0 %vm754_vm3, %v2444_v51  ;;  %v3081_v61 = vpop.xlane.xlu0 %3080  ;;  %v6730_v48 = vld [vmem:[#allocation38_spill] sm:$0xff]  ;;  %v6731_v46 = vld [vmem:[#allocation39_spill] sm:$0xff] }
 0x56c   : > { %4483 = vmatpush3.bf16.msra.mxu0 %v4480_v31  ;;  %v2770_v17 = vmul.f32 %v4878_v3, %v2766_v37  ;;  %4887 = vrcp.f32 %v3081_v61  ;;  %v6399_v3 = vld [vmem:[#allocation11] sm:$0xff] }
 0x56d   : > { %v2771_v4 = vmul.f32 %v6723_v53, %v2767_v44  ;;  %v2764_v34 = vsub.f32 2.0, %v2760_v20  ;;  %4246 = vmatprep.subr.mxu1 %v6399_v3  ;;  %v3339_v31 = vld [vmem:[#allocation13] sm:$0xf] }
 0x56e   : > { %v4882_v52 = vpop.eup %4881  ;;  %v2774_v45 = vmul.f32 %v6726_v14, %v2770_v17 }
 0x56f   : > { %v2768_v23 = vmul.f32 %v4880_v13, %v2764_v34  ;;  %v2761_v33 = vmul.f32 %v4882_v52, %v2751_v59  ;;  %4350 = vmatprep.mubr.msk.f32.mxu0 %vm754_vm3, %v2771_v4  ;;  %v4758_v58 = vpop.permute.xlu0 %4757  ;;  %v6729_v59 = vld [vmem:[#allocation37_spill] sm:$0xff] }
 0x570   : > { %v4760_v62 = vunpack.i.h.bf16 %v4758_v58  ;;  %v4759_v1 = vunpack.i.l.bf16 %v4758_v58 }
 0x571   : > { %v2772_v21 = vmul.f32 %v6724_v5, %v2768_v23  ;;  %v2765_v26 = vsub.f32 2.0, %v2761_v33 }
 0x572   : > { %v4884_v42 = vpop.eup %4883  ;;  %v4488_v38 = vpack.c.bf16 %v4760_v62, %v4759_v1 }
 0x573   : > { %v2769_v9 = vmul.f32 %v4882_v52, %v2765_v26  ;;  %v3089_v40 = vmul.f32 %v4884_v42, %v3075_v56  ;;  %4351 = vmatmul.mubr.msk.f32.vlgmr.msra.gmra.mrb[28].mxu0 %vm754_vm3, %v2772_v21  ;;  %v4886_v11 = vpop.eup %4885  ;;  %v1044_v51 = vpop.permute.xlu0 %1043 }
 0x574   : > { %v3090_v19 = vmul.f32 %v4886_v11, %v3078_v29 }
 0x575   : > { %v2773_v15 = vmul.f32 %v6725_v12, %v2769_v9  ;;  %v3093_v0 = vsub.f32 2.0, %v3089_v40 }
 0x576   : > { %v4888_v36 = vpop.eup %4887  ;;  %v3094_v7 = vsub.f32 2.0, %v3090_v19 }
 0x577   : > { %v3097_v24 = vmul.f32 %v4884_v42, %v3093_v0  ;;  %4353 = vmatprep.mubr.msk.f32.mxu0 %vm754_vm3, %v2773_v15  ;;  %v3091_v57 = vmul.f32 %v4888_v36, %v3081_v61  ;;  %v1468_v40 = vpop.permute.xlu0 %1467 }
 0x578   : > { %4354 = vmatmul.mubr.msk.f32.gmra.mrb[30].mxu0 %vm754_vm3, %v2774_v45  ;;  %v3098_v50 = vmul.f32 %v4886_v11, %v3094_v7 }
 0x579   : > { %v3101_v49 = vmul.f32 %v6727_v47, %v3097_v24  ;;  %v3095_v43 = vsub.f32 2.0, %v3091_v57 }
 0x57a   : > { %v3102_v18 = vmul.f32 %v6728_v28, %v3098_v50 }
 0x57b   : > { %4372 = vmatprep.mubr.msk.f32.mxu0 %vm754_vm3, %v3101_v49  ;;  %v3099_v25 = vmul.f32 %v4888_v36, %v3095_v43 }
 0x57d   : > { %v3103_v39 = vmul.f32 %v6729_v59, %v3099_v25  ;;  %v1587_v25 = vld [vmem:[#allocation11 + $0x10] sm:$0xff] }
 0x590   : > { %v3084_v8 = vpop.xlane.xlu1 %3083 }
 0x591   : > { %4889 = vrcp.f32 %v3084_v8 }
 0x594   : > { %v4753_v16 = vpop.permute.xlu1 %4752 }
 0x595   : > { %v4755_v32 = vunpack.i.h.bf16 %v4753_v16  ;;  %v4754_v60 = vunpack.i.l.bf16 %v4753_v16 }
 0x597   : > { %v4484_v10 = vpack.c.bf16 %v4755_v32, %v4754_v60  ;;  %v1798_v32 = vpop.permute.xlu0 %1797 }
 0x599   : > { %4485 = vmatprep.subr.bf16.mxu0 %v4484_v10 }
 0x59a   : > { %4487 = vmatpush3.bf16.msra.mxu0 %v4484_v10 }
 0x59b   : > { %v4890_v55 = vpop.eup %4889  ;;  %4489 = vmatprep.subr.bf16.mxu0 %v4488_v38 }
 0x59c   : > { %v3092_v41 = vmul.f32 %v4890_v55, %v3084_v8 }
 0x59e   : > { %v3096_v6 = vsub.f32 2.0, %v3092_v41  ;;  %4491 = vmatpush3.bf16.msra.mxu0 %v4488_v38 }
 0x59f   : > { %4386 = vmatprep.subr.msk.mxu0 %vm3353_vm1, %v3339_v31 }
 0x5a0   : > { %v3100_v63 = vmul.f32 %v4890_v55, %v3096_v6 }
 0x5a1   : > { %4373 = vmatmul.mubr.msk.f32.vlgmr.msra.gmra.mrb[32].mxu0 %vm754_vm3, %v3102_v18 }
 0x5a2   : > { %v3104_v22 = vmul.f32 %v6730_v48, %v3100_v63  ;;  %4375 = vmatprep.mubr.msk.f32.mxu0 %vm754_vm3, %v3103_v39  ;;  %4387 = vmatpush3.msk.msra.mxu0 %vm3353_vm1, %v3339_v31 }
 0x5a5   : > { %4376 = vmatmul.mubr.msk.f32.gmra.mrb[34].mxu0 %vm754_vm3, %v3104_v22 }
 0x60e   : > { %v4220_v2 = vpop.f32.mrb[4].mxu0 }
 0x60f   : > { %v895_v54 = vpop.f32.mrb[5].mxu0  ;;  %v6406_v4 = vadd.f32 %v4220_v2, %v6731_v46 }
 0x610   : > { %v6403_v13 = vadd.f32 %v6731_v46, %v895_v54 }
 0x611   : > { %v920_v42 = vmul.f32 1.442695, %v6406_v4  ;;  %vm915_vm13 = vcmp.gt.f32.partialorder %v6406_v4, 0.0 }
 0x612   : > { %v4223_v56 = vpop.f32.mrb[6].mxu0  ;;  %v918_v52 = vmul.f32 1.442695, %v6403_v13  ;;  %vm914_vm12 = vcmp.gt.f32.partialorder %v6403_v13, 0.0 }
 0x613   : > { %v905_v30 = vpop.f32.mrb[7].mxu0  ;;  %v6416_v17 = vadd.f32 %v4223_v56, %v6731_v46 }
 0x614   : > { %v6410_v37 = vadd.f32 %v6731_v46, %v905_v30 }
 0x615   : > { %v924_v24 = vmul.f32 1.442695, %v6416_v17  ;;  %vm917_vm15 = vcmp.gt.f32.partialorder %v6416_v17, 0.0 }
 0x616   : > { %v4234_v27 = vpop.f32.mrb[8].mxu0  ;;  %v922_v12 = vmul.f32 1.442695, %v6410_v37  ;;  %vm916_vm14 = vcmp.gt.f32.partialorder %v6410_v37, 0.0 }
 0x617   : > { %v1130_v44 = vadd.f32 %v4234_v27, %v1044_v51  ;;  %v1124_v20 = vpop.f32.mrb[9].mxu0 }
 0x618   : > { %v1125_v53 = vadd.f32 %v1124_v20, %v1044_v51  ;;  %v2128_v20 = vpop.permute.xlu0 %2127 }
 0x619   : > { %v1149_v34 = vmul.f32 1.442695, %v1130_v44  ;;  %vm1144_vm9 = vcmp.gt.f32.partialorder %v1130_v44, 0.0 }
 0x61a   : > { %v1147_v23 = vmul.f32 1.442695, %v1125_v53  ;;  %v4237_v33 = vpop.f32.mrb[10].mxu0  ;;  %vm1143_vm8 = vcmp.gt.f32.partialorder %v1125_v53, 0.0 }
 0x61b   : > { %4891 = vpow2.f32 %v1149_v34  ;;  %v6412_v5 = vadd.f32 %v4237_v33, %v1044_v51  ;;  %v1134_v21 = vpop.f32.mrb[11].mxu0  ;;  %v1917_v33 = vld [vmem:[#allocation11 + $0x18] sm:$0xff] }
 0x61c   : > { %4893 = vpow2.f32 %v1147_v23  ;;  %v1135_v26 = vadd.f32 %v1134_v21, %v1044_v51 }
 0x61d   : > { %v1153_v9 = vmul.f32 1.442695, %v6412_v5  ;;  %4895 = vpow2.f32 %v918_v52  ;;  %vm1146_vm11 = vcmp.gt.f32.partialorder %v6412_v5, 0.0 }
 0x61e   : > { %v1151_v15 = vmul.f32 1.442695, %v1135_v26  ;;  %v4264_v0 = vpop.f32.mrb[12].mxu0  ;;  %vm1145_vm10 = vcmp.gt.f32.partialorder %v1135_v26, 0.0 }
 0x61f   : > { %4897 = vpow2.f32 %v1153_v9  ;;  %v1548_v14 = vpop.f32.mrb[13].mxu0  ;;  %v6423_v47 = vadd.f32 %v4264_v0, %v1468_v40 }
 0x620   : > { %4899 = vpow2.f32 %v1151_v15  ;;  %v6420_v45 = vadd.f32 %v1548_v14, %v1468_v40 }
 0x621   : > { %4901 = vpow2.f32 %v920_v42  ;;  %v1573_v36 = vmul.f32 1.442695, %v6423_v47  ;;  %vm1568_vm1 = vcmp.gt.f32.partialorder %v6423_v47, 0.0 }
 0x622   : > { %4903 = vpow2.f32 %v922_v12  ;;  %v1571_v49 = vmul.f32 1.442695, %v6420_v45  ;;  %v4267_v29 = vpop.f32.mrb[14].mxu0  ;;  %vm1567_vm0 = vcmp.gt.f32.partialorder %v6420_v45, 0.0 }
 0x623   : > { %v1558_v61 = vpop.f32.mrb[15].mxu0  ;;  %4905 = vpow2.f32 %v924_v24  ;;  %v6429_v58 = vadd.f32 %v4267_v29, %v1468_v40 }
 0x624   : > { %v6426_v11 = vadd.f32 %v1558_v61, %v1468_v40  ;;  %4907 = vpow2.f32 %v1571_v49 }
 0x625   : > { %v4892_v8 = vpop.eup %4891  ;;  %4909 = vpow2.f32 %v1573_v36  ;;  %v1577_v7 = vmul.f32 1.442695, %v6429_v58 }
 0x626   : > { %v4894_v19 = vpop.eup %4893  ;;  %v3943_v57 = vadd.f32 -1.0, %v4892_v8  ;;  %v1575_v16 = vmul.f32 1.442695, %v6426_v11 }
 0x627   : > { %v3942_v62 = vadd.f32 -1.0, %v4894_v19  ;;  %v4896_v1 = vpop.eup %4895  ;;  %v2458_v19 = vpop.permute.xlu1 %2457 }
 0x628   : > { %v1160_v38 = vsel %vm1144_vm9, %v1130_v44, %v3943_v57  ;;  %4911 = vpow2.f32 %v1575_v16  ;;  %v3934_v59 = vadd.f32 -1.0, %v4896_v1  ;;  %vm1570_vm9 = vcmp.gt.f32.partialorder %v6429_v58, 0.0 }
 0x629   : > { %v4898_v60 = vpop.eup %4897  ;;  %v1159_v10 = vsel %vm1143_vm8, %v1125_v53, %v3942_v62  ;;  %4913 = vpow2.f32 %v1577_v7  ;;  %vm1569_vm8 = vcmp.gt.f32.partialorder %v6426_v11, 0.0 }
 0x62a   : > { %v4900_v43 = vpop.eup %4899  ;;  %4240 = vmatprep.mubr.msk.f32.mxu1 %vm1164_vm7, %v1159_v10  ;;  %v4286_v55 = vpop.f32.mrb[16].mxu0  ;;  %v3945_v50 = vadd.f32 -1.0, %v4898_v60  ;;  %v930_v51 = vsel %vm914_vm12, %v6403_v13, %v3934_v59 }
 0x62b   : > { %v4902_v41 = vpop.eup %4901  ;;  %v6434_v6 = vadd.f32 %v4286_v55, %v1798_v32  ;;  %4241 = vmatmul.mubr.msk.f32.vlgmr.msra.gmra.mrb[4].mxu1 %vm1164_vm7, %v1160_v38  ;;  %v1878_v28 = vpop.f32.mrb[17].mxu0  ;;  %v3944_v18 = vadd.f32 -1.0, %v4900_v43 }
 0x62c   : > { %v4904_v39 = vpop.eup %4903  ;;  %v6437_v63 = vadd.f32 %v1878_v28, %v1798_v32  ;;  %4247 = vmatpush3.msra.mxu1 %v6399_v3  ;;  %v3935_v35 = vadd.f32 -1.0, %v4902_v41  ;;  %v1162_v54 = vsel %vm1146_vm11, %v6412_v5, %v3945_v50 }
 0x62d   : > { %v1903_v48 = vmul.f32 1.442695, %v6434_v6  ;;  %v1161_v22 = vsel %vm1145_vm10, %v1135_v26, %v3944_v18  ;;  %4268 = vmatprep.subr.mxu1 %v1587_v25  ;;  %v4906_v56 = vpop.eup %4905  ;;  %v3936_v46 = vadd.f32 -1.0, %v4904_v39  ;;  %vm1898_vm11 = vcmp.gt.f32.partialorder %v6434_v6, 0.0 }
 0x62e   : > { %v1901_v31 = vmul.f32 1.442695, %v6437_v63  ;;  %4243 = vmatprep.mubr.msk.f32.mxu1 %vm1164_vm7, %v1161_v22  ;;  %v4289_v2 = vpop.f32.mrb[18].mxu0  ;;  %v4908_v27 = vpop.eup %4907  ;;  %v931_v34 = vsel %vm915_vm13, %v6406_v4, %v3935_v35  ;;  %v3937_v23 = vadd.f32 -1.0, %v4906_v56  ;;  %vm1897_vm10 = vcmp.gt.f32.partialorder %v6437_v63, 0.0 }
 0x62f   : > { %v6446_v30 = vadd.f32 %v4289_v2, %v1798_v32  ;;  %4244 = vmatmul.mubr.msk.f32.gmra.mrb[6].mxu1 %vm1164_vm7, %v1162_v54  ;;  %v1888_v3 = vpop.f32.mrb[19].mxu0  ;;  %v4910_v5 = vpop.eup %4909  ;;  %v932_v42 = vsel %vm916_vm14, %v6410_v37, %v3936_v46  ;;  %v3958_v9 = vadd.f32 -1.0, %v4908_v27 }
 0x630   : > { %4915 = vpow2.f32 %v1901_v31  ;;  %v6450_v44 = vadd.f32 %v1888_v3, %v1798_v32  ;;  %4248 = vmatprep.mubr.msk.f32.mxu1 %vm1164_vm7, %v930_v51  ;;  %v3959_v15 = vadd.f32 -1.0, %v4910_v5  ;;  %v933_v14 = vsel %vm917_vm15, %v6416_v17, %v3937_v23  ;;  %v2247_v32 = vld [vmem:[#allocation11 + $0x20] sm:$0xff]  ;;  %v2788_v27 = vpop.permute.xlu0 %2787 }
 0x631   : > { %4917 = vpow2.f32 %v1903_v48  ;;  %v1907_v53 = vmul.f32 1.442695, %v6446_v30  ;;  %v1583_v61 = vsel %vm1567_vm0, %v6420_v45, %v3958_v9  ;;  %vm1900_vm13 = vcmp.gt.f32.partialorder %v6446_v30, 0.0 }
 0x632   : > { %v1905_v52 = vmul.f32 1.442695, %v6450_v44  ;;  %v4308_v13 = vpop.f32.mrb[20].mxu0  ;;  %v4912_v40 = vpop.eup %4911  ;;  %v1584_v16 = vsel %vm1568_vm1, %v6423_v47, %v3959_v15  ;;  %vm1899_vm12 = vcmp.gt.f32.partialorder %v6450_v44, 0.0 }
 0x633   : > { %v6458_v21 = vadd.f32 %v4308_v13, %v2128_v20  ;;  %4249 = vmatmul.mubr.msk.f32.vlgmr.msra.gmra.mrb[4].mxu1 %vm1164_vm7, %v931_v34  ;;  %v2208_v26 = vpop.f32.mrb[21].mxu0  ;;  %v4914_v24 = vpop.eup %4913  ;;  %v3960_v8 = vadd.f32 -1.0, %v4912_v40 }
 0x634   : > { %4919 = vpow2.f32 %v1905_v52  ;;  %v6462_v12 = vadd.f32 %v2208_v26, %v2128_v20  ;;  %4251 = vmatprep.mubr.msk.f32.mxu1 %vm1164_vm7, %v932_v42  ;;  %4269 = vmatpush3.msra.mxu1 %v1587_v25  ;;  %v3961_v1 = vadd.f32 -1.0, %v4914_v24 }
 0x635   : > { %4921 = vpow2.f32 %v1907_v53  ;;  %v2233_v4 = vmul.f32 1.442695, %v6458_v21  ;;  %4290 = vmatprep.subr.mxu1 %v1917_v33  ;;  %v1585_v43 = vsel %vm1569_vm8, %v6426_v11, %v3960_v8  ;;  %vm2228_vm15 = vcmp.gt.f32.partialorder %v6458_v21, 0.0 }
 0x636   : > { %v2231_v0 = vmul.f32 1.442695, %v6462_v12  ;;  %v4311_v37 = vpop.f32.mrb[22].mxu0  ;;  %v1586_v28 = vsel %vm1570_vm9, %v6429_v58, %v3961_v1  ;;  %vm2227_vm14 = vcmp.gt.f32.partialorder %v6462_v12, 0.0  ;;  %v3237_v1 = vld [vmem:[#allocation11 + $0x38] sm:$0xff] }
 0x637   : > { %v6470_v49 = vadd.f32 %v4311_v37, %v2128_v20  ;;  %4252 = vmatmul.mubr.msk.f32.gmra.mrb[6].mxu1 %vm1164_vm7, %v933_v14  ;;  %v2218_v29 = vpop.f32.mrb[23].mxu0 }
 0x638   : > { %4923 = vpow2.f32 %v2231_v0  ;;  %v6474_v36 = vadd.f32 %v2218_v29, %v2128_v20  ;;  %4270 = vmatprep.mubr.msk.f32.mxu1 %vm1164_vm7, %v1583_v61 }
 0x639   : > { %4925 = vpow2.f32 %v2233_v4  ;;  %v2237_v17 = vmul.f32 1.442695, %v6470_v49  ;;  %v2907_v4 = vld [vmem:[#allocation11 + $0x30] sm:$0xff]  ;;  %vm2230_vm1 = vcmp.gt.f32.partialorder %v6470_v49, 0.0 }
 0x63a   : > { %v4916_v57 = vpop.eup %4915  ;;  %v2235_v62 = vmul.f32 1.442695, %v6474_v36  ;;  %v4330_v45 = vpop.f32.mrb[24].mxu0  ;;  %vm2229_vm0 = vcmp.gt.f32.partialorder %v6474_v36, 0.0 }
 0x63b   : > { %v4918_v60 = vpop.eup %4917  ;;  %v6482_v7 = vadd.f32 %v4330_v45, %v2458_v19  ;;  %4271 = vmatmul.mubr.msk.f32.vlgmr.msra.gmra.mrb[4].mxu1 %vm1164_vm7, %v1584_v16  ;;  %v2538_v10 = vpop.f32.mrb[25].mxu0  ;;  %v3970_v38 = vadd.f32 -1.0, %v4916_v57 }
 0x63c   : > { %4927 = vpow2.f32 %v2235_v62  ;;  %v6486_v55 = vadd.f32 %v2538_v10, %v2458_v19  ;;  %4273 = vmatprep.mubr.msk.f32.mxu1 %vm1164_vm7, %v1585_v43  ;;  %4291 = vmatpush3.msra.mxu1 %v1917_v33  ;;  %v3971_v25 = vadd.f32 -1.0, %v4918_v60 }
 0x63d   : > { %4929 = vpow2.f32 %v2237_v17  ;;  %v2563_v47 = vmul.f32 1.442695, %v6482_v7  ;;  %4312 = vmatprep.subr.mxu1 %v2247_v32  ;;  %v1913_v48 = vsel %vm1897_vm10, %v6437_v63, %v3970_v38  ;;  %v2577_v63 = vld [vmem:[#allocation11 + $0x28] sm:$0xff]  ;;  %vm2558_vm9 = vcmp.gt.f32.partialorder %v6482_v7, 0.0 }
 0x63e   : > { %v4920_v50 = vpop.eup %4919  ;;  %v2561_v41 = vmul.f32 1.442695, %v6486_v55  ;;  %v4333_v11 = vpop.f32.mrb[26].mxu0  ;;  %v1914_v2 = vsel %vm1898_vm11, %v6434_v6, %v3971_v25  ;;  %vm2557_vm8 = vcmp.gt.f32.partialorder %v6486_v55, 0.0 }
 0x63f   : > { %v4922_v18 = vpop.eup %4921  ;;  %v6494_v59 = vadd.f32 %v4333_v11, %v2458_v19  ;;  %4274 = vmatmul.mubr.msk.f32.gmra.mrb[6].mxu1 %vm1164_vm7, %v1586_v28  ;;  %v2548_v39 = vpop.f32.mrb[27].mxu0  ;;  %v3972_v22 = vadd.f32 -1.0, %v4920_v50 }
 0x640   : > { %4931 = vpow2.f32 %v2561_v41  ;;  %v6498_v35 = vadd.f32 %v2548_v39, %v2458_v19  ;;  %4292 = vmatprep.mubr.msk.f32.mxu1 %vm1164_vm7, %v1913_v48  ;;  %v3973_v56 = vadd.f32 -1.0, %v4922_v18  ;;  %v3118_v18 = vpop.permute.xlu1 %3117 }
 0x641   : > { %4933 = vpow2.f32 %v2563_v47  ;;  %v2567_v31 = vmul.f32 1.442695, %v6494_v59  ;;  %v1915_v51 = vsel %vm1899_vm12, %v6450_v44, %v3972_v22  ;;  %vm2560_vm11 = vcmp.gt.f32.partialorder %v6494_v59, 0.0 }
 0x642   : > { %v4924_v58 = vpop.eup %4923  ;;  %v2565_v54 = vmul.f32 1.442695, %v6498_v35  ;;  %v1916_v34 = vsel %vm1900_vm13, %v6446_v30, %v3973_v56  ;;  %vm2559_vm10 = vcmp.gt.f32.partialorder %v6498_v35, 0.0 }
 0x643   : > { %v4926_v3 = vpop.eup %4925  ;;  %4293 = vmatmul.mubr.msk.f32.vlgmr.msra.gmra.mrb[4].mxu1 %vm1164_vm7, %v1914_v2  ;;  %v3982_v46 = vadd.f32 -1.0, %v4924_v58 }
 0x644   : > { %4935 = vpow2.f32 %v2565_v54  ;;  %4295 = vmatprep.mubr.msk.f32.mxu1 %vm1164_vm7, %v1915_v51  ;;  %4313 = vmatpush3.msra.mxu1 %v2247_v32  ;;  %v3983_v20 = vadd.f32 -1.0, %v4926_v3 }
 0x645   : > { %4937 = vpow2.f32 %v2567_v31  ;;  %4334 = vmatprep.subr.mxu1 %v2577_v63  ;;  %v2243_v23 = vsel %vm2227_vm14, %v6462_v12, %v3982_v46 }
 0x646   : > { %v4928_v6 = vpop.eup %4927  ;;  %v4352_v53 = vpop.f32.mrb[28].mxu0  ;;  %v2244_v9 = vsel %vm2228_vm15, %v6458_v21, %v3983_v20 }
 0x647   : > { %v4930_v52 = vpop.eup %4929  ;;  %v6512_v13 = vadd.f32 %v4352_v53, %v2788_v27  ;;  %4296 = vmatmul.mubr.msk.f32.gmra.mrb[6].mxu1 %vm1164_vm7, %v1916_v34  ;;  %v2868_v44 = vpop.f32.mrb[29].mxu0  ;;  %v3984_v33 = vadd.f32 -1.0, %v4928_v6 }
 0x648   : > { %v2869_v5 = vadd.f32 %v2868_v44, %v2788_v27  ;;  %4314 = vmatprep.mubr.msk.f32.mxu1 %vm1164_vm7, %v2243_v23  ;;  %v3985_v40 = vadd.f32 -1.0, %v4930_v52 }
 0x649   : > { %v2893_v26 = vmul.f32 1.442695, %v6512_v13  ;;  %v2245_v0 = vsel %vm2229_vm0, %v6474_v36, %v3984_v33  ;;  %vm2888_vm13 = vcmp.gt.f32.partialorder %v6512_v13, 0.0 }
 0x64a   : > { %v4932_v42 = vpop.eup %4931  ;;  %v2891_v30 = vmul.f32 1.442695, %v2869_v5  ;;  %v2246_v19 = vsel %vm2230_vm1, %v6470_v49, %v3985_v40  ;;  %vm2887_vm12 = vcmp.gt.f32.partialorder %v2869_v5, 0.0 }
 0x64b   : > { %v4934_v15 = vpop.eup %4933  ;;  %4939 = vpow2.f32 %v2893_v26  ;;  %4315 = vmatmul.mubr.msk.f32.vlgmr.msra.gmra.mrb[4].mxu1 %vm1164_vm7, %v2244_v9  ;;  %v4355_v12 = vpop.f32.mrb[30].mxu0  ;;  %v3994_v37 = vadd.f32 -1.0, %v4932_v42 }
 0x64c   : > { %4941 = vpow2.f32 %v2891_v30  ;;  %v2884_v14 = vadd.f32 %v4355_v12, %v2788_v27  ;;  %4317 = vmatprep.mubr.msk.f32.mxu1 %vm1164_vm7, %v2245_v0  ;;  %v2878_v24 = vpop.f32.mrb[31].mxu0  ;;  %4335 = vmatpush3.msra.mxu1 %v2577_v63  ;;  %v3995_v61 = vadd.f32 -1.0, %v4934_v15 }
 0x64d   : > { %v2879_v21 = vadd.f32 %v2878_v24, %v2788_v27  ;;  %4356 = vmatprep.subr.mxu1 %v2907_v4  ;;  %v2573_v57 = vsel %vm2557_vm8, %v6486_v55, %v3994_v37 }
 0x64e   : > { %v4936_v29 = vpop.eup %4935  ;;  %v2897_v8 = vmul.f32 1.442695, %v2884_v14  ;;  %v2574_v62 = vsel %vm2558_vm9, %v6482_v7, %v3995_v61  ;;  %vm2890_vm15 = vcmp.gt.f32.partialorder %v2884_v14, 0.0 }
 0x64f   : > { %v4938_v17 = vpop.eup %4937  ;;  %v2895_v36 = vmul.f32 1.442695, %v2879_v21  ;;  %4318 = vmatmul.mubr.msk.f32.gmra.mrb[6].mxu1 %vm1164_vm7, %v2246_v19  ;;  %v3996_v16 = vadd.f32 -1.0, %v4936_v29  ;;  %vm2889_vm14 = vcmp.gt.f32.partialorder %v2879_v21, 0.0  ;;  %v6732_v29 = vld [vmem:[#allocation24_spill] sm:$0xff] }
 0x650   : > { %4943 = vpow2.f32 %v2897_v8  ;;  %4336 = vmatprep.mubr.msk.f32.mxu1 %vm1164_vm7, %v2573_v57  ;;  %v3997_v45 = vadd.f32 -1.0, %v4938_v17  ;;  %v6733_v61 = vsub.s32 1, %v6732_v29 }
 0x651   : > { %4945 = vpow2.f32 %v2895_v36  ;;  %v2575_v49 = vsel %vm2559_vm10, %v6498_v35, %v3996_v16  ;;  %vm3340_vm10 = vcmask 31744  }
 0x652   : > { %v2576_v43 = vsel %vm2560_vm11, %v6494_v59, %v3997_v45 }
 0x653   : > { %4337 = vmatmul.mubr.msk.f32.vlgmr.msra.gmra.mrb[4].mxu1 %vm1164_vm7, %v2574_v62 }
 0x654   : > { %4339 = vmatprep.mubr.msk.f32.mxu1 %vm1164_vm7, %v2575_v49  ;;  %4357 = vmatpush3.msra.mxu1 %v2907_v4 }
 0x655   : > { %v4940_v32 = vpop.eup %4939  ;;  %4378 = vmatprep.subr.mxu1 %v3237_v1 }
 0x656   : > { %v4942_v60 = vpop.eup %4941  ;;  %v4007_v10 = vadd.f32 -1.0, %v4940_v32 }
 0x657   : > { %4340 = vmatmul.mubr.msk.f32.gmra.mrb[6].mxu1 %vm1164_vm7, %v2576_v43  ;;  %v4006_v7 = vadd.f32 -1.0, %v4942_v60 }
 0x658   : > { %v2904_v47 = vsel %vm2888_vm13, %v6512_v13, %v4007_v10 }
 0x659   : > { %v2903_v38 = vsel %vm2887_vm12, %v2869_v5, %v4006_v7 }
 0x65a   : > { %v4944_v55 = vpop.eup %4943  ;;  %4358 = vmatprep.mubr.msk.f32.mxu1 %vm1164_vm7, %v2903_v38 }
 0x65b   : > { %v4946_v50 = vpop.eup %4945  ;;  %4359 = vmatmul.mubr.msk.f32.vlgmr.msra.gmra.mrb[4].mxu1 %vm1164_vm7, %v2904_v47  ;;  %v4009_v25 = vadd.f32 -1.0, %v4944_v55 }
 0x65c   : > { %v4008_v41 = vadd.f32 -1.0, %v4946_v50  ;;  %4379 = vmatpush3.msra.mxu1 %v3237_v1 }
 0x65d   : > { %v2906_v28 = vsel %vm2890_vm15, %v2884_v14, %v4009_v25 }
 0x65e   : > { %v2905_v11 = vsel %vm2889_vm14, %v2879_v21, %v4008_v41 }
 0x65f   : > { %4361 = vmatprep.mubr.msk.f32.mxu1 %vm1164_vm7, %v2905_v11 }
 0x660   : > { %4362 = vmatmul.mubr.msk.f32.gmra.mrb[6].mxu1 %vm1164_vm7, %v2906_v28 }
 0x674   : > { %v4374_v59 = vpop.f32.mrb[32].mxu0 }
 0x675   : > { %v3204_v39 = vadd.f32 %v4374_v59, %v3118_v18  ;;  %v3198_v48 = vpop.f32.mrb[33].mxu0 }
 0x676   : > { %v3199_v22 = vadd.f32 %v3198_v48, %v3118_v18 }
 0x677   : > { %v3223_v35 = vmul.f32 1.442695, %v3204_v39  ;;  %vm3218_vm1 = vcmp.gt.f32.partialorder %v3204_v39, 0.0 }
 0x678   : > { %v3221_v31 = vmul.f32 1.442695, %v3199_v22  ;;  %v4377_v58 = vpop.f32.mrb[34].mxu0  ;;  %vm3217_vm0 = vcmp.gt.f32.partialorder %v3199_v22, 0.0 }
 0x679   : > { %4947 = vpow2.f32 %v3223_v35  ;;  %v3214_v2 = vadd.f32 %v4377_v58, %v3118_v18  ;;  %v3208_v54 = vpop.f32.mrb[35].mxu0 }
 0x67a   : > { %4949 = vpow2.f32 %v3221_v31  ;;  %v3209_v56 = vadd.f32 %v3208_v54, %v3118_v18 }
 0x67b   : > { %v3227_v63 = vmul.f32 1.442695, %v3214_v2  ;;  %vm3220_vm9 = vcmp.gt.f32.partialorder %v3214_v2, 0.0 }
 0x67c   : > { %v3225_v3 = vmul.f32 1.442695, %v3209_v56  ;;  %vm3219_vm8 = vcmp.gt.f32.partialorder %v3209_v56, 0.0 }
 0x67d   : > { %4951 = vpow2.f32 %v3227_v63 }
 0x67e   : > { %4953 = vpow2.f32 %v3225_v3 }
 0x683   : > { %v4948_v51 = vpop.eup %4947 }
 0x684   : > { %v4950_v46 = vpop.eup %4949  ;;  %v4019_v27 = vadd.f32 -1.0, %v4948_v51 }
 0x685   : > { %v4018_v6 = vadd.f32 -1.0, %v4950_v46 }
 0x686   : > { %v3234_v52 = vsel %vm3218_vm1, %v3204_v39, %v4019_v27 }
 0x687   : > { %v4952_v20 = vpop.eup %4951  ;;  %v3233_v53 = vsel %vm3217_vm0, %v3199_v22, %v4018_v6 }
 0x688   : > { %v4954_v34 = vpop.eup %4953  ;;  %4380 = vmatprep.mubr.msk.f32.mxu1 %vm1164_vm7, %v3233_v53  ;;  %v4021_v13 = vadd.f32 -1.0, %v4952_v20 }
 0x689   : > { %4381 = vmatmul.mubr.msk.f32.vlgmr.msra.gmra.mrb[4].mxu1 %vm1164_vm7, %v3234_v52  ;;  %v4020_v44 = vadd.f32 -1.0, %v4954_v34 }
 0x68a   : > { %v3236_v33 = vsel %vm3220_vm9, %v3214_v2, %v4021_v13 }
 0x68b   : > { %v3235_v23 = vsel %vm3219_vm8, %v3209_v56, %v4020_v44 }
 0x68c   : > { %4383 = vmatprep.mubr.msk.f32.mxu1 %vm1164_vm7, %v3235_v23 }
 0x68d   : > { %4384 = vmatmul.mubr.msk.f32.gmra.mrb[6].mxu1 %vm1164_vm7, %v3236_v33 }
 0x75c   : > { %v4382_v5 = vpop.f32.mrb[4].mxu1 }
 0x75d   : > { %v3316_v26 = vpop.f32.mrb[5].mxu1 }
 0x75e   : > { %v4492_v42 = vpack.c.bf16 %v4382_v5, %v3316_v26  ;;  %4388 = vmatprep.mubr.msk.f32.mxu0 %vm3340_vm10, %v3316_v26 }
 0x75f   : > { %4389 = vmatmul.mubr.msk.f32.vlgmr.msra.gmra.mrb[36].mxu0 %vm3340_vm10, %v4382_v5 }
 0x760   : > { %v4385_v9 = vpop.f32.mrb[6].mxu1  ;;  %4493 = vmatprep.subr.bf16.mxu0 %v4492_v42 }
 0x761   : > { %v3326_v30 = vpop.f32.mrb[7].mxu1  ;;  %4495 = vmatpush3.bf16.msra.mxu0 %v4492_v42 }
 0x762   : > { %v4496_v40 = vpack.c.bf16 %v4385_v9, %v3326_v30  ;;  %4391 = vmatprep.mubr.msk.f32.mxu0 %vm3340_vm10, %v3326_v30 }
 0x763   : > { %4392 = vmatmul.mubr.msk.f32.gmra.mrb[38].mxu0 %vm3340_vm10, %v4385_v9 }
 0x764   : > { %4497 = vmatprep.subr.bf16.mxu0 %v4496_v40 }
 0x765   : > { %4499 = vmatpush3.bf16.msra.mxu0 %v4496_v40 }
 0x832   : > { %v4390_v4 = vpop.f32.mrb[36].mxu0 }
 0x833   : > { %3481 = vperm.xlu1 %4762, %v4390_v4   ;;  %v3423_v15 = vpop.f32.mrb[37].mxu0 }
 0x834   : > { %3476 = vperm.xlu0 %4761, %v3423_v15  }
 0x836   : > { %v4393_v12 = vpop.f32.mrb[38].mxu0 }
 0x837   : > { %v3433_v0 = vpop.f32.mrb[39].mxu0 }
 0x838   : > { %3491 = vperm.xlu0 %4761, %v4393_v12   ;;  %3486 = vperm.xlu1 %4762, %v3433_v0  }
 0x861   : > { %3442 = vxpose.xlu1.b32.start [1/4] (short) (narrow) %v3423_v15, 8 }
 0x865   : > { %3443 = vxpose.xlu1.b32.cont [2/4] (short) (narrow) %v4390_v4, 8 }
 0x869   : > { %3444 = vxpose.xlu1.b32.cont [3/4] (short) (narrow) %v3433_v0, 8 }
 0x86d   : > { %3445 = vxpose.xlu1.b32.end [4/4] (short) (narrow) %v4393_v12, 8 }
 0x8b2   : > { %v3482_v37 = vpop.permute.xlu1 %3481 }
 0x8b3   : > { %v3477_v24 = vpop.permute.xlu0 %3476 }
 0x8b7   : > { %v3487_v14 = vpop.permute.xlu1 %3486  ;;  %v3492_v62 = vpop.permute.xlu0 %3491 }
 0x8e1   : > { %v3458_v21 = vpop.trf.xlu1 }
 0x8e2   : > { %v3497_v8 = vrot.slane %v3458_v21, %v6733_v61 }
 0x8e4   : > { %v3499_v19 = vadd.f32 %v3497_v8, %v3482_v37  ;;  %v3498_v17 = vadd.f32 %v3497_v8, %v3477_v24  ;;  %v3500_v36 = vadd.f32 %v3497_v8, %v3487_v14  ;;  %v3501_v32 = vadd.f32 %v3497_v8, %v3492_v62  ;;  %v4031_v62 = vld [vmem:[#allocation14] ss:$0 sm:$0xff] }
 0x8e6   : > { %vm3503_vm7 = vcmp.gt.f32.partialorder %v3499_v19, 0.0  ;;  %v3507_v57 = vmul.f32 0.2, %v3499_v19  ;;  %vm3502_vm11 = vcmp.gt.f32.partialorder %v3498_v17, 0.0  ;;  %v3506_v16 = vmul.f32 0.2, %v3498_v17 }
 0x8e7   : > { %v3508_v49 = vmul.f32 0.2, %v3500_v36  ;;  %vm3504_vm12 = vcmp.gt.f32.partialorder %v3500_v36, 0.0  ;;  %v3509_v47 = vmul.f32 0.2, %v3501_v32  ;;  %vm3505_vm13 = vcmp.gt.f32.partialorder %v3501_v32, 0.0 }
 0x8e8   : > { %v3511_v45 = vsel %vm3503_vm7, %v3499_v19, %v3507_v57  ;;  %v3510_v1 = vsel %vm3502_vm11, %v3498_v17, %v3506_v16 }
 0x8e9   : > { %v3515_v10 = vsel %vm456_vm2, %v3511_v45, -1e+30  ;;  %v3514_v38 = vsel %vm455_vm4, %v3510_v1, -1e+30  ;;  %v3512_v55 = vsel %vm3504_vm12, %v3500_v36, %v3508_v49  ;;  %v3513_v11 = vsel %vm3505_vm13, %v3501_v32, %v3509_v47 }
 0x8ea   : > { %v3521_v43 = vsel %vm754_vm3, %v3515_v10, -inf  ;;  %v3518_v50 = vsel %vm754_vm3, %v3514_v38, -inf  ;;  %v3516_v41 = vsel %vm457_vm5, %v3512_v55, -1e+30  ;;  %v3517_v59 = vsel %vm458_vm6, %v3513_v11, -1e+30 }
 0x8eb   : > { %3522 = vmax.xlane.f32.xlu0 %v3521_v43  ;;  %v3524_v28 = vsel %vm754_vm3, %v3516_v41, -inf  ;;  %v3527_v39 = vsel %vm754_vm3, %v3517_v59, -inf }
 0x8ef   : > { %3519 = vmax.xlane.f32.xlu0 %v3518_v50 }
 0x8f3   : > { %3525 = vmax.xlane.f32.xlu0 %v3524_v28 }
 0x8f7   : > { %3528 = vmax.xlane.f32.xlu0 %v3527_v39 }
 0x978   : > { %v3523_v48 = vpop.xlane.xlu0 %3522 }
 0x979   : > { %v3531_v22 = vsub.f32 %v3515_v10, %v3523_v48 }
 0x97b   : > { %v3536_v58 = vmul.f32 1.442695, %v3531_v22 }
 0x97c   : > { %v3520_v35 = vpop.xlane.xlu0 %3519 }
 0x97d   : > { %v3530_v31 = vsub.f32 %v3514_v38, %v3520_v35 }
 0x97f   : > { %v3534_v2 = vmul.f32 1.442695, %v3530_v31 }
 0x980   : > { %v3526_v54 = vpop.xlane.xlu0 %3525 }
 0x981   : > { %4955 = vpow2.f32 %v3534_v2  ;;  %v3532_v56 = vsub.f32 %v3516_v41, %v3526_v54 }
 0x982   : > { %4957 = vpow2.f32 %v3536_v58 }
 0x983   : > { %v3538_v63 = vmul.f32 1.442695, %v3532_v56 }
 0x984   : > { %v3529_v3 = vpop.xlane.xlu0 %3528 }
 0x985   : > { %4959 = vpow2.f32 %v3538_v63  ;;  %v3533_v51 = vsub.f32 %v3517_v59, %v3529_v3 }
 0x987   : > { %v3540_v46 = vmul.f32 1.442695, %v3533_v51 }
 0x989   : > { %4961 = vpow2.f32 %v3540_v46 }
 0x98b   : > { %v4956_v27 = vpop.eup %4955 }
 0x98c   : > { %v3542_v6 = vsel %vm754_vm3, %v4956_v27, 0.0  ;;  %v4958_v20 = vpop.eup %4957 }
 0x98d   : > { %3543 = vadd.xlane.f32.xlu0 %v3542_v6  ;;  %v3545_v34 = vsel %vm754_vm3, %v4958_v20, 0.0 }
 0x98f   : > { %v4960_v53 = vpop.eup %4959 }
 0x990   : > { %v3548_v52 = vsel %vm754_vm3, %v4960_v53, 0.0 }
 0x991   : > { %3546 = vadd.xlane.f32.xlu0 %v3545_v34  ;;  %3549 = vadd.xlane.f32.xlu1 %v3548_v52 }
 0x993   : > { %v4962_v13 = vpop.eup %4961 }
 0x994   : > { %v3551_v44 = vsel %vm754_vm3, %v4962_v13, 0.0 }
 0x995   : > { %3552 = vadd.xlane.f32.xlu0 %v3551_v44 }
 0xa1a   : > { %v3544_v23 = vpop.xlane.xlu0 %3543 }
 0xa1b   : > { %4963 = vrcp.f32 %v3544_v23 }
 0xa1e   : > { %v3550_v33 = vpop.xlane.xlu1 %3549  ;;  %v3547_v5 = vpop.xlane.xlu0 %3546 }
 0xa1f   : > { %4965 = vrcp.f32 %v3550_v33 }
 0xa20   : > { %4967 = vrcp.f32 %v3547_v5 }
 0xa22   : > { %v3553_v26 = vpop.xlane.xlu0 %3552 }
 0xa23   : > { %4969 = vrcp.f32 %v3553_v26 }
 0xa25   : > { %v4964_v42 = vpop.eup %4963 }
 0xa26   : > { %v3558_v9 = vmul.f32 %v4964_v42, %v3544_v23 }
 0xa28   : > { %v3562_v30 = vsub.f32 2.0, %v3558_v9 }
 0xa29   : > { %v4966_v40 = vpop.eup %4965 }
 0xa2a   : > { %v4968_v4 = vpop.eup %4967  ;;  %v3566_v15 = vmul.f32 %v4964_v42, %v3562_v30  ;;  %v3560_v12 = vmul.f32 %v4966_v40, %v3550_v33 }
 0xa2b   : > { %v3559_v0 = vmul.f32 %v4968_v4, %v3547_v5 }
 0xa2c   : > { %v3570_v37 = vmul.f32 %v4956_v27, %v3566_v15  ;;  %v3564_v14 = vsub.f32 2.0, %v3560_v12 }
 0xa2d   : > { %v4970_v24 = vpop.eup %4969  ;;  %v3563_v21 = vsub.f32 2.0, %v3559_v0 }
 0xa2e   : > { %v3568_v29 = vmul.f32 %v4966_v40, %v3564_v14  ;;  %v3561_v61 = vmul.f32 %v4970_v24, %v3553_v26  ;;  %4402 = vmatprep.mubr.msk.f32.mxu0 %vm754_vm3, %v3570_v37 }
 0xa2f   : > { %v3567_v8 = vmul.f32 %v4968_v4, %v3563_v21 }
 0xa30   : > { %v3572_v19 = vmul.f32 %v4960_v53, %v3568_v29  ;;  %v3565_v17 = vsub.f32 2.0, %v3561_v61 }
 0xa31   : > { %v3571_v36 = vmul.f32 %v4958_v20, %v3567_v8 }
 0xa32   : > { %v3569_v57 = vmul.f32 %v4970_v24, %v3565_v17 }
 0xa33   : > { %4403 = vmatmul.mubr.msk.f32.vlgmr.msra.gmra.mrb[40].mxu0 %vm754_vm3, %v3571_v36 }
 0xa34   : > { %v3573_v16 = vmul.f32 %v4962_v13, %v3569_v57  ;;  %4405 = vmatprep.mubr.msk.f32.mxu0 %vm754_vm3, %v3572_v19 }
 0xa37   : > { %4406 = vmatmul.mubr.msk.f32.gmra.mrb[42].mxu0 %vm754_vm3, %v3573_v16 }
 0xb06   : > { %v4404_v45 = vpop.f32.mrb[40].mxu0 }
 0xb07   : > { %v3665_v1 = vadd.f32 %v4404_v45, %v4031_v62  ;;  %v3659_v49 = vpop.f32.mrb[41].mxu0 }
 0xb08   : > { %v3660_v32 = vadd.f32 %v4031_v62, %v3659_v49 }
 0xb09   : > { %v3681_v60 = vsel %vm3340_vm10, %v3665_v1, -inf }
 0xb0a   : > { %3682 = vmax.xlane.f32.xlu0 %v3681_v60  ;;  %v4407_v10 = vpop.f32.mrb[42].mxu0  ;;  %v3678_v38 = vsel %vm3340_vm10, %v3660_v32, -inf }
 0xb0b   : > { %v3669_v43 = vpop.f32.mrb[43].mxu0  ;;  %v3675_v55 = vadd.f32 %v4407_v10, %v4031_v62 }
 0xb0c   : > { %v3670_v7 = vadd.f32 %v4031_v62, %v3669_v43 }
 0xb0d   : > { %v3687_v50 = vsel %vm3340_vm10, %v3675_v55, -inf }
 0xb0e   : > { %3679 = vmax.xlane.f32.xlu0 %v3678_v38  ;;  %v3684_v47 = vsel %vm3340_vm10, %v3670_v7, -inf }
 0xb12   : > { %3685 = vmax.xlane.f32.xlu0 %v3684_v47 }
 0xb16   : > { %3688 = vmax.xlane.f32.xlu0 %v3687_v50 }
 0xb97   : > { %v3683_v25 = vpop.xlane.xlu0 %3682 }
 0xb98   : > { %v3691_v41 = vsub.f32 %v3665_v1, %v3683_v25 }
 0xb9a   : > { %v3696_v11 = vmul.f32 1.442695, %v3691_v41 }
 0xb9b   : > { %v3680_v28 = vpop.xlane.xlu0 %3679 }
 0xb9c   : > { %4971 = vpow2.f32 %v3696_v11  ;;  %v3690_v18 = vsub.f32 %v3660_v32, %v3680_v28 }
 0xb9e   : > { %v3694_v59 = vmul.f32 1.442695, %v3690_v18 }
 0xb9f   : > { %v3686_v39 = vpop.xlane.xlu0 %3685 }
 0xba0   : > { %4973 = vpow2.f32 %v3694_v59  ;;  %v3692_v48 = vsub.f32 %v3670_v7, %v3686_v39 }
 0xba2   : > { %v3698_v22 = vmul.f32 1.442695, %v3692_v48 }
 0xba3   : > { %v3689_v35 = vpop.xlane.xlu0 %3688 }
 0xba4   : > { %4975 = vpow2.f32 %v3698_v22  ;;  %v3693_v31 = vsub.f32 %v3675_v55, %v3689_v35 }
 0xba6   : > { %v4972_v58 = vpop.eup %4971  ;;  %v3700_v2 = vmul.f32 1.442695, %v3693_v31 }
 0xba7   : > { %v3705_v54 = vsel %vm3340_vm10, %v4972_v58, 0.0 }
 0xba8   : > { %4977 = vpow2.f32 %v3700_v2  ;;  %3706 = vadd.xlane.f32.xlu0 %v3705_v54 }
 0xbaa   : > { %v4974_v56 = vpop.eup %4973 }
 0xbab   : > { %v3702_v63 = vsel %vm3340_vm10, %v4974_v56, 0.0 }
 0xbac   : > { %3703 = vadd.xlane.f32.xlu0 %v3702_v63 }
 0xbae   : > { %v4976_v3 = vpop.eup %4975 }
 0xbaf   : > { %v3708_v51 = vsel %vm3340_vm10, %v4976_v3, 0.0 }
 0xbb0   : > { %3709 = vadd.xlane.f32.xlu0 %v3708_v51 }
 0xbb2   : > { %v4978_v46 = vpop.eup %4977 }
 0xbb3   : > { %v3711_v27 = vsel %vm3340_vm10, %v4978_v46, 0.0 }
 0xbb4   : > { %3712 = vadd.xlane.f32.xlu0 %v3711_v27 }
 0xc35   : > { %v3707_v6 = vpop.xlane.xlu0 %3706 }
 0xc36   : > { %4979 = vlog2.f32 %v3707_v6 }
 0xc39   : > { %v3704_v20 = vpop.xlane.xlu0 %3703 }
 0xc3a   : > { %4981 = vlog2.f32 %v3704_v20 }
 0xc3d   : > { %v3710_v53 = vpop.xlane.xlu0 %3709 }
 0xc3e   : > { %4983 = vlog2.f32 %v3710_v53 }
 0xc40   : > { %v4980_v34 = vpop.eup %4979 }
 0xc41   : > { %v3717_v52 = vmul.f32 0.6931472, %v4980_v34  ;;  %v3713_v13 = vpop.xlane.xlu0 %3712 }
 0xc42   : > { %4985 = vlog2.f32 %v3713_v13 }
 0xc43   : > { %v3723_v44 = vsub.f32 %v3691_v41, %v3717_v52 }
 0xc44   : > { %v4982_v23 = vpop.eup %4981 }
 0xc45   : > { %3727 = vst.msk [vmem:[%s441_s4 + $0x8] sm:$0xff] %vm3340_vm10, %v3723_v44  ;;  %v3715_v33 = vmul.f32 0.6931472, %v4982_v23 }
 0xc47   : > { %v3722_v5 = vsub.f32 %v3690_v18, %v3715_v33 }
 0xc48   : > { %v4984_v26 = vpop.eup %4983 }
 0xc49   : > { %3726 = vst.msk [vmem:[%s441_s4] sm:$0xff] %vm3340_vm10, %v3722_v5  ;;  %v3719_v42 = vmul.f32 0.6931472, %v4984_v26 }
 0xc4b   : > { %v3724_v9 = vsub.f32 %v3692_v48, %v3719_v42 }
 0xc4c   : > { %v4986_v30 = vpop.eup %4985 }
 0xc4d   : > { %3728 = vst.msk [vmem:[%s441_s4 + $0x10] sm:$0xff] %vm3340_vm10, %v3724_v9  ;;  %v3721_v40 = vmul.f32 0.6931472, %v4986_v30 }
 0xc4f   : > { %v3725_v4 = vsub.f32 %v3693_v31, %v3721_v40 }
 0xc51   : > { %3729 = vst.msk [vmem:[%s441_s4 + $0x18] sm:$0xff] %vm3340_vm10, %v3725_v4 }
 0xc52   : > { %5228 = shalt.err (!%p5225_p7)
}
 0xc53   : > { %s5229_s2 = scalar_lea.hbm %s6592_s10, 512  ;;  %s5233_s16 = scalar_lea.hbm %s6646_s8, 2048 }
 0xc54   : > { %p5230_p8 = scmp.ne.s32.totalorder %s6592_s10, %s5229_s2  ;;  %p5234_p1 = scmp.lt.u32.totalorder %s6592_s10, %s6646_s8 }
 0xc55   : > { %p5235_p3 = scmp.lt.u32.totalorder %s5233_s16, %s5229_s2  ;;  %p5237_p9 = scmp.lt.u32.totalorder %s5229_s2, %s6592_s10 }
 0xc56   : > { %p5231_p12 = pnand %p5230_p8, %p6738_p10 }
 0xc57   : > { %p5236_p2 = por %p5235_p3, %p5234_p1 }
 0xc58   : > { %p5232_p13 = pneg %p5231_p12 }
 0xc59   : > { %p5238_p4 = por %p5237_p9, %p5236_p2 }
 0xc5b   : > { %p5239_p6 = pnand %p5238_p4, %p5232_p13 }
 0xc5d   : > { %5242 = shalt.err (!%p5239_p6)
}
 0xc5e   : > { %s5329_s25 = smov 128   ;;  %s5330_s21 = smov 8  }
 0xc5f   : > { %4556 = dma.vmem_to_hbm [thread:$0]  (%p6738_p10), %s6594_s24, 512, %s6592_s10, %s3731_s3, %s5329_s25, %s5329_s25, %s5330_s21  }
 0xc60 PF: > { %p4601_p0 = scmp.ge.s32.totalorder %s5301_s30, 2  ;;  %s3759_s4 = sand.u32 1, %s5289_s27  }
 0xc61   : > { %p6739_p5 = scmp.ne.s32.totalorder %s6689_s14, 0  ;;  %s3760_s13 = scalar_lea.sflag [#allocation4], %s3759_s4 }
 0xc63   : > { %p4585_p11 = pnand %p4601_p0, %p6739_p5 }
 0xc65   : > { %5284 = dma.done.wait (!%p4585_p11), %s3760_s13, 512  }
 0xc66   : > { %5286 = vsyncadd (!%p4585_p11), %s3760_s13, 4294966784  ;;  %p27_p7 = scmp.ge.s32.totalorder %s5560_s15, 6   ;;  %s6740_s27 = smov %s5293_s28 }
 0xc67   : > { %s6741_s28 = smov %s5297_s29  ;;  %s6742_s29 = smov %s5571_s22 }
 0xc68   : > { %s6743_s30 = smov %s5560_s15  ;;  %29 = sbr.rel (!%p27_p7) target bundleno = 17 (0x11), region = 134 }
 0xc6f   :  { %3765 = vsyncpa [#allocation3], 1 }
 0xc70   :  { %3767 = vsyncpa [#allocation3 + $0x1], 1 }
 0xc71   :  { %3768 = vsyncpa [#allocation6], 1 }
 0xc72   :  { %3770 = vsyncpa [#allocation6 + $0x1], 1 }
 0xc73   :  { %3771 = vsyncpa [#allocation9], 1 }
 0xc74   :  { %3772 = vsyncpa [#allocation12], 1 }
 0xc75   :  { %3773 = vsyncpa [#allocation15], 1 }
 0xc76   :  { %3774 = vsyncpa [#allocation4], 1 }
 0xc77   :  { %3776 = vsyncpa [#allocation4 + $0x1], 1 }

</bundles_post_ra>
